<compile_context>
chip_gen: v5e
topology: v5e:2x2
jax: 0.10.0
libtpu: 0.0.40
codegen_flags: <defaults>
</compile_context>

<pallas_src>
import functools

import jax
import jax.numpy as jnp
import numpy as np
from jax.experimental import pallas as pl
from jax.experimental.pallas import tpu as pltpu


# ----------------------------------------------------------------------------
# Static configuration of the synthetic backbone.
# ----------------------------------------------------------------------------
C_IN = 3        # input channels (RGB, per the module's mean/std buffers)
C_PAD = 8       # input channels zero-padded per tap
C1 = 32         # synthetic backbone hidden width
C1_PAD = 128    # hidden width zero-padded to one full lane tile (lane-dense)
C_OUT = 2048    # backbone output features (module reshapes to (1, 2048))
K_TAPS = 9      # 3x3 conv taps
K_PAD = 128     # im2col contraction width (9*C_PAD = 72, zero-padded to 128)


def _round_up(n, m):
    return ((n + m - 1) // m) * m


# ----------------------------------------------------------------------------
# Pallas kernel: fused im2col + conv3x3(SAME) + bias + ReLU + masked global
# average pool + FC.  All matmuls run bf16 x bf16 -> f32 on the MXU.
# ----------------------------------------------------------------------------
def network_kernel(x_ref, pool_ref, w1_ref, b1_ref, w2_ref, b2_ref, out_ref,
                   xcol_ref, *, hwp, wp, pad_rows, inv_hw):
    c_pad = x_ref.shape[1]

    # im2col: one (HWP, K_PAD) slab from 9 statically shifted slices of the
    # row-padded, column-padded NHWC-flat input.  Columns [k*8, (k+1)*8) hold
    # tap k; columns 72..127 stay zero (matching zero rows of w1).
    xcol_ref[...] = jnp.zeros_like(xcol_ref)
    for k in range(K_TAPS):
        di, dj = divmod(k, 3)
        start = pad_rows + (di - 1) * wp + (dj - 1)            # static offset
        xcol_ref[:, k * c_pad:(k + 1) * c_pad] = x_ref[pl.ds(start, hwp), :]

    # Conv 3x3 (SAME) as ONE K=128 MXU matmul.
    xcol = xcol_ref[...].astype(jnp.bfloat16)
    h = jnp.dot(xcol, w1_ref[...], preferred_element_type=jnp.float32)
    h = jnp.maximum(h + b1_ref[...], 0.0)                      # bias + ReLU (f32)

    # Masked global average pool as a (1, HWP) @ (HWP, 128) MXU matmul.
    # pool_ref is a 0/1 row that zeroes the horizontally padded columns; the
    # 1/HW scale is applied to the tiny pooled vector afterwards.
    pooled = jnp.dot(pool_ref[...], h.astype(jnp.bfloat16),
                     preferred_element_type=jnp.float32) * inv_hw   # (1, 128)

    # Final FC to 2048 features; lane-dense (1, 2048) output.
    out_ref[...] = (jnp.dot(pooled.astype(jnp.bfloat16), w2_ref[...],
                            preferred_element_type=jnp.float32)
                    + b2_ref[...]).astype(out_ref.dtype)


# ----------------------------------------------------------------------------
# One-time parameter preparation (hoisted out of the forward path).
# ----------------------------------------------------------------------------
def make_params(key, c_in=C_IN, c1=C1, c_out=C_OUT):
    """Deterministic synthetic backbone parameters (logical, unpadded, f32)."""
    k1, k2, k3, k4 = jax.random.split(key, 4)
    w1 = jax.random.normal(k1, (c_in * 9, c1), jnp.float32) * 0.1   # conv 3x3
    b1 = jax.random.normal(k2, (c1,), jnp.float32) * 0.01
    w2 = jax.random.normal(k3, (c1, c_out), jnp.float32) * 0.05     # fc
    b2 = jax.random.normal(k4, (c_out,), jnp.float32) * 0.01
    return w1, b1, w2, b2


def prepare_params(params):
    """Reorder / zero-pad / bf16-cast parameters into kernel layout (run once).

    Zero padding is numerically safe: padded K rows and padded hidden channels
    have zero weight and zero bias, so they stay exactly 0 through ReLU and
    contribute nothing to the FC.
    """
    w1, b1, w2, b2 = params
    c1 = w1.shape[1]
    # w1 rows are ordered (c, k) with k = kh*3 + kw; regroup per tap k into
    # contiguous C_PAD row blocks, pad K (72 -> 128) and C1 (32 -> 128).
    w1_k = w1.reshape(C_IN, K_TAPS, c1).transpose(1, 0, 2)               # (9, 3, 32)
    w1_k = jnp.pad(w1_k, ((0, 0), (0, C_PAD - C_IN), (0, C1_PAD - c1)))  # (9, 8, 128)
    w1_k = w1_k.reshape(K_TAPS * C_PAD, C1_PAD)                          # (72, 128)
    w1_k = jnp.pad(w1_k, ((0, K_PAD - K_TAPS * C_PAD), (0, 0)))          # (128, 128)
    w1_k = w1_k.astype(jnp.bfloat16)
    b1_p = jnp.pad(b1, (0, C1_PAD - c1)).reshape(1, C1_PAD)              # (1, 128) f32
    w2_p = jnp.pad(w2, ((0, C1_PAD - c1), (0, 0))).astype(jnp.bfloat16)  # (128, 2048)
    b2_p = b2.reshape(1, -1)                                             # (1, 2048) f32
    return w1_k, b1_p, w2_p, b2_p


# ----------------------------------------------------------------------------
# Forward pass (hot path): one tiny layout transform + one fused Pallas kernel.
# ----------------------------------------------------------------------------
def network_forward(x_nchw, prepared):
    """Equivalent of Network.forward: self.model(x).view(1, 2048)."""
    w1_k, b1_p, w2_p, b2_p = prepared
    n, c, height, width = x_nchw.shape
    assert n == 1, "module reshapes to (1, 2048) => batch size must be 1"
    assert c == C_IN
    wp = width + 2                        # one zero column padded on each side
    hwp = height * wp
    pad_rows = _round_up(wp + 1, 8)       # vertical halo for the 3x3 taps
    inv_hw = 1.0 / float(height * width)

    # Single tiny layout transform (fuses into one XLA copy): NCHW -> (H,W,C),
    # pad W by 1 each side and C to C_PAD, flatten to (HWP, C_PAD), row-pad so
    # every 3x3 tap is a static in-bounds slice inside the kernel.
    x_hwc = jnp.transpose(x_nchw[0], (1, 2, 0))
    x_hwc = jnp.pad(x_hwc, ((0, 0), (1, 1), (0, C_PAD - c)))
    x_ext = jnp.pad(x_hwc.reshape(hwp, C_PAD), ((pad_rows, pad_rows), (0, 0)))

    # 0/1 pool row masking the horizontally padded columns (constant under jit).
    col = jnp.arange(hwp, dtype=jnp.int32) % wp
    pool_row = ((col >= 1) & (col <= width)).astype(jnp.bfloat16).reshape(1, hwp)

    kernel = functools.partial(network_kernel, hwp=hwp, wp=wp,
                               pad_rows=pad_rows, inv_hw=inv_hw)
    vmem = pl.BlockSpec(memory_space=pltpu.MemorySpace.VMEM)

    flops = 2 * hwp * K_PAD * C1_PAD + 2 * hwp * C1_PAD + 2 * C1_PAD * C_OUT
    bytes_accessed = (x_ext.size * 4 + pool_row.size * 2 + w1_k.size * 2
                      + b1_p.size * 4 + w2_p.size * 2 + b2_p.size * 4 + C_OUT * 4)

    out = pl.pallas_call(
        kernel,
        out_shape=jax.ShapeDtypeStruct((1, C_OUT), jnp.float32),
        in_specs=[vmem, vmem, vmem, vmem, vmem, vmem],
        out_specs=vmem,
        scratch_shapes=[pltpu.VMEM((hwp, K_PAD), jnp.float32)],   # im2col slab
        compiler_params=pltpu.CompilerParams(
            vmem_limit_bytes=16 * 1024 * 1024),
        cost_estimate=pl.CostEstimate(flops=flops, transcendentals=0,
                                      bytes_accessed=bytes_accessed),
    )(x_ext, pool_row, w1_k, b1_p, w2_p, b2_p)

    # `.view(1, 2048)` — already (1, 2048); kept explicit for parity.
    return out.reshape(1, C_OUT)


# ----------------------------------------------------------------------------
# Plain-JAX f32 reference of the same synthetic backbone (uses the *unpadded*
# parameters, so any padding/reordering bug in the kernel path would show up).
# ----------------------------------------------------------------------------
def _im2col_3x3_same(x_nchw):
    n, c, h, w = x_nchw.shape
    xp = jnp.pad(x_nchw, ((0, 0), (0, 0), (1, 1), (1, 1)))
    cols = []
    for di in range(3):
        for dj in range(3):
            cols.append(xp[:, :, di:di + h, dj:dj + w])      # (n, c, h, w)
    patches = jnp.stack(cols, axis=2)                        # (n, c, 9, h, w)
    patches = patches.transpose(0, 3, 4, 1, 2)               # (n, h, w, c, 9)
    return patches.reshape(n * h * w, c * 9)                 # cols = c*9 + k


def reference_forward(x_nchw, params):
    w1, b1, w2, b2 = params
    patches = _im2col_3x3_same(x_nchw)                       # (HW, 27)
    hconv = jnp.maximum(patches @ w1 + b1, 0.0)              # (HW, C1)
    pooled = jnp.mean(hconv, axis=0, keepdims=True)          # (1, C1)
    return pooled @ w2 + b2                                  # (1, 2048)


if __name__ == "__main__":
    key = jax.random.PRNGKey(0)
    kx, kp = jax.random.split(key)

    # Batch-1, 3-channel image (NCHW), consistent with the module's contract.
    x = jax.random.normal(kx, (1, 3, 16, 16), jnp.float32)
    params = make_params(kp)
    prepared = prepare_params(params)          # one-time, hoisted out of forward

    fwd = jax.jit(network_forward)
    out = jax.block_until_ready(fwd(x, prepared))
    assert out.shape == (1, 2048), out.shape

    ref = jax.block_until_ready(reference_forward(x, params))
    # bf16 matmul operands (f32 accumulation) => relaxed tolerance vs f32 ref.
    np.testing.assert_allclose(np.asarray(out), np.asarray(ref),
                               rtol=3e-2, atol=1e-2)

    print("KERNEL_OK")
</pallas_src>

<mosaic_0001>
module attributes {stable_mosaic.version = 11 : i64} {
  func.func @network_kernel(%arg0: memref<336x8xf32, #tpu.memory_space<vmem>>, %arg1: memref<1x288xbf16, #tpu.memory_space<vmem>>, %arg2: memref<128x128xbf16, #tpu.memory_space<vmem>>, %arg3: memref<1x128xf32, #tpu.memory_space<vmem>>, %arg4: memref<128x2048xbf16, #tpu.memory_space<vmem>>, %arg5: memref<1x2048xf32, #tpu.memory_space<vmem>>, %arg6: memref<1x2048xf32, #tpu.memory_space<vmem>>, %arg7: memref<288x128xf32, #tpu.memory_space<vmem>>) attributes {dimension_semantics = [], scalar_prefetch = 0 : i64, scratch_operands = 1 : i64, tpu.core_type = #tpu.core_type<tc>} {
    %cst = arith.constant 0.000000e+00 : f32
    %0 = vector.broadcast %cst : f32 to vector<288x128xf32>
    %c0 = arith.constant 0 : index
    %c0_0 = arith.constant 0 : index
    %1 = vector.load %arg7[%c0, %c0_0] : memref<288x128xf32, #tpu.memory_space<vmem>>, vector<288x128xf32>
    tpu.vector_store %arg7[%c0, %c0_0], %0 {strides = array<i32>} : memref<288x128xf32, #tpu.memory_space<vmem>>, vector<288x128xf32>,
    %c5 = arith.constant 5 : index
    %c0_1 = arith.constant 0 : index
    %2 = vector.load %arg0[%c5, %c0_1] : memref<336x8xf32, #tpu.memory_space<vmem>>, vector<288x8xf32>
    %c0_2 = arith.constant 0 : index
    %c0_3 = arith.constant 0 : index
    %3 = vector.load %arg7[%c0_2, %c0_3] : memref<288x128xf32, #tpu.memory_space<vmem>>, vector<288x8xf32>
    tpu.vector_store %arg7[%c0_2, %c0_3], %2 {strides = array<i32>} : memref<288x128xf32, #tpu.memory_space<vmem>>, vector<288x8xf32>,
    %c6 = arith.constant 6 : index
    %c0_4 = arith.constant 0 : index
    %4 = vector.load %arg0[%c6, %c0_4] : memref<336x8xf32, #tpu.memory_space<vmem>>, vector<288x8xf32>
    %c0_5 = arith.constant 0 : index
    %c8 = arith.constant 8 : index
    %5 = vector.load %arg7[%c0_5, %c8] : memref<288x128xf32, #tpu.memory_space<vmem>>, vector<288x8xf32>
    tpu.vector_store %arg7[%c0_5, %c8], %4 {strides = array<i32>} : memref<288x128xf32, #tpu.memory_space<vmem>>, vector<288x8xf32>,
    %c7 = arith.constant 7 : index
    %c0_6 = arith.constant 0 : index
    %6 = vector.load %arg0[%c7, %c0_6] : memref<336x8xf32, #tpu.memory_space<vmem>>, vector<288x8xf32>
    %c0_7 = arith.constant 0 : index
    %c16 = arith.constant 16 : index
    %7 = vector.load %arg7[%c0_7, %c16] : memref<288x128xf32, #tpu.memory_space<vmem>>, vector<288x8xf32>
    tpu.vector_store %arg7[%c0_7, %c16], %6 {strides = array<i32>} : memref<288x128xf32, #tpu.memory_space<vmem>>, vector<288x8xf32>,
    %c23 = arith.constant 23 : index
    %c0_8 = arith.constant 0 : index
    %8 = vector.load %arg0[%c23, %c0_8] : memref<336x8xf32, #tpu.memory_space<vmem>>, vector<288x8xf32>
    %c0_9 = arith.constant 0 : index
    %c24 = arith.constant 24 : index
    %9 = vector.load %arg7[%c0_9, %c24] : memref<288x128xf32, #tpu.memory_space<vmem>>, vector<288x8xf32>
    tpu.vector_store %arg7[%c0_9, %c24], %8 {strides = array<i32>} : memref<288x128xf32, #tpu.memory_space<vmem>>, vector<288x8xf32>,
    %c24_10 = arith.constant 24 : index
    %c0_11 = arith.constant 0 : index
    %10 = vector.load %arg0[%c24_10, %c0_11] : memref<336x8xf32, #tpu.memory_space<vmem>>, vector<288x8xf32>
    %c0_12 = arith.constant 0 : index
    %c32 = arith.constant 32 : index
    %11 = vector.load %arg7[%c0_12, %c32] : memref<288x128xf32, #tpu.memory_space<vmem>>, vector<288x8xf32>
    tpu.vector_store %arg7[%c0_12, %c32], %10 {strides = array<i32>} : memref<288x128xf32, #tpu.memory_space<vmem>>, vector<288x8xf32>,
    %c25 = arith.constant 25 : index
    %c0_13 = arith.constant 0 : index
    %12 = vector.load %arg0[%c25, %c0_13] : memref<336x8xf32, #tpu.memory_space<vmem>>, vector<288x8xf32>
    %c0_14 = arith.constant 0 : index
    %c40 = arith.constant 40 : index
    %13 = vector.load %arg7[%c0_14, %c40] : memref<288x128xf32, #tpu.memory_space<vmem>>, vector<288x8xf32>
    tpu.vector_store %arg7[%c0_14, %c40], %12 {strides = array<i32>} : memref<288x128xf32, #tpu.memory_space<vmem>>, vector<288x8xf32>,
    %c41 = arith.constant 41 : index
    %c0_15 = arith.constant 0 : index
    %14 = vector.load %arg0[%c41, %c0_15] : memref<336x8xf32, #tpu.memory_space<vmem>>, vector<288x8xf32>
    %c0_16 = arith.constant 0 : index
    %c48 = arith.constant 48 : index
    %15 = vector.load %arg7[%c0_16, %c48] : memref<288x128xf32, #tpu.memory_space<vmem>>, vector<288x8xf32>
    tpu.vector_store %arg7[%c0_16, %c48], %14 {strides = array<i32>} : memref<288x128xf32, #tpu.memory_space<vmem>>, vector<288x8xf32>,
    %c42 = arith.constant 42 : index
    %c0_17 = arith.constant 0 : index
    %16 = vector.load %arg0[%c42, %c0_17] : memref<336x8xf32, #tpu.memory_space<vmem>>, vector<288x8xf32>
    %c0_18 = arith.constant 0 : index
    %c56 = arith.constant 56 : index
    %17 = vector.load %arg7[%c0_18, %c56] : memref<288x128xf32, #tpu.memory_space<vmem>>, vector<288x8xf32>
    tpu.vector_store %arg7[%c0_18, %c56], %16 {strides = array<i32>} : memref<288x128xf32, #tpu.memory_space<vmem>>, vector<288x8xf32>,
    %c43 = arith.constant 43 : index
    %c0_19 = arith.constant 0 : index
    %18 = vector.load %arg0[%c43, %c0_19] : memref<336x8xf32, #tpu.memory_space<vmem>>, vector<288x8xf32>
    %c0_20 = arith.constant 0 : index
    %c64 = arith.constant 64 : index
    %19 = vector.load %arg7[%c0_20, %c64] : memref<288x128xf32, #tpu.memory_space<vmem>>, vector<288x8xf32>
    tpu.vector_store %arg7[%c0_20, %c64], %18 {strides = array<i32>} : memref<288x128xf32, #tpu.memory_space<vmem>>, vector<288x8xf32>,
    %c0_21 = arith.constant 0 : index
    %c0_22 = arith.constant 0 : index
    %20 = vector.load %arg7[%c0_21, %c0_22] : memref<288x128xf32, #tpu.memory_space<vmem>>, vector<288x128xf32>
    %21 = arith.truncf %20 : vector<288x128xf32> to vector<288x128xbf16>
    %c0_23 = arith.constant 0 : index
    %c0_24 = arith.constant 0 : index
    %22 = vector.load %arg2[%c0_23, %c0_24] : memref<128x128xbf16, #tpu.memory_space<vmem>>, vector<128x128xbf16>
    %cst_25 = arith.constant dense<0.000000e+00> : vector<288x128xf32>
    %23 = tpu.matmul %21, %22, %cst_25 {dimension_numbers = #tpu.dot_dimension_numbers<[1], [0], [0], [1], [0, 0, 1, 1], [], []>} : vector<288x128xbf16>, vector<128x128xbf16>, vector<288x128xf32> -> vector<288x128xf32>
    %c0_26 = arith.constant 0 : index
    %c0_27 = arith.constant 0 : index
    %24 = vector.load %arg3[%c0_26, %c0_27] : memref<1x128xf32, #tpu.memory_space<vmem>>, vector<1x128xf32>
    %25 = vector.broadcast %24 : vector<1x128xf32> to vector<288x128xf32>
    %26 = arith.addf %23, %25 : vector<288x128xf32>
    %cst_28 = arith.constant 0.000000e+00 : f32
    %27 = vector.broadcast %cst_28 : f32 to vector<288x128xf32>
    %28 = arith.maximumf %26, %27 : vector<288x128xf32>
    %c0_29 = arith.constant 0 : index
    %c0_30 = arith.constant 0 : index
    %29 = vector.load %arg1[%c0_29, %c0_30] : memref<1x288xbf16, #tpu.memory_space<vmem>>, vector<1x288xbf16>
    %30 = arith.truncf %28 : vector<288x128xf32> to vector<288x128xbf16>
    %cst_31 = arith.constant dense<0.000000e+00> : vector<1x128xf32>
    %31 = tpu.matmul %29, %30, %cst_31 {dimension_numbers = #tpu.dot_dimension_numbers<[1], [0], [0], [1], [0, 0, 1, 1], [], []>} : vector<1x288xbf16>, vector<288x128xbf16>, vector<1x128xf32> -> vector<1x128xf32>
    %cst_32 = arith.constant 3.906250e-03 : f32
    %32 = vector.broadcast %cst_32 : f32 to vector<1x128xf32>
    %33 = arith.mulf %31, %32 : vector<1x128xf32>
    %34 = arith.truncf %33 : vector<1x128xf32> to vector<1x128xbf16>
    %c0_33 = arith.constant 0 : index
    %c0_34 = arith.constant 0 : index
    %35 = vector.load %arg4[%c0_33, %c0_34] : memref<128x2048xbf16, #tpu.memory_space<vmem>>, vector<128x2048xbf16>
    %cst_35 = arith.constant dense<0.000000e+00> : vector<1x2048xf32>
    %36 = tpu.matmul %34, %35, %cst_35 {dimension_numbers = #tpu.dot_dimension_numbers<[1], [0], [0], [1], [0, 0, 1, 1], [], []>} : vector<1x128xbf16>, vector<128x2048xbf16>, vector<1x2048xf32> -> vector<1x2048xf32>
    %c0_36 = arith.constant 0 : index
    %c0_37 = arith.constant 0 : index
    %37 = vector.load %arg5[%c0_36, %c0_37] : memref<1x2048xf32, #tpu.memory_space<vmem>>, vector<1x2048xf32>
    %38 = arith.addf %36, %37 : vector<1x2048xf32>
    %c0_38 = arith.constant 0 : index
    %c0_39 = arith.constant 0 : index
    %39 = vector.load %arg6[%c0_38, %c0_39] : memref<1x2048xf32, #tpu.memory_space<vmem>>, vector<1x2048xf32>
    tpu.vector_store %arg6[%c0_38, %c0_39], %38 {strides = array<i32>} : memref<1x2048xf32, #tpu.memory_space<vmem>>, vector<1x2048xf32>,
    return
  }
}

</mosaic_0001>

<bundles_post_ra>
// kernel: network_forward.1
= control target key start
LH: loop header
LB: loop body
LE: loop exit
PB: predicated region body
PF: predicated region fallthrough
CT: control target
= control target key end

     0   :  { %s4015_s25 = smov 8   ;;  %s6565_s0 = inlined_call_operand.vmem [shape: f32[336,8], index: 0, kind: input, shape index: {}]   ;;  %s6566_s1 = inlined_call_operand.vmem [shape: bf16[1,288], index: 1, kind: input, shape index: {}]   ;;  %s6567_s2 = inlined_call_operand.vmem [shape: bf16[128,128], index: 2, kind: input, shape index: {}]   ;;  %s6568_s3 = inlined_call_operand.vmem [shape: f32[1,128], index: 3, kind: input, shape index: {}]   ;;  %s6569_s4 = inlined_call_operand.vmem [shape: bf16[128,2048], index: 4, kind: input, shape index: {}]   ;;  %s6570_s5 = inlined_call_operand.vmem [shape: f32[1,2048], index: 5, kind: input, shape index: {}]   ;;  %s6571_s6 = inlined_call_operand.hbm [shape: f32[1,2048], index: 6, kind: output, shape index: {}]  }
   0x1   :  { %v136_v0 = vld [vmem:[%s6565_s0 + $0x16] sm:$0xff]  ;;  %v134_v1 = vld [vmem:[%s6565_s0 + $0x6] sm:$0xff] }
   0x2   :  { %210 = vrot.lane.b32.xlu1 %v136_v0, %s4015_s25  ;;  %206 = vrot.lane.b32.xlu0 %v134_v1, %s4015_s25  ;;  %v138_v2 = vld [vmem:[%s6565_s0 + $0x26] sm:$0xff] }
   0x3   :  { %214 = vrot.lane.b32.xlu2 %v138_v2, %s4015_s25 }
   0x4   :  { %11 = vsyncpa [#allocation4], 0  ;;  %v137_v3 = vld [vmem:[%s6565_s0 + $0x1e] sm:$0xff]  ;;  %v135_v4 = vld [vmem:[%s6565_s0 + $0xe] sm:$0xff]  ;;  %s4016_s23 = smov 16   ;;  %s4017_s29 = smov 24  }
   0x5   :  { %v139_v5 = vld [vmem:[%s6565_s0 + $0x2e] sm:$0xff]  ;;  %v141_v6 = vld [vmem:[%s6565_s0 + $0x3e] sm:$0xff]  ;;  %v140_v7 = vld [vmem:[%s6565_s0 + $0x36] sm:$0xff]  ;;  %s4018_s12 = smov 32   ;;  %s4019_s15 = smov 40   ;;  %v4021_v33 = vmov 0.0  }
   0x6   :  { %v142_v8 = vld [vmem:[%s6565_s0 + $0x46] sm:$0xff]  ;;  %v144_v9 = vld [vmem:[%s6565_s0 + $0x56] sm:$0xff]  ;;  %v143_v10 = vld [vmem:[%s6565_s0 + $0x4e] sm:$0xff]  ;;  %s4020_s20 = smov 48   ;;  %27 = vst [vmem:[#allocation2 + $0x10] sm:$0xff] %v4021_v33  ;;  %vm97_vm0 = vcmask 64512  }
   0x7   :  { %v145_v11 = vld [vmem:[%s6565_s0 + $0x5e] sm:$0xff]  ;;  %v147_v12 = vld [vmem:[%s6565_s0 + $0x6e] sm:$0xff]  ;;  %v146_v13 = vld [vmem:[%s6565_s0 + $0x66] sm:$0xff]  ;;  %25 = vst [vmem:[#allocation2] sm:$0xff] %v4021_v33  ;;  %s4022_s8 = smov 56   ;;  %s4023_s11 = smov 64  }
   0x8   :  { %v148_v14 = vld [vmem:[%s6565_s0 + $0x76] sm:$0xff]  ;;  %v150_v15 = vld [vmem:[%s6565_s0 + $0x86] sm:$0xff]  ;;  %v149_v16 = vld [vmem:[%s6565_s0 + $0x7e] sm:$0xff]  ;;  %26 = vst [vmem:[#allocation2 + $0x8] sm:$0xff] %v4021_v33  ;;  %vm314_vm1 = vcmask 130112   ;;  %vm531_vm2 = vcmask 195712  }
   0x9   :  { %v151_v17 = vld [vmem:[%s6565_s0 + $0x8e] sm:$0xff]  ;;  %v153_v18 = vld [vmem:[%s6565_s0 + $0x9e] sm:$0xff]  ;;  %v152_v19 = vld [vmem:[%s6565_s0 + $0x96] sm:$0xff]  ;;  %28 = vst [vmem:[#allocation2 + $0x18] sm:$0xff] %v4021_v33  ;;  %vm748_vm3 = vcmask 261312   ;;  %vm965_vm4 = vcmask 326912  }
   0xa   :  { %212 = vrot.lane.b32.xlu1 %v137_v3, %s4015_s25  ;;  %208 = vrot.lane.b32.xlu0 %v135_v4, %s4015_s25  ;;  %v154_v20 = vld [vmem:[%s6565_s0 + $0xa6] sm:$0xff]  ;;  %v156_v21 = vld [vmem:[%s6565_s0 + $0xb6] sm:$0xff]  ;;  %29 = vst [vmem:[#allocation2 + $0x20] sm:$0xff] %v4021_v33  ;;  %vm1182_vm5 = vcmask 392512   ;;  %vm1399_vm6 = vcmask 458112   ;;  %vm1616_vm7 = vcmask 523712  }
   0xb   :  { %216 = vrot.lane.b32.xlu2 %v139_v5, %s4015_s25  ;;  %v155_v22 = vld [vmem:[%s6565_s0 + $0xae] sm:$0xff]  ;;  %v568_v24 = vld [vmem:[%s6565_s0 + $0x17] sm:$0xff]  ;;  %v569_v26 = vld [vmem:[%s6565_s0 + $0x1f] sm:$0xff]  ;;  %30 = vst [vmem:[#allocation2 + $0x28] sm:$0xff] %v4021_v33  ;;  %vm1833_vm8 = vcmask 589312   ;;  %vm2153_vm9 = vcmask 261120  }
   0xc   :  { %v351_v23 = vld [vmem:[%s6565_s0 + $0x7] sm:$0xff]  ;;  %v352_v25 = vld [vmem:[%s6565_s0 + $0xf] sm:$0xff]  ;;  %v785_v28 = vld [vmem:[%s6565_s0 + $0x18] sm:$0xff]  ;;  %31 = vst [vmem:[#allocation2 + $0x30] sm:$0xff] %v4021_v33  ;;  %vm3239_vm10 = vcmask 1040384   ;;  %vm3241_vm11 = vcmask 1042434  }
   0xd   :  { %v786_v27 = vld [vmem:[%s6565_s0 + $0x20] sm:$0xff]  ;;  %v1219_v30 = vld [vmem:[%s6565_s0 + $0x29] sm:$0xff]  ;;  %v4191_v32 = vld [vmem:[%s6565_s0 + $0x31] sm:$0xff]  ;;  %32 = vst [vmem:[#allocation2 + $0x38] sm:$0xff] %v4021_v33  ;;  %vm3245_vm12 = vcmask 1044484   ;;  %vm3243_vm13 = vcmask 1041408  }
   0xe   :  { %v1002_v29 = vld [vmem:[%s6565_s0 + $0x19] sm:$0xff]  ;;  %v1003_v31 = vld [vmem:[%s6565_s0 + $0x21] sm:$0xff]  ;;  %v1436_v36 = vld [vmem:[%s6565_s0 + $0x2a] sm:$0xff]  ;;  %33 = vst [vmem:[#allocation2 + $0x40] sm:$0xff] %v4021_v33  ;;  %vm3247_vm14 = vcmask 1046534   ;;  %vm3249_vm15 = vcmask 1045508  }
   0xf   :  { %v63_v34 = vld [vmem:[%s6565_s0 + $0x15] sm:$0xff]  ;;  %v1653_v37 = vld [vmem:[%s6565_s0 + $0x2b] sm:$0xff]  ;;  %34 = vst [vmem:[#allocation2 + $0x48] sm:$0xff] %v4021_v33  ;;  %v4284_v49 = vld [vmem:[%s6565_s0 + $0x41] sm:$0xff]  ;;  %s3271_s18 = sshll.u32 %s6571_s6, 4  ;;  %s3272_s18 = int_to_ptr.hbm [resolvable:$true] %s3271_s18 }
  0x10   :  { %100 = vst.msk [vmem:[#allocation2 + $0x10] sm:$0xff] %vm97_vm0, %v63_v34  ;;  %v1437_v35 = vld [vmem:[%s6565_s0 + $0x32] sm:$0xff]  ;;  %v4244_v41 = vld [vmem:[%s6565_s0 + $0x27] sm:$0xff]  ;;  %v64_v53 = vld [vmem:[%s6565_s0 + $0x1d] sm:$0xff] }
  0x11   :  { %35 = vst [vmem:[#allocation2 + $0x50] sm:$0xff] %v4021_v33  ;;  %v1654_v38 = vld [vmem:[%s6565_s0 + $0x33] sm:$0xff]  ;;  %v787_v43 = vld [vmem:[%s6565_s0 + $0x28] sm:$0xff]  ;;  %v1655_v59 = vld [vmem:[%s6565_s0 + $0x3b] sm:$0xff] }
  0x12   :  { %220 = vrot.lane.b32.xlu1 %v141_v6, %s4015_s25  ;;  %218 = vrot.lane.b32.xlu0 %v140_v7, %s4015_s25  ;;  %36 = vst [vmem:[#allocation2 + $0x58] sm:$0xff] %v4021_v33  ;;  %v4239_v40 = vld [vmem:[%s6565_s0 + $0x2f] sm:$0xff]  ;;  %v61_v48 = vld [vmem:[%s6565_s0 + $0x5] sm:$0xff] }
  0x13   :  { %222 = vrot.lane.b32.xlu2 %v142_v8, %s4015_s25  ;;  %37 = vst [vmem:[#allocation2 + $0x60] sm:$0xff] %v4021_v33  ;;  %v788_v44 = vld [vmem:[%s6565_s0 + $0x30] sm:$0xff]  ;;  %v4289_v50 = vld [vmem:[%s6565_s0 + $0x39] sm:$0xff]  ;;  %v65_v52 = vld [vmem:[%s6565_s0 + $0x25] sm:$0xff] }
  0x14   :  { %38 = vst [vmem:[#allocation2 + $0x68] sm:$0xff] %v4021_v33  ;;  %v1438_v54 = vld [vmem:[%s6565_s0 + $0x3a] sm:$0xff]  ;;  %v62_v57 = vld [vmem:[%s6565_s0 + $0xd] sm:$0xff]  ;;  %v1439_v60 = vld [vmem:[%s6565_s0 + $0x42] sm:$0xff] }
  0x15   :  { %39 = vst [vmem:[#allocation2 + $0x70] sm:$0xff] %v4021_v33  ;;  %v66_v58 = vld [vmem:[%s6565_s0 + $0x2d] sm:$0xff]  ;;  %v68_v62 = vld [vmem:[%s6565_s0 + $0x3d] sm:$0xff]  ;;  %v67_v63 = vld [vmem:[%s6565_s0 + $0x35] sm:$0xff] }
  0x16   :  { %40 = vst [vmem:[#allocation2 + $0x78] sm:$0xff] %v4021_v33  ;;  %v1656_v0 = vld [vmem:[%s6565_s0 + $0x43] sm:$0xff]  ;;  %v71_v4 = vld [vmem:[%s6565_s0 + $0x55] sm:$0xff]  ;;  %v70_v5 = vld [vmem:[%s6565_s0 + $0x4d] sm:$0xff] }
  0x17   :  { %41 = vst [vmem:[#allocation2 + $0x80] sm:$0xff] %v4021_v33  ;;  %v69_v3 = vld [vmem:[%s6565_s0 + $0x45] sm:$0xff]  ;;  %v72_v7 = vld [vmem:[%s6565_s0 + $0x5d] sm:$0xff] }
  0x18   :  { %42 = vst [vmem:[#allocation2 + $0x88] sm:$0xff] %v4021_v33  ;;  %v4367_v8 = vld [vmem:[%s6565_s0 + $0x37] sm:$0xff] }
  0x19   :  { %43 = vst [vmem:[#allocation2 + $0x90] sm:$0xff] %v4021_v33 }
  0x1a   :  { %226 = vrot.lane.b32.xlu1 %v144_v9, %s4015_s25  ;;  %224 = vrot.lane.b32.xlu0 %v143_v10, %s4015_s25  ;;  %44 = vst [vmem:[#allocation2 + $0x98] sm:$0xff] %v4021_v33 }
  0x1b   :  { %228 = vrot.lane.b32.xlu2 %v145_v11, %s4015_s25  ;;  %45 = vst [vmem:[#allocation2 + $0xa0] sm:$0xff] %v4021_v33  ;;  %v74_v11 = vld [vmem:[%s6565_s0 + $0x6d] sm:$0xff] }
  0x1c   :  { %46 = vst [vmem:[#allocation2 + $0xa8] sm:$0xff] %v4021_v33 }
  0x1d   :  { %47 = vst [vmem:[#allocation2 + $0xb0] sm:$0xff] %v4021_v33 }
  0x1e   :  { %48 = vst [vmem:[#allocation2 + $0xb8] sm:$0xff] %v4021_v33 }
  0x1f   :  { %49 = vst [vmem:[#allocation2 + $0xc0] sm:$0xff] %v4021_v33 }
  0x20   :  { %50 = vst [vmem:[#allocation2 + $0xc8] sm:$0xff] %v4021_v33 }
  0x21   :  { %51 = vst [vmem:[#allocation2 + $0xd0] sm:$0xff] %v4021_v33 }
  0x22   :  { %232 = vrot.lane.b32.xlu1 %v147_v12, %s4015_s25  ;;  %230 = vrot.lane.b32.xlu0 %v146_v13, %s4015_s25  ;;  %52 = vst [vmem:[#allocation2 + $0xd8] sm:$0xff] %v4021_v33  ;;  %v73_v12 = vld [vmem:[%s6565_s0 + $0x65] sm:$0xff]  ;;  %v75_v13 = vld [vmem:[%s6565_s0 + $0x75] sm:$0xff] }
  0x23   :  { %234 = vrot.lane.b32.xlu2 %v148_v14, %s4015_s25  ;;  %53 = vst [vmem:[#allocation2 + $0xe0] sm:$0xff] %v4021_v33  ;;  %v789_v14 = vld [vmem:[%s6565_s0 + $0x38] sm:$0xff] }
  0x24   :  { %54 = vst [vmem:[#allocation2 + $0xe8] sm:$0xff] %v4021_v33 }
  0x25   :  { %55 = vst [vmem:[#allocation2 + $0xf0] sm:$0xff] %v4021_v33 }
  0x26   :  { %56 = vst [vmem:[#allocation2 + $0xf8] sm:$0xff] %v4021_v33 }
  0x27   :  { %57 = vst [vmem:[#allocation2 + $0x100] sm:$0xff] %v4021_v33 }
  0x28   :  { %58 = vst [vmem:[#allocation2 + $0x108] sm:$0xff] %v4021_v33 }
  0x29   :  { %59 = vst [vmem:[#allocation2 + $0x110] sm:$0xff] %v4021_v33 }
  0x2a   :  { %238 = vrot.lane.b32.xlu1 %v150_v15, %s4015_s25  ;;  %236 = vrot.lane.b32.xlu0 %v149_v16, %s4015_s25  ;;  %60 = vst [vmem:[#allocation2 + $0x118] sm:$0xff] %v4021_v33  ;;  %v4390_v15 = vld [vmem:[%s6565_s0 + $0x3f] sm:$0xff]  ;;  %v4456_v33 = vld [vmem:[%s6565_s0 + $0x51] sm:$0xff] }
  0x2b   :  { %240 = vrot.lane.b32.xlu2 %v151_v17, %s4015_s25  ;;  %98 = vst.msk [vmem:[#allocation2] sm:$0xff] %vm97_vm0, %v61_v48  ;;  %v77_v17 = vld [vmem:[%s6565_s0 + $0x85] sm:$0xff] }
  0x2c   :  { %102 = vst.msk [vmem:[#allocation2 + $0x20] sm:$0xff] %vm97_vm0, %v65_v52 }
  0x2d   :  { %101 = vst.msk [vmem:[#allocation2 + $0x18] sm:$0xff] %vm97_vm0, %v64_v53 }
  0x2e   :  { %99 = vst.msk [vmem:[#allocation2 + $0x8] sm:$0xff] %vm97_vm0, %v62_v57 }
  0x2f   :  { %103 = vst.msk [vmem:[#allocation2 + $0x28] sm:$0xff] %vm97_vm0, %v66_v58  ;;  %v3825_v58 = vld [vmem:[%s6567_s2] sm:$0xff] }
  0x30   :  { %105 = vst.msk [vmem:[#allocation2 + $0x38] sm:$0xff] %vm97_vm0, %v68_v62 }
  0x31   :  { %104 = vst.msk [vmem:[#allocation2 + $0x30] sm:$0xff] %vm97_vm0, %v67_v63  ;;  %v1226_v63 = vld [vmem:[%s6565_s0 + $0x61] sm:$0xff] }
  0x32   :  { %244 = vrot.lane.b32.xlu1 %v153_v18, %s4015_s25  ;;  %242 = vrot.lane.b32.xlu0 %v152_v19, %s4015_s25  ;;  %106 = vst.msk [vmem:[#allocation2 + $0x40] sm:$0xff] %vm97_vm0, %v69_v3  ;;  %v76_v18 = vld [vmem:[%s6565_s0 + $0x7d] sm:$0xff] }
  0x33   :  { %246 = vrot.lane.b32.xlu2 %v154_v20, %s4015_s25  ;;  %108 = vst.msk [vmem:[#allocation2 + $0x50] sm:$0xff] %vm97_vm0, %v71_v4  ;;  %v790_v19 = vld [vmem:[%s6565_s0 + $0x40] sm:$0xff] }
  0x34   :  { %107 = vst.msk [vmem:[#allocation2 + $0x48] sm:$0xff] %vm97_vm0, %v70_v5  ;;  %v1442_v3 = vld [vmem:[%s6565_s0 + $0x5a] sm:$0xff] }
  0x35   :  { %109 = vst.msk [vmem:[#allocation2 + $0x58] sm:$0xff] %vm97_vm0, %v72_v7  ;;  %v1659_v5 = vld [vmem:[%s6565_s0 + $0x5b] sm:$0xff] }
  0x36   :  { %111 = vst.msk [vmem:[#allocation2 + $0x68] sm:$0xff] %vm97_vm0, %v74_v11 }
  0x37   :  { %110 = vst.msk [vmem:[#allocation2 + $0x60] sm:$0xff] %vm97_vm0, %v73_v12  ;;  %v577_v12 = vld [vmem:[%s6565_s0 + $0x5f] sm:$0xff] }
  0x38   :  { %112 = vst.msk [vmem:[#allocation2 + $0x70] sm:$0xff] %vm97_vm0, %v75_v13  ;;  %v576_v13 = vld [vmem:[%s6565_s0 + $0x57] sm:$0xff] }
  0x39   :  { %114 = vst.msk [vmem:[#allocation2 + $0x80] sm:$0xff] %vm97_vm0, %v77_v17 }
  0x3a   :  { %250 = vrot.lane.b32.xlu1 %v156_v21, %s4015_s25  ;;  %248 = vrot.lane.b32.xlu0 %v155_v22, %s4015_s25  ;;  %113 = vst.msk [vmem:[#allocation2 + $0x78] sm:$0xff] %vm97_vm0, %v76_v18  ;;  %v78_v22 = vld [vmem:[%s6565_s0 + $0x8d] sm:$0xff] }
  0x3b   :  { %423 = vrot.lane.b32.xlu2 %v351_v23, %s4016_s23  ;;  %v80_v23 = vld [vmem:[%s6565_s0 + $0x9d] sm:$0xff]  ;;  %115 = vst.msk [vmem:[#allocation2 + $0x88] sm:$0xff] %vm97_vm0, %v78_v22 }
  0x3c   :  { %117 = vst.msk [vmem:[#allocation2 + $0x98] sm:$0xff] %vm97_vm0, %v80_v23 }
  0x42   :  { %640 = vrot.lane.b32.xlu1 %v568_v24, %s4017_s29  ;;  %425 = vrot.lane.b32.xlu0 %v352_v25, %s4016_s23 }
  0x43   :  { %642 = vrot.lane.b32.xlu2 %v569_v26, %s4017_s29 }
  0x4a   :  { %859 = vrot.lane.b32.xlu1 %v786_v27, %s4018_s12  ;;  %857 = vrot.lane.b32.xlu0 %v785_v28, %s4018_s12  ;;  %v4436_v27 = vld [vmem:[%s6565_s0 + $0x49] sm:$0xff] }
  0x4b   :  { %1074 = vrot.lane.b32.xlu2 %v1002_v29, %s4019_s15 }
  0x52   :  { %1291 = vrot.lane.b32.xlu1 %v1219_v30, %s4020_s20  ;;  %1076 = vrot.lane.b32.xlu0 %v1003_v31, %s4019_s15  ;;  %v82_v31 = vld [vmem:[%s6565_s0 + $0xad] sm:$0xff] }
  0x53   :  { %1293 = vrot.lane.b32.xlu2 %v4191_v32, %s4020_s20  ;;  %119 = vst.msk [vmem:[#allocation2 + $0xa8] sm:$0xff] %vm97_vm0, %v82_v31  ;;  %v1661_v31 = vld [vmem:[%s6565_s0 + $0x6b] sm:$0xff] }
  0x5a   :  { %1510 = vrot.lane.b32.xlu1 %v1437_v35, %s4022_s8  ;;  %1508 = vrot.lane.b32.xlu0 %v1436_v36, %s4022_s8  ;;  %v3832_v35 = vld [vmem:[%s6567_s2 + $0x38] sm:$0xff] }
  0x5b   :  { %1725 = vrot.lane.b32.xlu2 %v1653_v37, %s4023_s11  ;;  %1992 = vmatpush.bf16.msra.mxu0 %v3832_v35  ;;  %v1441_v36 = vld [vmem:[%s6565_s0 + $0x52] sm:$0xff] }
  0x5c   :  { %3961 = vmatpush.bf16.msra.mxu1 %v3832_v35  ;;  %v3831_v37 = vld [vmem:[%s6567_s2 + $0x30] sm:$0xff]  ;;  %3962 = vmatpush.bf16.msra.mxu2 %v3832_v35 }
  0x5d   :  { %v215_v39 = vpop.permute.xlu2 %214 }
  0x5e   :  { %319 = vst.msk [vmem:[#allocation2 + $0x20] sm:$0xff] %vm314_vm1, %v215_v39 }
  0x5f   :  { %1993 = vmatpush.bf16.msra.mxu0 %v3831_v37 }
  0x60   :  { %3963 = vmatpush.bf16.msra.mxu1 %v3831_v37  ;;  %3964 = vmatpush.bf16.msra.mxu2 %v3831_v37 }
  0x62   :  { %427 = vrot.lane.b32.xlu1 %v568_v24, %s4016_s23  ;;  %1727 = vrot.lane.b32.xlu0 %v1654_v38, %s4023_s11  ;;  %v79_v24 = vld [vmem:[%s6565_s0 + $0x95] sm:$0xff] }
  0x63   :  { %429 = vrot.lane.b32.xlu2 %v569_v26, %s4016_s23  ;;  %v81_v26 = vld [vmem:[%s6565_s0 + $0xa5] sm:$0xff]  ;;  %116 = vst.msk [vmem:[#allocation2 + $0x90] sm:$0xff] %vm97_vm0, %v79_v24 }
  0x64   :  { %118 = vst.msk [vmem:[#allocation2 + $0xa0] sm:$0xff] %vm97_vm0, %v81_v26  ;;  %v1227_v26 = vld [vmem:[%s6565_s0 + $0x69] sm:$0xff] }
  0x65   :  { %v217_v42 = vpop.permute.xlu2 %216 }
  0x66   :  { %320 = vst.msk [vmem:[#allocation2 + $0x28] sm:$0xff] %vm314_vm1, %v217_v42 }
  0x6a   :  { %646 = vrot.lane.b32.xlu1 %v4239_v40, %s4017_s29  ;;  %644 = vrot.lane.b32.xlu0 %v4244_v41, %s4017_s29 }
  0x6b   :  { %861 = vrot.lane.b32.xlu2 %v787_v43, %s4018_s12  ;;  %v3830_v43 = vld [vmem:[%s6567_s2 + $0x28] sm:$0xff] }
  0x6c   :  { %1994 = vmatpush.bf16.msra.mxu0 %v3830_v43  ;;  %3965 = vmatpush.bf16.msra.mxu1 %v3830_v43 }
  0x6d   :  { %v223_v45 = vpop.permute.xlu2 %222  ;;  %3966 = vmatpush.bf16.msra.mxu2 %v3830_v43 }
  0x6e   :  { %323 = vst.msk [vmem:[#allocation2 + $0x40] sm:$0xff] %vm314_vm1, %v223_v45 }
  0x72   :  { %1078 = vrot.lane.b32.xlu1 %v1219_v30, %s4019_s15  ;;  %863 = vrot.lane.b32.xlu0 %v788_v44, %s4018_s12  ;;  %v83_v30 = vld [vmem:[%s6565_s0 + $0xb5] sm:$0xff]  ;;  %v3829_v44 = vld [vmem:[%s6567_s2 + $0x20] sm:$0xff] }
  0x73   :  { %1080 = vrot.lane.b32.xlu2 %v4191_v32, %s4019_s15  ;;  %v1440_v32 = vld [vmem:[%s6565_s0 + $0x4a] sm:$0xff]  ;;  %120 = vst.msk [vmem:[#allocation2 + $0xb0] sm:$0xff] %vm97_vm0, %v83_v30  ;;  %1995 = vmatpush.bf16.msra.mxu0 %v3829_v44 }
  0x74   :  { %v211_v46 = vpop.permute.xlu1 %210  ;;  %v207_v47 = vpop.permute.xlu0 %206  ;;  %3967 = vmatpush.bf16.msra.mxu1 %v3829_v44  ;;  %3968 = vmatpush.bf16.msra.mxu2 %v3829_v44  ;;  %v795_v44 = vld [vmem:[%s6565_s0 + $0x68] sm:$0xff] }
  0x75   :  { %317 = vst.msk [vmem:[#allocation2 + $0x10] sm:$0xff] %vm314_vm1, %v211_v46  ;;  %v229_v51 = vpop.permute.xlu2 %228 }
  0x76   :  { %315 = vst.msk [vmem:[#allocation2] sm:$0xff] %vm314_vm1, %v207_v47  ;;  %v4497_v47 = vld [vmem:[%s6565_s0 + $0x47] sm:$0xff] }
  0x77   :  { %326 = vst.msk [vmem:[#allocation2 + $0x58] sm:$0xff] %vm314_vm1, %v229_v51  ;;  %v3827_v51 = vld [vmem:[%s6567_s2 + $0x10] sm:$0xff] }
  0x7a   :  { %1297 = vrot.lane.b32.xlu1 %v4284_v49, %s4020_s20  ;;  %1295 = vrot.lane.b32.xlu0 %v4289_v50, %s4020_s20 }
  0x7b   :  { %1512 = vrot.lane.b32.xlu2 %v1438_v54, %s4022_s8  ;;  %v3826_v54 = vld [vmem:[%s6567_s2 + $0x8] sm:$0xff] }
  0x7c   :  { %v213_v55 = vpop.permute.xlu1 %212  ;;  %v209_v56 = vpop.permute.xlu0 %208 }
  0x7d   :  { %318 = vst.msk [vmem:[#allocation2 + $0x18] sm:$0xff] %vm314_vm1, %v213_v55  ;;  %v235_v61 = vpop.permute.xlu2 %234  ;;  %v792_v55 = vld [vmem:[%s6565_s0 + $0x50] sm:$0xff] }
  0x7e   :  { %316 = vst.msk [vmem:[#allocation2 + $0x8] sm:$0xff] %vm314_vm1, %v209_v56  ;;  %v791_v56 = vld [vmem:[%s6565_s0 + $0x48] sm:$0xff] }
  0x7f   :  { %329 = vst.msk [vmem:[#allocation2 + $0x70] sm:$0xff] %vm314_vm1, %v235_v61  ;;  %v1225_v61 = vld [vmem:[%s6565_s0 + $0x59] sm:$0xff] }
  0x82   :  { %1729 = vrot.lane.b32.xlu1 %v1655_v59, %s4023_s11  ;;  %1514 = vrot.lane.b32.xlu0 %v1439_v60, %s4022_s8 }
  0x83   :  { %1731 = vrot.lane.b32.xlu2 %v1656_v0, %s4023_s11 }
  0x84   :  { %v221_v1 = vpop.permute.xlu1 %220  ;;  %v219_v2 = vpop.permute.xlu0 %218 }
  0x85   :  { %322 = vst.msk [vmem:[#allocation2 + $0x38] sm:$0xff] %vm314_vm1, %v221_v1  ;;  %v241_v6 = vpop.permute.xlu2 %240 }
  0x86   :  { %321 = vst.msk [vmem:[#allocation2 + $0x30] sm:$0xff] %vm314_vm1, %v219_v2  ;;  %v1443_v2 = vld [vmem:[%s6565_s0 + $0x62] sm:$0xff] }
  0x87   :  { %332 = vst.msk [vmem:[#allocation2 + $0x88] sm:$0xff] %vm314_vm1, %v241_v6 }
  0x8a   :  { %433 = vrot.lane.b32.xlu1 %v4239_v40, %s4016_s23  ;;  %431 = vrot.lane.b32.xlu0 %v4244_v41, %s4016_s23  ;;  %v1658_v40 = vld [vmem:[%s6565_s0 + $0x53] sm:$0xff]  ;;  %v1657_v41 = vld [vmem:[%s6565_s0 + $0x4b] sm:$0xff] }
  0x8b   :  { %648 = vrot.lane.b32.xlu2 %v4367_v8, %s4017_s29 }
  0x8c   :  { %v227_v9 = vpop.permute.xlu1 %226  ;;  %v225_v10 = vpop.permute.xlu0 %224 }
  0x8d   :  { %325 = vst.msk [vmem:[#allocation2 + $0x50] sm:$0xff] %vm314_vm1, %v227_v9  ;;  %v247_v16 = vpop.permute.xlu2 %246 }
  0x8e   :  { %324 = vst.msk [vmem:[#allocation2 + $0x48] sm:$0xff] %vm314_vm1, %v225_v10 }
  0x8f   :  { %335 = vst.msk [vmem:[#allocation2 + $0xa0] sm:$0xff] %vm314_vm1, %v247_v16 }
  0x92   :  { %865 = vrot.lane.b32.xlu1 %v789_v14, %s4018_s12  ;;  %650 = vrot.lane.b32.xlu0 %v4390_v15, %s4017_s29 }
  0x93   :  { %867 = vrot.lane.b32.xlu2 %v790_v19, %s4018_s12 }
  0x94   :  { %v233_v20 = vpop.permute.xlu1 %232  ;;  %v231_v21 = vpop.permute.xlu0 %230 }
  0x95   :  { %328 = vst.msk [vmem:[#allocation2 + $0x68] sm:$0xff] %vm314_vm1, %v233_v20  ;;  %v424_v25 = vpop.permute.xlu2 %423 }
  0x96   :  { %327 = vst.msk [vmem:[#allocation2 + $0x60] sm:$0xff] %vm314_vm1, %v231_v21  ;;  %v794_v21 = vld [vmem:[%s6565_s0 + $0x60] sm:$0xff] }
  0x97   :  { %532 = vst.msk [vmem:[#allocation2] sm:$0xff] %vm531_vm2, %v424_v25  ;;  %v1228_v25 = vld [vmem:[%s6565_s0 + $0x71] sm:$0xff] }
  0x9a   :  { %1084 = vrot.lane.b32.xlu1 %v4284_v49, %s4019_s15  ;;  %1082 = vrot.lane.b32.xlu0 %v4289_v50, %s4019_s15  ;;  %v3828_v49 = vld [vmem:[%s6567_s2 + $0x18] sm:$0xff]  ;;  %v4509_v50 = vld [vmem:[%s6565_s0 + $0x4f] sm:$0xff] }
  0x9b   :  { %1299 = vrot.lane.b32.xlu2 %v4436_v27, %s4020_s20  ;;  %1996 = vmatpush.bf16.msra.mxu0 %v3828_v49 }
  0x9c   :  { %v239_v28 = vpop.permute.xlu1 %238  ;;  %v237_v29 = vpop.permute.xlu0 %236  ;;  %3969 = vmatpush.bf16.msra.mxu1 %v3828_v49  ;;  %3970 = vmatpush.bf16.msra.mxu2 %v3828_v49 }
  0x9d   :  { %331 = vst.msk [vmem:[#allocation2 + $0x80] sm:$0xff] %vm314_vm1, %v239_v28  ;;  %v643_v34 = vpop.permute.xlu2 %642  ;;  %v1444_v28 = vld [vmem:[%s6565_s0 + $0x6a] sm:$0xff] }
  0x9e   :  { %330 = vst.msk [vmem:[#allocation2 + $0x78] sm:$0xff] %vm314_vm1, %v237_v29 }
  0x9f   :  { %1997 = vmatpush.bf16.msra.mxu0 %v3827_v51 }
  0xa0   :  { %3971 = vmatpush.bf16.msra.mxu1 %v3827_v51  ;;  %3972 = vmatpush.bf16.msra.mxu2 %v3827_v51  ;;  %v1229_v51 = vld [vmem:[%s6565_s0 + $0x79] sm:$0xff] }
  0xa2   :  { %1516 = vrot.lane.b32.xlu1 %v1440_v32, %s4022_s8  ;;  %1301 = vrot.lane.b32.xlu0 %v4456_v33, %s4020_s20  ;;  %v1445_v32 = vld [vmem:[%s6565_s0 + $0x72] sm:$0xff] }
  0xa3   :  { %1518 = vrot.lane.b32.xlu2 %v1441_v36, %s4022_s8  ;;  %1998 = vmatpush.bf16.msra.mxu0 %v3826_v54 }
  0xa4   :  { %v245_v38 = vpop.permute.xlu1 %244  ;;  %v243_v39 = vpop.permute.xlu0 %242  ;;  %3973 = vmatpush.bf16.msra.mxu1 %v3826_v54  ;;  %3974 = vmatpush.bf16.msra.mxu2 %v3826_v54  ;;  %v1446_v54 = vld [vmem:[%s6565_s0 + $0x7a] sm:$0xff] }
  0xa5   :  { %334 = vst.msk [vmem:[#allocation2 + $0x98] sm:$0xff] %vm314_vm1, %v245_v38  ;;  %v1075_v42 = vpop.permute.xlu2 %1074  ;;  %v578_v38 = vld [vmem:[%s6565_s0 + $0x67] sm:$0xff] }
  0xa6   :  { %333 = vst.msk [vmem:[#allocation2 + $0x90] sm:$0xff] %vm314_vm1, %v243_v39 }
  0xa7   :  { %1999 = vmatpush.bf16.msra.mxu0 %v3825_v58 }
  0xa8   :  { %3975 = vmatpush.bf16.msra.mxu1 %v3825_v58  ;;  %3976 = vmatpush.bf16.msra.mxu2 %v3825_v58 }
  0xaa   :  { %1735 = vrot.lane.b32.xlu1 %v1658_v40, %s4023_s11  ;;  %1733 = vrot.lane.b32.xlu0 %v1657_v41, %s4023_s11 }
  0xab   :  { %435 = vrot.lane.b32.xlu2 %v4367_v8, %s4016_s23  ;;  %v1660_v8 = vld [vmem:[%s6565_s0 + $0x63] sm:$0xff] }
  0xac   :  { %v251_v45 = vpop.permute.xlu1 %250  ;;  %v249_v46 = vpop.permute.xlu0 %248 }
  0xad   :  { %337 = vst.msk [vmem:[#allocation2 + $0xb0] sm:$0xff] %vm314_vm1, %v251_v45  ;;  %v1294_v48 = vpop.permute.xlu2 %1293  ;;  %v579_v45 = vld [vmem:[%s6565_s0 + $0x6f] sm:$0xff] }
  0xae   :  { %336 = vst.msk [vmem:[#allocation2 + $0xa8] sm:$0xff] %vm314_vm1, %v249_v46 }
  0xb2   :  { %652 = vrot.lane.b32.xlu1 %v4497_v47, %s4017_s29  ;;  %437 = vrot.lane.b32.xlu0 %v4390_v15, %s4016_s23  ;;  %v793_v15 = vld [vmem:[%s6565_s0 + $0x58] sm:$0xff] }
  0xb3   :  { %654 = vrot.lane.b32.xlu2 %v4509_v50, %s4017_s29 }
  0xb4   :  { %v641_v52 = vpop.permute.xlu1 %640  ;;  %v426_v53 = vpop.permute.xlu0 %425 }
  0xb5   :  { %749 = vst.msk [vmem:[#allocation2] sm:$0xff] %vm748_vm3, %v641_v52  ;;  %v1726_v57 = vpop.permute.xlu2 %1725 }
  0xb6   :  { %533 = vst.msk [vmem:[#allocation2 + $0x8] sm:$0xff] %vm531_vm2, %v426_v53 }
  0xb7   :  { %750 = vst.msk [vmem:[#allocation2 + $0x8] sm:$0xff] %vm748_vm3, %v643_v34  ;;  %v1662_v34 = vld [vmem:[%s6565_s0 + $0x73] sm:$0xff] }
  0xba   :  { %871 = vrot.lane.b32.xlu1 %v792_v55, %s4018_s12  ;;  %869 = vrot.lane.b32.xlu0 %v791_v56, %s4018_s12  ;;  %v1230_v55 = vld [vmem:[%s6565_s0 + $0x81] sm:$0xff] }
  0xbb   :  { %1086 = vrot.lane.b32.xlu2 %v4436_v27, %s4019_s15 }
  0xbc   :  { %v860_v59 = vpop.permute.xlu1 %859  ;;  %v858_v60 = vpop.permute.xlu0 %857 }
  0xbd   :  { %967 = vst.msk [vmem:[#allocation2 + $0x8] sm:$0xff] %vm965_vm4, %v860_v59  ;;  %v430_v62 = vpop.permute.xlu2 %429 }
  0xbe   :  { %966 = vst.msk [vmem:[#allocation2] sm:$0xff] %vm965_vm4, %v858_v60  ;;  %v1664_v60 = vld [vmem:[%s6565_s0 + $0x83] sm:$0xff] }
  0xbf   :  { %1183 = vst.msk [vmem:[#allocation2] sm:$0xff] %vm1182_vm5, %v1075_v42 }
  0xc0   :  { %535 = vst.msk [vmem:[#allocation2 + $0x18] sm:$0xff] %vm531_vm2, %v430_v62 }
  0xc2   :  { %1303 = vrot.lane.b32.xlu1 %v1225_v61, %s4020_s20  ;;  %1088 = vrot.lane.b32.xlu0 %v4456_v33, %s4019_s15 }
  0xc3   :  { %1305 = vrot.lane.b32.xlu2 %v1226_v63, %s4020_s20 }
  0xc4   :  { %v1292_v0 = vpop.permute.xlu1 %1291  ;;  %v1077_v1 = vpop.permute.xlu0 %1076 }
  0xc5   :  { %1400 = vst.msk [vmem:[#allocation2] sm:$0xff] %vm1399_vm6, %v1292_v0  ;;  %v862_v4 = vpop.permute.xlu2 %861 }
  0xc6   :  { %1184 = vst.msk [vmem:[#allocation2 + $0x8] sm:$0xff] %vm1182_vm5, %v1077_v1  ;;  %v580_v1 = vld [vmem:[%s6565_s0 + $0x77] sm:$0xff] }
  0xc7   :  { %1401 = vst.msk [vmem:[#allocation2 + $0x8] sm:$0xff] %vm1399_vm6, %v1294_v48 }
  0xca   :  { %1522 = vrot.lane.b32.xlu1 %v1443_v2, %s4022_s8  ;;  %1520 = vrot.lane.b32.xlu0 %v1442_v3, %s4022_s8  ;;  %v581_v3 = vld [vmem:[%s6565_s0 + $0x7f] sm:$0xff] }
  0xcb   :  { %1737 = vrot.lane.b32.xlu2 %v1659_v5, %s4023_s11 }
  0xcc   :  { %v1511_v6 = vpop.permute.xlu1 %1510  ;;  %v1509_v7 = vpop.permute.xlu0 %1508 }
  0xcd   :  { %1618 = vst.msk [vmem:[#allocation2 + $0x8] sm:$0xff] %vm1616_vm7, %v1511_v6  ;;  %v1081_v9 = vpop.permute.xlu2 %1080 }
  0xce   :  { %1617 = vst.msk [vmem:[#allocation2] sm:$0xff] %vm1616_vm7, %v1509_v7 }
  0xcf   :  { %1834 = vst.msk [vmem:[#allocation2] sm:$0xff] %vm1833_vm8, %v1726_v57  ;;  %v1447_v57 = vld [vmem:[%s6565_s0 + $0x82] sm:$0xff] }
  0xd2   :  { %439 = vrot.lane.b32.xlu1 %v4497_v47, %s4016_s23  ;;  %1739 = vrot.lane.b32.xlu0 %v1660_v8, %s4023_s11  ;;  %v796_v47 = vld [vmem:[%s6565_s0 + $0x70] sm:$0xff] }
  0xd3   :  { %441 = vrot.lane.b32.xlu2 %v4509_v50, %s4016_s23 }
  0xd4   :  { %v428_v10 = vpop.permute.xlu1 %427  ;;  %v1728_v11 = vpop.permute.xlu0 %1727 }
  0xd5   :  { %534 = vst.msk [vmem:[#allocation2 + $0x10] sm:$0xff] %vm531_vm2, %v428_v10  ;;  %v1513_v14 = vpop.permute.xlu2 %1512  ;;  %v797_v10 = vld [vmem:[%s6565_s0 + $0x78] sm:$0xff] }
  0xd6   :  { %1835 = vst.msk [vmem:[#allocation2 + $0x8] sm:$0xff] %vm1833_vm8, %v1728_v11  ;;  %v1870_v18 = vld [vmem:[#allocation2] sm:$0xff] }
  0xda   :  { %658 = vrot.lane.b32.xlu1 %v577_v12, %s4017_s29  ;;  %656 = vrot.lane.b32.xlu0 %v576_v13, %s4017_s29 }
  0xdb   :  { %873 = vrot.lane.b32.xlu2 %v793_v15, %s4018_s12 }
  0xdc   :  { %v647_v16 = vpop.permute.xlu1 %646  ;;  %v645_v17 = vpop.permute.xlu0 %644 }
  0xdd   :  { %752 = vst.msk [vmem:[#allocation2 + $0x18] sm:$0xff] %vm748_vm3, %v647_v16  ;;  %v1871_v19 = vld [vmem:[#allocation2 + $0x8] sm:$0xff]  ;;  %v1732_v22 = vpop.permute.xlu2 %1731 }
  0xde   :  { %751 = vst.msk [vmem:[#allocation2 + $0x10] sm:$0xff] %vm748_vm3, %v645_v17  ;;  %v1906_v20 = vpack.c.bf16 %v1871_v19, %v1870_v18  ;;  %v1232_v16 = vld [vmem:[%s6565_s0 + $0x91] sm:$0xff] }
  0xdf   :  { %968 = vst.msk [vmem:[#allocation2 + $0x10] sm:$0xff] %vm965_vm4, %v862_v4  ;;  %v1449_v19 = vld [vmem:[%s6565_s0 + $0x92] sm:$0xff] }
  0xe0   :  { %2000 = vmatmul.bf16.vlgmr.msra.gmra.mxu0 %v1906_v20  ;;  %v1448_v20 = vld [vmem:[%s6565_s0 + $0x8a] sm:$0xff] }
  0xe2   :  { %1090 = vrot.lane.b32.xlu1 %v1225_v61, %s4019_s15  ;;  %875 = vrot.lane.b32.xlu0 %v794_v21, %s4018_s12  ;;  %v1663_v61 = vld [vmem:[%s6565_s0 + $0x7b] sm:$0xff] }
  0xe3   :  { %1092 = vrot.lane.b32.xlu2 %v1226_v63, %s4019_s15 }
  0xe4   :  { %v1079_v23 = vpop.permute.xlu1 %1078  ;;  %v864_v24 = vpop.permute.xlu0 %863 }
  0xe5   :  { %1185 = vst.msk [vmem:[#allocation2 + $0x10] sm:$0xff] %vm1182_vm5, %v1079_v23  ;;  %v649_v27 = vpop.permute.xlu2 %648 }
  0xe6   :  { %969 = vst.msk [vmem:[#allocation2 + $0x18] sm:$0xff] %vm965_vm4, %v864_v24 }
  0xe7   :  { %1186 = vst.msk [vmem:[#allocation2 + $0x18] sm:$0xff] %vm1182_vm5, %v1081_v9  ;;  %v798_v9 = vld [vmem:[%s6565_s0 + $0x80] sm:$0xff] }
  0xea   :  { %1309 = vrot.lane.b32.xlu1 %v1228_v25, %s4020_s20  ;;  %1307 = vrot.lane.b32.xlu0 %v1227_v26, %s4020_s20 }
  0xeb   :  { %1524 = vrot.lane.b32.xlu2 %v1444_v28, %s4022_s8 }
  0xec   :  { %v1298_v29 = vpop.permute.xlu1 %1297  ;;  %v1296_v30 = vpop.permute.xlu0 %1295 }
  0xed   :  { %1403 = vst.msk [vmem:[#allocation2 + $0x18] sm:$0xff] %vm1399_vm6, %v1298_v29  ;;  %v868_v33 = vpop.permute.xlu2 %867  ;;  %v583_v29 = vld [vmem:[%s6565_s0 + $0x8f] sm:$0xff] }
  0xee   :  { %1402 = vst.msk [vmem:[#allocation2 + $0x10] sm:$0xff] %vm1399_vm6, %v1296_v30  ;;  %v582_v30 = vld [vmem:[%s6565_s0 + $0x87] sm:$0xff] }
  0xef   :  { %1619 = vst.msk [vmem:[#allocation2 + $0x10] sm:$0xff] %vm1616_vm7, %v1513_v14  ;;  %v1231_v14 = vld [vmem:[%s6565_s0 + $0x89] sm:$0xff] }
  0xf2   :  { %1741 = vrot.lane.b32.xlu1 %v1661_v31, %s4023_s11  ;;  %1526 = vrot.lane.b32.xlu0 %v1445_v32, %s4022_s8  ;;  %v799_v32 = vld [vmem:[%s6565_s0 + $0x88] sm:$0xff] }
  0xf3   :  { %1743 = vrot.lane.b32.xlu2 %v1662_v34, %s4023_s11 }
  0xf4   :  { %v1730_v35 = vpop.permute.xlu1 %1729  ;;  %v1515_v36 = vpop.permute.xlu0 %1514 }
  0xf5   :  { %1836 = vst.msk [vmem:[#allocation2 + $0x10] sm:$0xff] %vm1833_vm8, %v1730_v35  ;;  %v1300_v37 = vpop.permute.xlu2 %1299 }
  0xf6   :  { %1620 = vst.msk [vmem:[#allocation2 + $0x18] sm:$0xff] %vm1616_vm7, %v1515_v36 }
  0xf7   :  { %1837 = vst.msk [vmem:[#allocation2 + $0x18] sm:$0xff] %vm1833_vm8, %v1732_v22  ;;  %v1665_v22 = vld [vmem:[%s6565_s0 + $0x8b] sm:$0xff] }
  0xfa   :  { %445 = vrot.lane.b32.xlu1 %v577_v12, %s4016_s23  ;;  %443 = vrot.lane.b32.xlu0 %v576_v13, %s4016_s23 }
  0xfb   :  { %660 = vrot.lane.b32.xlu2 %v578_v38, %s4017_s29 }
  0xfc   :  { %v434_v39 = vpop.permute.xlu1 %433  ;;  %v432_v40 = vpop.permute.xlu0 %431  ;;  %v1872_v41 = vld [vmem:[#allocation2 + $0x10] sm:$0xff] }
  0xfd   :  { %537 = vst.msk [vmem:[#allocation2 + $0x28] sm:$0xff] %vm531_vm2, %v434_v39  ;;  %v1519_v46 = vpop.permute.xlu2 %1518 }
  0xfe   :  { %536 = vst.msk [vmem:[#allocation2 + $0x20] sm:$0xff] %vm531_vm2, %v432_v40  ;;  %v1873_v42 = vld [vmem:[#allocation2 + $0x18] sm:$0xff] }
  0xff   :  { %753 = vst.msk [vmem:[#allocation2 + $0x20] sm:$0xff] %vm748_vm3, %v649_v27  ;;  %v1907_v43 = vpack.c.bf16 %v1873_v42, %v1872_v41  ;;  %v1234_v42 = vld [vmem:[%s6565_s0 + $0xa1] sm:$0xff] }
 0x101   :  { %2005 = vmatmul.bf16.gmra.mxu0 %v1907_v43  ;;  %v1233_v43 = vld [vmem:[%s6565_s0 + $0x99] sm:$0xff] }
 0x102   :  { %877 = vrot.lane.b32.xlu1 %v795_v44, %s4018_s12  ;;  %662 = vrot.lane.b32.xlu0 %v579_v45, %s4017_s29 }
 0x103   :  { %879 = vrot.lane.b32.xlu2 %v796_v47, %s4018_s12 }
 0x104   :  { %v866_v48 = vpop.permute.xlu1 %865  ;;  %v651_v49 = vpop.permute.xlu0 %650 }
 0x105   :  { %970 = vst.msk [vmem:[#allocation2 + $0x20] sm:$0xff] %vm965_vm4, %v866_v48  ;;  %v436_v50 = vpop.permute.xlu2 %435  ;;  %v1667_v48 = vld [vmem:[%s6565_s0 + $0x9b] sm:$0xff] }
 0x106   :  { %754 = vst.msk [vmem:[#allocation2 + $0x28] sm:$0xff] %vm748_vm3, %v651_v49  ;;  %v1451_v49 = vld [vmem:[%s6565_s0 + $0xa2] sm:$0xff] }
 0x107   :  { %971 = vst.msk [vmem:[#allocation2 + $0x28] sm:$0xff] %vm965_vm4, %v868_v33 }
 0x108   :  { %538 = vst.msk [vmem:[#allocation2 + $0x30] sm:$0xff] %vm531_vm2, %v436_v50 }
 0x10a   :  { %1096 = vrot.lane.b32.xlu1 %v1228_v25, %s4019_s15  ;;  %1094 = vrot.lane.b32.xlu0 %v1227_v26, %s4019_s15  ;;  %v1666_v25 = vld [vmem:[%s6565_s0 + $0x93] sm:$0xff] }
 0x10b   :  { %1311 = vrot.lane.b32.xlu2 %v1229_v51, %s4020_s20 }
 0x10c   :  { %v1085_v52 = vpop.permute.xlu1 %1084  ;;  %v1083_v53 = vpop.permute.xlu0 %1082 }
 0x10d   :  { %1188 = vst.msk [vmem:[#allocation2 + $0x28] sm:$0xff] %vm1182_vm5, %v1085_v52  ;;  %v655_v56 = vpop.permute.xlu2 %654 }
 0x10e   :  { %1187 = vst.msk [vmem:[#allocation2 + $0x20] sm:$0xff] %vm1182_vm5, %v1083_v53 }
 0x10f   :  { %1404 = vst.msk [vmem:[#allocation2 + $0x20] sm:$0xff] %vm1399_vm6, %v1300_v37 }
 0x112   :  { %1528 = vrot.lane.b32.xlu1 %v1446_v54, %s4022_s8  ;;  %1313 = vrot.lane.b32.xlu0 %v1230_v55, %s4020_s20 }
 0x113   :  { %1530 = vrot.lane.b32.xlu2 %v1447_v57, %s4022_s8 }
 0x114   :  { %v1517_v58 = vpop.permute.xlu1 %1516  ;;  %v1302_v59 = vpop.permute.xlu0 %1301 }
 0x115   :  { %1621 = vst.msk [vmem:[#allocation2 + $0x20] sm:$0xff] %vm1616_vm7, %v1517_v58  ;;  %v1087_v62 = vpop.permute.xlu2 %1086 }
 0x116   :  { %1405 = vst.msk [vmem:[#allocation2 + $0x28] sm:$0xff] %vm1399_vm6, %v1302_v59 }
 0x117   :  { %1622 = vst.msk [vmem:[#allocation2 + $0x28] sm:$0xff] %vm1616_vm7, %v1519_v46 }
 0x11a   :  { %1747 = vrot.lane.b32.xlu1 %v1664_v60, %s4023_s11  ;;  %1745 = vrot.lane.b32.xlu0 %v1663_v61, %s4023_s11 }
 0x11b   :  { %447 = vrot.lane.b32.xlu2 %v578_v38, %s4016_s23  ;;  %v800_v38 = vld [vmem:[%s6565_s0 + $0x90] sm:$0xff] }
 0x11c   :  { %v1736_v63 = vpop.permute.xlu1 %1735  ;;  %v1734_v0 = vpop.permute.xlu0 %1733 }
 0x11d   :  { %1839 = vst.msk [vmem:[#allocation2 + $0x28] sm:$0xff] %vm1833_vm8, %v1736_v63  ;;  %v1306_v2 = vpop.permute.xlu2 %1305  ;;  %v585_v63 = vld [vmem:[%s6565_s0 + $0x9f] sm:$0xff] }
 0x11e   :  { %1838 = vst.msk [vmem:[#allocation2 + $0x20] sm:$0xff] %vm1833_vm8, %v1734_v0 }
 0x122   :  { %664 = vrot.lane.b32.xlu1 %v580_v1, %s4017_s29  ;;  %449 = vrot.lane.b32.xlu0 %v579_v45, %s4016_s23  ;;  %v1450_v45 = vld [vmem:[%s6565_s0 + $0x9a] sm:$0xff] }
 0x123   :  { %666 = vrot.lane.b32.xlu2 %v581_v3, %s4017_s29 }
 0x124   :  { %v653_v4 = vpop.permute.xlu1 %652  ;;  %v438_v5 = vpop.permute.xlu0 %437  ;;  %v1875_v6 = vld [vmem:[#allocation2 + $0x28] sm:$0xff] }
 0x125   :  { %755 = vst.msk [vmem:[#allocation2 + $0x30] sm:$0xff] %vm748_vm3, %v653_v4  ;;  %v1874_v7 = vld [vmem:[#allocation2 + $0x20] sm:$0xff]  ;;  %v1738_v11 = vpop.permute.xlu2 %1737 }
 0x126   :  { %539 = vst.msk [vmem:[#allocation2 + $0x38] sm:$0xff] %vm531_vm2, %v438_v5  ;;  %v1908_v8 = vpack.c.bf16 %v1875_v6, %v1874_v7  ;;  %v1235_v6 = vld [vmem:[%s6565_s0 + $0xa9] sm:$0xff] }
 0x127   :  { %756 = vst.msk [vmem:[#allocation2 + $0x38] sm:$0xff] %vm748_vm3, %v655_v56 }
 0x128   :  { %2010 = vmatmul.bf16.gmra.mxu0 %v1908_v8 }
 0x12a   :  { %883 = vrot.lane.b32.xlu1 %v798_v9, %s4018_s12  ;;  %881 = vrot.lane.b32.xlu0 %v797_v10, %s4018_s12  ;;  %v1452_v10 = vld [vmem:[%s6565_s0 + $0xaa] sm:$0xff] }
 0x12b   :  { %1098 = vrot.lane.b32.xlu2 %v1229_v51, %s4019_s15  ;;  %v1668_v51 = vld [vmem:[%s6565_s0 + $0xa3] sm:$0xff] }
 0x12c   :  { %v872_v12 = vpop.permute.xlu1 %871  ;;  %v870_v13 = vpop.permute.xlu0 %869 }
 0x12d   :  { %973 = vst.msk [vmem:[#allocation2 + $0x38] sm:$0xff] %vm965_vm4, %v872_v12  ;;  %v442_v15 = vpop.permute.xlu2 %441 }
 0x12e   :  { %972 = vst.msk [vmem:[#allocation2 + $0x30] sm:$0xff] %vm965_vm4, %v870_v13  ;;  %v1453_v13 = vld [vmem:[%s6565_s0 + $0xb2] sm:$0xff] }
 0x12f   :  { %1189 = vst.msk [vmem:[#allocation2 + $0x30] sm:$0xff] %vm1182_vm5, %v1087_v62  ;;  %v801_v62 = vld [vmem:[%s6565_s0 + $0x98] sm:$0xff] }
 0x130   :  { %541 = vst.msk [vmem:[#allocation2 + $0x48] sm:$0xff] %vm531_vm2, %v442_v15 }
 0x132   :  { %1315 = vrot.lane.b32.xlu1 %v1231_v14, %s4020_s20  ;;  %1100 = vrot.lane.b32.xlu0 %v1230_v55, %s4019_s15  ;;  %v4810_v55 = vld [vmem:[%s6565_s0 + $0x97] sm:$0xff] }
 0x133   :  { %1317 = vrot.lane.b32.xlu2 %v1232_v16, %s4020_s20 }
 0x134   :  { %v1304_v17 = vpop.permute.xlu1 %1303  ;;  %v1089_v18 = vpop.permute.xlu0 %1088 }
 0x135   :  { %1406 = vst.msk [vmem:[#allocation2 + $0x30] sm:$0xff] %vm1399_vm6, %v1304_v17  ;;  %v874_v21 = vpop.permute.xlu2 %873 }
 0x136   :  { %1190 = vst.msk [vmem:[#allocation2 + $0x38] sm:$0xff] %vm1182_vm5, %v1089_v18 }
 0x137   :  { %1407 = vst.msk [vmem:[#allocation2 + $0x38] sm:$0xff] %vm1399_vm6, %v1306_v2 }
 0x13a   :  { %1534 = vrot.lane.b32.xlu1 %v1449_v19, %s4022_s8  ;;  %1532 = vrot.lane.b32.xlu0 %v1448_v20, %s4022_s8  ;;  %v1670_v20 = vld [vmem:[%s6565_s0 + $0xb3] sm:$0xff] }
 0x13b   :  { %1749 = vrot.lane.b32.xlu2 %v1665_v22, %s4023_s11 }
 0x13c   :  { %v1523_v23 = vpop.permute.xlu1 %1522  ;;  %v1521_v24 = vpop.permute.xlu0 %1520 }
 0x13d   :  { %1624 = vst.msk [vmem:[#allocation2 + $0x38] sm:$0xff] %vm1616_vm7, %v1523_v23  ;;  %v1093_v26 = vpop.permute.xlu2 %1092 }
 0x13e   :  { %1623 = vst.msk [vmem:[#allocation2 + $0x30] sm:$0xff] %vm1616_vm7, %v1521_v24 }
 0x13f   :  { %1840 = vst.msk [vmem:[#allocation2 + $0x30] sm:$0xff] %vm1833_vm8, %v1738_v11  ;;  %v1236_v11 = vld [vmem:[%s6565_s0 + $0xb1] sm:$0xff] }
 0x142   :  { %451 = vrot.lane.b32.xlu1 %v580_v1, %s4016_s23  ;;  %1751 = vrot.lane.b32.xlu0 %v1666_v25, %s4023_s11  ;;  %v802_v1 = vld [vmem:[%s6565_s0 + $0xa0] sm:$0xff] }
 0x143   :  { %453 = vrot.lane.b32.xlu2 %v581_v3, %s4016_s23 }
 0x144   :  { %v440_v27 = vpop.permute.xlu1 %439  ;;  %v1740_v28 = vpop.permute.xlu0 %1739 }
 0x145   :  { %540 = vst.msk [vmem:[#allocation2 + $0x40] sm:$0xff] %vm531_vm2, %v440_v27  ;;  %v1525_v31 = vpop.permute.xlu2 %1524 }
 0x146   :  { %1841 = vst.msk [vmem:[#allocation2 + $0x38] sm:$0xff] %vm1833_vm8, %v1740_v28  ;;  %v1876_v35 = vld [vmem:[#allocation2 + $0x30] sm:$0xff]  ;;  %v586_v28 = vld [vmem:[%s6565_s0 + $0xa7] sm:$0xff] }
 0x14a   :  { %670 = vrot.lane.b32.xlu1 %v583_v29, %s4017_s29  ;;  %668 = vrot.lane.b32.xlu0 %v582_v30, %s4017_s29 }
 0x14b   :  { %885 = vrot.lane.b32.xlu2 %v799_v32, %s4018_s12 }
 0x14c   :  { %v659_v33 = vpop.permute.xlu1 %658  ;;  %v657_v34 = vpop.permute.xlu0 %656 }
 0x14d   :  { %758 = vst.msk [vmem:[#allocation2 + $0x48] sm:$0xff] %vm748_vm3, %v659_v33  ;;  %v1877_v36 = vld [vmem:[#allocation2 + $0x38] sm:$0xff]  ;;  %v1744_v39 = vpop.permute.xlu2 %1743 }
 0x14e   :  { %757 = vst.msk [vmem:[#allocation2 + $0x40] sm:$0xff] %vm748_vm3, %v657_v34  ;;  %v1909_v37 = vpack.c.bf16 %v1877_v36, %v1876_v35  ;;  %v804_v36 = vld [vmem:[%s6565_s0 + $0xb0] sm:$0xff] }
 0x14f   :  { %974 = vst.msk [vmem:[#allocation2 + $0x40] sm:$0xff] %vm965_vm4, %v874_v21  ;;  %v1669_v21 = vld [vmem:[%s6565_s0 + $0xab] sm:$0xff] }
 0x150   :  { %2015 = vmatmul.bf16.gmra.mxu0 %v1909_v37  ;;  %v803_v37 = vld [vmem:[%s6565_s0 + $0xa8] sm:$0xff] }
 0x152   :  { %1102 = vrot.lane.b32.xlu1 %v1231_v14, %s4019_s15  ;;  %887 = vrot.lane.b32.xlu0 %v800_v38, %s4018_s12  ;;  %v4860_v14 = vld [vmem:[%s6568_s3] ss:$0 sm:$0xff] }
 0x153   :  { %1104 = vrot.lane.b32.xlu2 %v1232_v16, %s4019_s15 }
 0x154   :  { %v1091_v40 = vpop.permute.xlu1 %1090  ;;  %v876_v41 = vpop.permute.xlu0 %875 }
 0x155   :  { %1191 = vst.msk [vmem:[#allocation2 + $0x40] sm:$0xff] %vm1182_vm5, %v1091_v40  ;;  %v661_v44 = vpop.permute.xlu2 %660 }
 0x156   :  { %975 = vst.msk [vmem:[#allocation2 + $0x48] sm:$0xff] %vm965_vm4, %v876_v41  ;;  %v1237_v41 = vld [vmem:[%s6565_s0 + $0xb9] sm:$0xff] }
 0x157   :  { %1192 = vst.msk [vmem:[#allocation2 + $0x48] sm:$0xff] %vm1182_vm5, %v1093_v26 }
 0x15a   :  { %1321 = vrot.lane.b32.xlu1 %v1234_v42, %s4020_s20  ;;  %1319 = vrot.lane.b32.xlu0 %v1233_v43, %s4020_s20 }
 0x15b   :  { %1536 = vrot.lane.b32.xlu2 %v1450_v45, %s4022_s8 }
 0x15c   :  { %v1310_v46 = vpop.permute.xlu1 %1309  ;;  %v1308_v47 = vpop.permute.xlu0 %1307 }
 0x15d   :  { %1409 = vst.msk [vmem:[#allocation2 + $0x48] sm:$0xff] %vm1399_vm6, %v1310_v46  ;;  %v880_v50 = vpop.permute.xlu2 %879  ;;  %v4812_v56 = vpop.f32.mrf.mxu0 }
 0x15e   :  { %1408 = vst.msk [vmem:[#allocation2 + $0x40] sm:$0xff] %vm1399_vm6, %v1308_v47  ;;  %v1455_v47 = vld [vmem:[%s6565_s0 + $0xc2] sm:$0xff] }
 0x15f   :  { %1625 = vst.msk [vmem:[#allocation2 + $0x40] sm:$0xff] %vm1616_vm7, %v1525_v31 }
 0x162   :  { %1753 = vrot.lane.b32.xlu1 %v1667_v48, %s4023_s11  ;;  %1538 = vrot.lane.b32.xlu0 %v1451_v49, %s4022_s8  ;;  %v1454_v48 = vld [vmem:[%s6565_s0 + $0xba] sm:$0xff] }
 0x163   :  { %1755 = vrot.lane.b32.xlu2 %v1668_v51, %s4023_s11 }
 0x164   :  { %v1742_v52 = vpop.permute.xlu1 %1741  ;;  %v1527_v53 = vpop.permute.xlu0 %1526 }
 0x165   :  { %1842 = vst.msk [vmem:[#allocation2 + $0x40] sm:$0xff] %vm1833_vm8, %v1742_v52  ;;  %v1312_v54 = vpop.permute.xlu2 %1311  ;;  %v4832_v4 = vpop.f32.mrf.mxu0 }
 0x166   :  { %1626 = vst.msk [vmem:[#allocation2 + $0x48] sm:$0xff] %vm1616_vm7, %v1527_v53 }
 0x167   :  { %1843 = vst.msk [vmem:[#allocation2 + $0x48] sm:$0xff] %vm1833_vm8, %v1744_v39 }
 0x16a   :  { %457 = vrot.lane.b32.xlu1 %v583_v29, %s4016_s23  ;;  %455 = vrot.lane.b32.xlu0 %v582_v30, %s4016_s23  ;;  %v587_v30 = vld [vmem:[%s6565_s0 + $0xaf] sm:$0xff] }
 0x16b   :  { %672 = vrot.lane.b32.xlu2 %v4810_v55, %s4017_s29 }
 0x16c   :  { %v446_v57 = vpop.permute.xlu1 %445  ;;  %v444_v58 = vpop.permute.xlu0 %443  ;;  %v1878_v59 = vld [vmem:[#allocation2 + $0x40] sm:$0xff] }
 0x16d   :  { %543 = vst.msk [vmem:[#allocation2 + $0x58] sm:$0xff] %vm531_vm2, %v446_v57  ;;  %v1531_v0 = vpop.permute.xlu2 %1530  ;;  %v1672_v57 = vld [vmem:[%s6565_s0 + $0xc3] sm:$0xff] }
 0x16e   :  { %542 = vst.msk [vmem:[#allocation2 + $0x50] sm:$0xff] %vm531_vm2, %v444_v58  ;;  %v1879_v60 = vld [vmem:[#allocation2 + $0x48] sm:$0xff] }
 0x16f   :  { %759 = vst.msk [vmem:[#allocation2 + $0x50] sm:$0xff] %vm748_vm3, %v661_v44  ;;  %v1910_v61 = vpack.c.bf16 %v1879_v60, %v1878_v59 }
 0x171   :  { %2020 = vmatmul.bf16.gmra.mxu0 %v1910_v61 }
 0x172   :  { %889 = vrot.lane.b32.xlu1 %v801_v62, %s4018_s12  ;;  %674 = vrot.lane.b32.xlu0 %v585_v63, %s4017_s29 }
 0x173   :  { %891 = vrot.lane.b32.xlu2 %v802_v1, %s4018_s12  ;;  %v4954_v1 = vld [vmem:[%s6565_s0 + $0xb7] sm:$0xff] }
 0x174   :  { %v878_v2 = vpop.permute.xlu1 %877  ;;  %v663_v3 = vpop.permute.xlu0 %662 }
 0x175   :  { %976 = vst.msk [vmem:[#allocation2 + $0x50] sm:$0xff] %vm965_vm4, %v878_v2  ;;  %v448_v5 = vpop.permute.xlu2 %447 }
 0x176   :  { %760 = vst.msk [vmem:[#allocation2 + $0x58] sm:$0xff] %vm748_vm3, %v663_v3  ;;  %v805_v3 = vld [vmem:[%s6565_s0 + $0xb8] sm:$0xff] }
 0x177   :  { %977 = vst.msk [vmem:[#allocation2 + $0x58] sm:$0xff] %vm965_vm4, %v880_v50  ;;  %v1671_v50 = vld [vmem:[%s6565_s0 + $0xbb] sm:$0xff] }
 0x178   :  { %544 = vst.msk [vmem:[#allocation2 + $0x60] sm:$0xff] %vm531_vm2, %v448_v5 }
 0x17a   :  { %1108 = vrot.lane.b32.xlu1 %v1234_v42, %s4019_s15  ;;  %1106 = vrot.lane.b32.xlu0 %v1233_v43, %s4019_s15  ;;  %v1238_v43 = vld [vmem:[%s6565_s0 + $0xc1] sm:$0xff] }
 0x17b   :  { %1323 = vrot.lane.b32.xlu2 %v1235_v6, %s4020_s20 }
 0x17c   :  { %v1097_v7 = vpop.permute.xlu1 %1096  ;;  %v1095_v8 = vpop.permute.xlu0 %1094 }
 0x17d   :  { %1194 = vst.msk [vmem:[#allocation2 + $0x58] sm:$0xff] %vm1182_vm5, %v1097_v7  ;;  %v667_v12 = vpop.permute.xlu2 %666 }
 0x17e   :  { %1193 = vst.msk [vmem:[#allocation2 + $0x50] sm:$0xff] %vm1182_vm5, %v1095_v8  ;;  %v2006_v9 = vpop.f32.mrf.mxu0 }
 0x17f   :  { %1410 = vst.msk [vmem:[#allocation2 + $0x50] sm:$0xff] %vm1399_vm6, %v1312_v54  ;;  %v2007_v17 = vadd.f32 %v4860_v14, %v2006_v9 }
 0x181   :  { %v2093_v23 = vmax.f32 %v2007_v17, 0.0 }
 0x182   :  { %1540 = vrot.lane.b32.xlu1 %v1452_v10, %s4022_s8  ;;  %1325 = vrot.lane.b32.xlu0 %v1236_v11, %s4020_s20  ;;  %v806_v10 = vld [vmem:[%s6565_s0 + $0xc0] sm:$0xff] }
 0x183   :  { %1542 = vrot.lane.b32.xlu2 %v1453_v13, %s4022_s8 }
 0x184   :  { %v1529_v15 = vpop.permute.xlu1 %1528  ;;  %v1314_v16 = vpop.permute.xlu0 %1313 }
 0x185   :  { %1627 = vst.msk [vmem:[#allocation2 + $0x50] sm:$0xff] %vm1616_vm7, %v1529_v15  ;;  %v1099_v22 = vpop.permute.xlu2 %1098  ;;  %v4979_v15 = vld [vmem:[%s6565_s0 + $0xd1] sm:$0xff] }
 0x186   :  { %1411 = vst.msk [vmem:[#allocation2 + $0x58] sm:$0xff] %vm1399_vm6, %v1314_v16  ;;  %v2008_v18 = vpop.f32.mrf.mxu0  ;;  %v4984_v16 = vld [vmem:[%s6565_s0 + $0xc9] sm:$0xff] }
 0x187   :  { %1628 = vst.msk [vmem:[#allocation2 + $0x58] sm:$0xff] %vm1616_vm7, %v1531_v0  ;;  %v2009_v19 = vadd.f32 %v4860_v14, %v2008_v18  ;;  %v4949_v0 = vld [vmem:[%s6565_s0 + $0xbf] sm:$0xff]  ;;  %v1456_v18 = vld [vmem:[%s6565_s0 + $0xca] sm:$0xff] }
 0x189   :  { %v2094_v24 = vmax.f32 %v2009_v19, 0.0 }
 0x18a   :  { %1759 = vrot.lane.b32.xlu1 %v1670_v20, %s4023_s11  ;;  %1757 = vrot.lane.b32.xlu0 %v1669_v21, %s4023_s11 }
 0x18b   :  { %v4876_v25 = vpack.c.bf16 %v2094_v24, %v2093_v23  ;;  %459 = vrot.lane.b32.xlu2 %v4810_v55, %s4016_s23  ;;  %v1457_v23 = vld [vmem:[%s6565_s0 + $0xd2] sm:$0xff] }
 0x18c   :  { %v1748_v26 = vpop.permute.xlu1 %1747  ;;  %v1746_v27 = vpop.permute.xlu0 %1745 }
 0x18d   :  { %1845 = vst.msk [vmem:[#allocation2 + $0x58] sm:$0xff] %vm1833_vm8, %v1748_v26  ;;  %v1318_v29 = vpop.permute.xlu2 %1317  ;;  %v1674_v26 = vld [vmem:[%s6565_s0 + $0xd3] sm:$0xff] }
 0x18e   :  { %1844 = vst.msk [vmem:[#allocation2 + $0x50] sm:$0xff] %vm1833_vm8, %v1746_v27 }
 0x192   :  { %676 = vrot.lane.b32.xlu1 %v586_v28, %s4017_s29  ;;  %461 = vrot.lane.b32.xlu0 %v585_v63, %s4016_s23 }
 0x193   :  { %678 = vrot.lane.b32.xlu2 %v587_v30, %s4017_s29 }
 0x194   :  { %v665_v31 = vpop.permute.xlu1 %664  ;;  %v450_v32 = vpop.permute.xlu0 %449  ;;  %v1881_v33 = vld [vmem:[#allocation2 + $0x58] sm:$0xff] }
 0x195   :  { %761 = vst.msk [vmem:[#allocation2 + $0x60] sm:$0xff] %vm748_vm3, %v665_v31  ;;  %v1880_v34 = vld [vmem:[#allocation2 + $0x50] sm:$0xff]  ;;  %v1750_v38 = vpop.permute.xlu2 %1749 }
 0x196   :  { %545 = vst.msk [vmem:[#allocation2 + $0x68] sm:$0xff] %vm531_vm2, %v450_v32  ;;  %v1911_v35 = vpack.c.bf16 %v1881_v33, %v1880_v34  ;;  %v161_v32 = vld [vmem:[%s6565_s0 + $0xde] sm:$0xff]  ;;  %v160_v33 = vld [vmem:[%s6565_s0 + $0xd6] sm:$0xff] }
 0x197   :  { %762 = vst.msk [vmem:[#allocation2 + $0x68] sm:$0xff] %vm748_vm3, %v667_v12 }
 0x198   :  { %2025 = vmatmul.bf16.gmra.mxu0 %v1911_v35 }
 0x19a   :  { %895 = vrot.lane.b32.xlu1 %v804_v36, %s4018_s12  ;;  %893 = vrot.lane.b32.xlu0 %v803_v37, %s4018_s12  ;;  %v5025_v37 = vld [vmem:[%s6565_s0 + $0xd7] sm:$0xff] }
 0x19b   :  { %1110 = vrot.lane.b32.xlu2 %v1235_v6, %s4019_s15 }
 0x19c   :  { %v884_v39 = vpop.permute.xlu1 %883  ;;  %v882_v40 = vpop.permute.xlu0 %881 }
 0x19d   :  { %979 = vst.msk [vmem:[#allocation2 + $0x68] sm:$0xff] %vm965_vm4, %v884_v39  ;;  %v454_v42 = vpop.permute.xlu2 %453 }
 0x19e   :  { %978 = vst.msk [vmem:[#allocation2 + $0x60] sm:$0xff] %vm965_vm4, %v882_v40 }
 0x19f   :  { %1195 = vst.msk [vmem:[#allocation2 + $0x60] sm:$0xff] %vm1182_vm5, %v1099_v22  ;;  %v1673_v22 = vld [vmem:[%s6565_s0 + $0xcb] sm:$0xff] }
 0x1a0   :  { %547 = vst.msk [vmem:[#allocation2 + $0x78] sm:$0xff] %vm531_vm2, %v454_v42 }
 0x1a2   :  { %1327 = vrot.lane.b32.xlu1 %v1237_v41, %s4020_s20  ;;  %1112 = vrot.lane.b32.xlu0 %v1236_v11, %s4019_s15 }
 0x1a3   :  { %1329 = vrot.lane.b32.xlu2 %v1238_v43, %s4020_s20 }
 0x1a4   :  { %v1316_v44 = vpop.permute.xlu1 %1315  ;;  %v1101_v45 = vpop.permute.xlu0 %1100 }
 0x1a5   :  { %1412 = vst.msk [vmem:[#allocation2 + $0x60] sm:$0xff] %vm1399_vm6, %v1316_v44  ;;  %v2011_v46 = vpop.f32.mrf.mxu0  ;;  %v886_v49 = vpop.permute.xlu2 %885  ;;  %v5037_v44 = vld [vmem:[%s6565_s0 + $0xe7] sm:$0xff] }
 0x1a6   :  { %1196 = vst.msk [vmem:[#allocation2 + $0x68] sm:$0xff] %vm1182_vm5, %v1101_v45  ;;  %v2012_v51 = vadd.f32 %v4860_v14, %v2011_v46  ;;  %v5042_v45 = vld [vmem:[%s6565_s0 + $0xdf] sm:$0xff] }
 0x1a7   :  { %1413 = vst.msk [vmem:[#allocation2 + $0x68] sm:$0xff] %vm1399_vm6, %v1318_v29 }
 0x1a8   :  { %v2095_v59 = vmax.f32 %v2012_v51, 0.0  ;;  %v811_v51 = vld [vmem:[%s6565_s0 + $0xe8] sm:$0xff] }
 0x1aa   :  { %1546 = vrot.lane.b32.xlu1 %v1455_v47, %s4022_s8  ;;  %1544 = vrot.lane.b32.xlu0 %v1454_v48, %s4022_s8  ;;  %v5051_v47 = vld [vmem:[%s6565_s0 + $0xef] sm:$0xff] }
 0x1ab   :  { %1761 = vrot.lane.b32.xlu2 %v1671_v50, %s4023_s11  ;;  %v812_v50 = vld [vmem:[%s6565_s0 + $0xf0] sm:$0xff] }
 0x1ac   :  { %v1535_v52 = vpop.permute.xlu1 %1534  ;;  %v1533_v53 = vpop.permute.xlu0 %1532 }
 0x1ad   :  { %1630 = vst.msk [vmem:[#allocation2 + $0x68] sm:$0xff] %vm1616_vm7, %v1535_v52  ;;  %v2013_v54 = vpop.f32.mrf.mxu0  ;;  %v1105_v58 = vpop.permute.xlu2 %1104 }
 0x1ae   :  { %1629 = vst.msk [vmem:[#allocation2 + $0x60] sm:$0xff] %vm1616_vm7, %v1533_v53  ;;  %v2014_v55 = vadd.f32 %v4860_v14, %v2013_v54  ;;  %v5070_v53 = vld [vmem:[%s6565_s0 + $0xe9] sm:$0xff] }
 0x1af   :  { %1846 = vst.msk [vmem:[#allocation2 + $0x60] sm:$0xff] %vm1833_vm8, %v1750_v38 }
 0x1b0   :  { %v2096_v60 = vmax.f32 %v2014_v55, 0.0 }
 0x1b2   :  { %463 = vrot.lane.b32.xlu1 %v586_v28, %s4016_s23  ;;  %1763 = vrot.lane.b32.xlu0 %v1672_v57, %s4023_s11  ;;  %v4941_v61 = vpack.c.bf16 %v2096_v60, %v2095_v59  ;;  %v5080_v57 = vld [vmem:[%s6565_s0 + $0xf9] sm:$0xff]  ;;  %v5094_v60 = vld [vmem:[%s6565_s0 + $0x101] sm:$0xff] }
 0x1b3   :  { %465 = vrot.lane.b32.xlu2 %v587_v30, %s4016_s23 }
 0x1b4   :  { %v452_v62 = vpop.permute.xlu1 %451  ;;  %v1752_v63 = vpop.permute.xlu0 %1751 }
 0x1b5   :  { %546 = vst.msk [vmem:[#allocation2 + $0x70] sm:$0xff] %vm531_vm2, %v452_v62  ;;  %v1537_v2 = vpop.permute.xlu2 %1536 }
 0x1b6   :  { %1847 = vst.msk [vmem:[#allocation2 + $0x68] sm:$0xff] %vm1833_vm8, %v1752_v63  ;;  %v1882_v7 = vld [vmem:[#allocation2 + $0x60] sm:$0xff] }
 0x1ba   :  { %682 = vrot.lane.b32.xlu1 %v4949_v0, %s4017_s29  ;;  %680 = vrot.lane.b32.xlu0 %v4954_v1, %s4017_s29 }
 0x1bb   :  { %897 = vrot.lane.b32.xlu2 %v805_v3, %s4018_s12  ;;  %v164_v3 = vld [vmem:[%s6565_s0 + $0xf6] sm:$0xff] }
 0x1bc   :  { %v671_v5 = vpop.permute.xlu1 %670  ;;  %v669_v6 = vpop.permute.xlu0 %668 }
 0x1bd   :  { %764 = vst.msk [vmem:[#allocation2 + $0x78] sm:$0xff] %vm748_vm3, %v671_v5  ;;  %v1883_v8 = vld [vmem:[#allocation2 + $0x68] sm:$0xff]  ;;  %v1756_v11 = vpop.permute.xlu2 %1755 }
 0x1be   :  { %763 = vst.msk [vmem:[#allocation2 + $0x70] sm:$0xff] %vm748_vm3, %v669_v6  ;;  %v1912_v9 = vpack.c.bf16 %v1883_v8, %v1882_v7  ;;  %v1462_v6 = vld [vmem:[%s6565_s0 + $0xfa] sm:$0xff] }
 0x1bf   :  { %980 = vst.msk [vmem:[#allocation2 + $0x70] sm:$0xff] %vm965_vm4, %v886_v49 }
 0x1c0   :  { %2030 = vmatmul.bf16.gmra.mxu0 %v1912_v9  ;;  %v5118_v9 = vld [vmem:[%s6565_s0 + $0xf7] sm:$0xff] }
 0x1c2   :  { %1114 = vrot.lane.b32.xlu1 %v1237_v41, %s4019_s15  ;;  %899 = vrot.lane.b32.xlu0 %v806_v10, %s4018_s12  ;;  %v1463_v10 = vld [vmem:[%s6565_s0 + $0x102] sm:$0xff] }
 0x1c3   :  { %1116 = vrot.lane.b32.xlu2 %v1238_v43, %s4019_s15 }
 0x1c4   :  { %v1103_v12 = vpop.permute.xlu1 %1102  ;;  %v888_v13 = vpop.permute.xlu0 %887 }
 0x1c5   :  { %1197 = vst.msk [vmem:[#allocation2 + $0x70] sm:$0xff] %vm1182_vm5, %v1103_v12  ;;  %v673_v17 = vpop.permute.xlu2 %672  ;;  %v5129_v12 = vld [vmem:[%s6565_s0 + $0xff] sm:$0xff] }
 0x1c6   :  { %981 = vst.msk [vmem:[#allocation2 + $0x78] sm:$0xff] %vm965_vm4, %v888_v13 }
 0x1c7   :  { %1198 = vst.msk [vmem:[#allocation2 + $0x78] sm:$0xff] %vm1182_vm5, %v1105_v58  ;;  %v5085_v58 = vld [vmem:[%s6565_s0 + $0xf1] sm:$0xff] }
 0x1ca   :  { %1333 = vrot.lane.b32.xlu1 %v4979_v15, %s4020_s20  ;;  %1331 = vrot.lane.b32.xlu0 %v4984_v16, %s4020_s20 }
 0x1cb   :  { %1548 = vrot.lane.b32.xlu2 %v1456_v18, %s4022_s8 }
 0x1cc   :  { %v1322_v19 = vpop.permute.xlu1 %1321  ;;  %v1320_v20 = vpop.permute.xlu0 %1319 }
 0x1cd   :  { %1415 = vst.msk [vmem:[#allocation2 + $0x78] sm:$0xff] %vm1399_vm6, %v1322_v19  ;;  %v2016_v21 = vpop.f32.mrf.mxu0  ;;  %v892_v24 = vpop.permute.xlu2 %891 }
 0x1ce   :  { %1414 = vst.msk [vmem:[#allocation2 + $0x70] sm:$0xff] %vm1399_vm6, %v1320_v20  ;;  %v2017_v27 = vadd.f32 %v4860_v14, %v2016_v21  ;;  %v1680_v21 = vld [vmem:[%s6565_s0 + $0x103] sm:$0xff] }
 0x1cf   :  { %1631 = vst.msk [vmem:[#allocation2 + $0x70] sm:$0xff] %vm1616_vm7, %v1537_v2  ;;  %v165_v2 = vld [vmem:[%s6565_s0 + $0xfe] sm:$0xff] }
 0x1d0   :  { %v2097_v35 = vmax.f32 %v2017_v27, 0.0 }
 0x1d2   :  { %1765 = vrot.lane.b32.xlu1 %v1673_v22, %s4023_s11  ;;  %1550 = vrot.lane.b32.xlu0 %v1457_v23, %s4022_s8  ;;  %v1679_v22 = vld [vmem:[%s6565_s0 + $0xfb] sm:$0xff] }
 0x1d3   :  { %1767 = vrot.lane.b32.xlu2 %v1674_v26, %s4023_s11 }
 0x1d4   :  { %v1754_v28 = vpop.permute.xlu1 %1753  ;;  %v1539_v29 = vpop.permute.xlu0 %1538 }
 0x1d5   :  { %1848 = vst.msk [vmem:[#allocation2 + $0x70] sm:$0xff] %vm1833_vm8, %v1754_v28  ;;  %v2018_v30 = vpop.f32.mrf.mxu0  ;;  %v1324_v34 = vpop.permute.xlu2 %1323  ;;  %v5154_v28 = vld [vmem:[%s6565_s0 + $0x10f] sm:$0xff] }
 0x1d6   :  { %1632 = vst.msk [vmem:[#allocation2 + $0x78] sm:$0xff] %vm1616_vm7, %v1539_v29  ;;  %v2019_v31 = vadd.f32 %v4860_v14, %v2018_v30  ;;  %v5159_v29 = vld [vmem:[%s6565_s0 + $0x107] sm:$0xff] }
 0x1d7   :  { %1849 = vst.msk [vmem:[#allocation2 + $0x78] sm:$0xff] %vm1833_vm8, %v1756_v11 }
 0x1d8   :  { %v2098_v36 = vmax.f32 %v2019_v31, 0.0 }
 0x1da   :  { %260 = vrot.lane.b32.xlu1 %v161_v32, %s4015_s25  ;;  %258 = vrot.lane.b32.xlu0 %v160_v33, %s4015_s25  ;;  %v5027_v38 = vpack.c.bf16 %v2098_v36, %v2097_v35  ;;  %v815_v33 = vld [vmem:[%s6565_s0 + $0x108] sm:$0xff]  ;;  %v816_v35 = vld [vmem:[%s6565_s0 + $0x110] sm:$0xff] }
 0x1db   :  { %475 = vrot.lane.b32.xlu2 %v5025_v37, %s4016_s23 }
 0x1dc   :  { %v458_v39 = vpop.permute.xlu1 %457  ;;  %v456_v40 = vpop.permute.xlu0 %455  ;;  %v1884_v41 = vld [vmem:[#allocation2 + $0x70] sm:$0xff] }
 0x1dd   :  { %549 = vst.msk [vmem:[#allocation2 + $0x88] sm:$0xff] %vm531_vm2, %v458_v39  ;;  %v1543_v46 = vpop.permute.xlu2 %1542  ;;  %v5187_v39 = vld [vmem:[%s6565_s0 + $0xcf] sm:$0xff] }
 0x1de   :  { %548 = vst.msk [vmem:[#allocation2 + $0x80] sm:$0xff] %vm531_vm2, %v456_v40  ;;  %v1885_v42 = vld [vmem:[#allocation2 + $0x78] sm:$0xff] }
 0x1df   :  { %765 = vst.msk [vmem:[#allocation2 + $0x80] sm:$0xff] %vm748_vm3, %v673_v17  ;;  %v1913_v43 = vpack.c.bf16 %v1885_v42, %v1884_v41  ;;  %v5201_v41 = vld [vmem:[%s6565_s0 + $0x109] sm:$0xff] }
 0x1e1   :  { %2035 = vmatmul.bf16.gmra.mxu0 %v1913_v43 }
 0x1e2   :  { %692 = vrot.lane.b32.xlu1 %v5037_v44, %s4017_s29  ;;  %477 = vrot.lane.b32.xlu0 %v5042_v45, %s4016_s23 }
 0x1e3   :  { %694 = vrot.lane.b32.xlu2 %v5051_v47, %s4017_s29 }
 0x1e4   :  { %v890_v48 = vpop.permute.xlu1 %889  ;;  %v675_v49 = vpop.permute.xlu0 %674 }
 0x1e5   :  { %982 = vst.msk [vmem:[#allocation2 + $0x80] sm:$0xff] %vm965_vm4, %v890_v48  ;;  %v460_v52 = vpop.permute.xlu2 %459  ;;  %v807_v48 = vld [vmem:[%s6565_s0 + $0xc8] sm:$0xff] }
 0x1e6   :  { %766 = vst.msk [vmem:[#allocation2 + $0x88] sm:$0xff] %vm748_vm3, %v675_v49  ;;  %v5215_v49 = vld [vmem:[%s6565_s0 + $0x111] sm:$0xff] }
 0x1e7   :  { %983 = vst.msk [vmem:[#allocation2 + $0x88] sm:$0xff] %vm965_vm4, %v892_v24  ;;  %v157_v24 = vld [vmem:[%s6565_s0 + $0xbe] sm:$0xff] }
 0x1e8   :  { %550 = vst.msk [vmem:[#allocation2 + $0x90] sm:$0xff] %vm531_vm2, %v460_v52 }
 0x1ea   :  { %911 = vrot.lane.b32.xlu1 %v812_v50, %s4018_s12  ;;  %909 = vrot.lane.b32.xlu0 %v811_v51, %s4018_s12  ;;  %v808_v51 = vld [vmem:[%s6565_s0 + $0xd0] sm:$0xff] }
 0x1eb   :  { %1126 = vrot.lane.b32.xlu2 %v5070_v53, %s4019_s15 }
 0x1ec   :  { %v1109_v54 = vpop.permute.xlu1 %1108  ;;  %v1107_v55 = vpop.permute.xlu0 %1106 }
 0x1ed   :  { %1200 = vst.msk [vmem:[#allocation2 + $0x88] sm:$0xff] %vm1182_vm5, %v1109_v54  ;;  %v679_v59 = vpop.permute.xlu2 %678 }
 0x1ee   :  { %1199 = vst.msk [vmem:[#allocation2 + $0x80] sm:$0xff] %vm1182_vm5, %v1107_v55 }
 0x1ef   :  { %1416 = vst.msk [vmem:[#allocation2 + $0x80] sm:$0xff] %vm1399_vm6, %v1324_v34 }
 0x1f2   :  { %1343 = vrot.lane.b32.xlu1 %v5080_v57, %s4020_s20  ;;  %1128 = vrot.lane.b32.xlu0 %v5085_v58, %s4019_s15 }
 0x1f3   :  { %1345 = vrot.lane.b32.xlu2 %v5094_v60, %s4020_s20 }
 0x1f4   :  { %v1541_v62 = vpop.permute.xlu1 %1540  ;;  %v1326_v63 = vpop.permute.xlu0 %1325 }
 0x1f5   :  { %1633 = vst.msk [vmem:[#allocation2 + $0x80] sm:$0xff] %vm1616_vm7, %v1541_v62  ;;  %v1111_v5 = vpop.permute.xlu2 %1110  ;;  %v88_v62 = vld [vmem:[%s6565_s0 + $0xdd] sm:$0xff] }
 0x1f6   :  { %1417 = vst.msk [vmem:[#allocation2 + $0x88] sm:$0xff] %vm1399_vm6, %v1326_v63 }
 0x1f7   :  { %1634 = vst.msk [vmem:[#allocation2 + $0x88] sm:$0xff] %vm1616_vm7, %v1543_v46  ;;  %v5207_v46 = vpop.f32.mrf.mxu0 }
 0x1f8   :  { %125 = vst.msk [vmem:[#allocation2 + $0xd8] sm:$0xff] %vm97_vm0, %v88_v62  ;;  %v163_v62 = vld [vmem:[%s6565_s0 + $0xee] sm:$0xff] }
 0x1fa   :  { %268 = vrot.lane.b32.xlu1 %v165_v2, %s4015_s25  ;;  %266 = vrot.lane.b32.xlu0 %v164_v3, %s4015_s25  ;;  %v87_v2 = vld [vmem:[%s6565_s0 + $0xd5] sm:$0xff]  ;;  %v5236_v3 = vld [vmem:[%s6565_s0 + $0x121] sm:$0xff] }
 0x1fb   :  { %1560 = vrot.lane.b32.xlu2 %v1462_v6, %s4022_s8  ;;  %124 = vst.msk [vmem:[#allocation2 + $0xd0] sm:$0xff] %vm97_vm0, %v87_v2 }
 0x1fc   :  { %v1760_v7 = vpop.permute.xlu1 %1759  ;;  %v1758_v8 = vpop.permute.xlu0 %1757 }
 0x1fd   :  { %1851 = vst.msk [vmem:[#allocation2 + $0x88] sm:$0xff] %vm1833_vm8, %v1760_v7  ;;  %v1330_v11 = vpop.permute.xlu2 %1329 }
 0x1fe   :  { %1850 = vst.msk [vmem:[#allocation2 + $0x80] sm:$0xff] %vm1833_vm8, %v1758_v8 }
 0x1ff   :  { %v5244_v7 = vpop.f32.mrf.mxu0 }
 0x202   :  { %483 = vrot.lane.b32.xlu1 %v5118_v9, %s4016_s23  ;;  %1562 = vrot.lane.b32.xlu0 %v1463_v10, %s4022_s8 }
 0x203   :  { %485 = vrot.lane.b32.xlu2 %v5129_v12, %s4016_s23 }
 0x204   :  { %v677_v13 = vpop.permute.xlu1 %676  ;;  %v462_v17 = vpop.permute.xlu0 %461  ;;  %v1887_v18 = vld [vmem:[#allocation2 + $0x88] sm:$0xff] }
 0x205   :  { %767 = vst.msk [vmem:[#allocation2 + $0x90] sm:$0xff] %vm748_vm3, %v677_v13  ;;  %v1886_v19 = vld [vmem:[#allocation2 + $0x80] sm:$0xff]  ;;  %v1762_v23 = vpop.permute.xlu2 %1761 }
 0x206   :  { %551 = vst.msk [vmem:[#allocation2 + $0x98] sm:$0xff] %vm531_vm2, %v462_v17  ;;  %v1914_v20 = vpack.c.bf16 %v1887_v18, %v1886_v19 }
 0x207   :  { %768 = vst.msk [vmem:[#allocation2 + $0x98] sm:$0xff] %vm748_vm3, %v679_v59 }
 0x208   :  { %2040 = vmatmul.bf16.gmra.mxu0 %v1914_v20  ;;  %v5274_v20 = vld [vmem:[%s6565_s0 + $0xe1] sm:$0xff] }
 0x20a   :  { %1779 = vrot.lane.b32.xlu1 %v1680_v21, %s4023_s11  ;;  %1777 = vrot.lane.b32.xlu0 %v1679_v22, %s4023_s11  ;;  %v1683_v22 = vld [vmem:[%s6565_s0 + $0x11b] sm:$0xff] }
 0x20b   :  { %252 = vrot.lane.b32.xlu2 %v157_v24, %s4015_s25 }
 0x20c   :  { %v896_v26 = vpop.permute.xlu1 %895  ;;  %v894_v27 = vpop.permute.xlu0 %893 }
 0x20d   :  { %985 = vst.msk [vmem:[#allocation2 + $0x98] sm:$0xff] %vm965_vm4, %v896_v26  ;;  %v466_v30 = vpop.permute.xlu2 %465 }
 0x20e   :  { %984 = vst.msk [vmem:[#allocation2 + $0x90] sm:$0xff] %vm965_vm4, %v894_v27  ;;  %v1458_v27 = vld [vmem:[%s6565_s0 + $0xda] sm:$0xff] }
 0x20f   :  { %1201 = vst.msk [vmem:[#allocation2 + $0x90] sm:$0xff] %vm1182_vm5, %v1111_v5  ;;  %v5241_v5 = vld [vmem:[%s6565_s0 + $0x119] sm:$0xff] }
 0x210   :  { %553 = vst.msk [vmem:[#allocation2 + $0xa8] sm:$0xff] %vm531_vm2, %v466_v30  ;;  %v1684_v30 = vld [vmem:[%s6565_s0 + $0x123] sm:$0xff] }
 0x212   :  { %702 = vrot.lane.b32.xlu1 %v5154_v28, %s4017_s29  ;;  %700 = vrot.lane.b32.xlu0 %v5159_v29, %s4017_s29 }
 0x213   :  { %467 = vrot.lane.b32.xlu2 %v4954_v1, %s4016_s23 }
 0x214   :  { %v1328_v31 = vpop.permute.xlu1 %1327  ;;  %v1113_v32 = vpop.permute.xlu0 %1112 }
 0x215   :  { %1418 = vst.msk [vmem:[#allocation2 + $0x90] sm:$0xff] %vm1399_vm6, %v1328_v31  ;;  %v898_v34 = vpop.permute.xlu2 %897  ;;  %v5259_v17 = vpop.f32.mrf.mxu0 }
 0x216   :  { %1202 = vst.msk [vmem:[#allocation2 + $0x98] sm:$0xff] %vm1182_vm5, %v1113_v32  ;;  %v1459_v32 = vld [vmem:[%s6565_s0 + $0xe2] sm:$0xff] }
 0x217   :  { %1419 = vst.msk [vmem:[#allocation2 + $0x98] sm:$0xff] %vm1399_vm6, %v1330_v11  ;;  %v1466_v11 = vld [vmem:[%s6565_s0 + $0x11a] sm:$0xff] }
 0x21a   :  { %917 = vrot.lane.b32.xlu1 %v815_v33, %s4018_s12  ;;  %469 = vrot.lane.b32.xlu0 %v4949_v0, %s4016_s23  ;;  %v5192_v0 = vld [vmem:[%s6565_s0 + $0xc7] sm:$0xff] }
 0x21b   :  { %919 = vrot.lane.b32.xlu2 %v816_v35, %s4018_s12 }
 0x21c   :  { %v1547_v36 = vpop.permute.xlu1 %1546  ;;  %v1545_v1 = vpop.permute.xlu0 %1544 }
 0x21d   :  { %1636 = vst.msk [vmem:[#allocation2 + $0x98] sm:$0xff] %vm1616_vm7, %v1547_v36  ;;  %v1117_v40 = vpop.permute.xlu2 %1116 }
 0x21e   :  { %1635 = vst.msk [vmem:[#allocation2 + $0x90] sm:$0xff] %vm1616_vm7, %v1545_v1  ;;  %v92_v1 = vld [vmem:[%s6565_s0 + $0xfd] sm:$0xff] }
 0x21f   :  { %1852 = vst.msk [vmem:[#allocation2 + $0x90] sm:$0xff] %vm1833_vm8, %v1762_v23  ;;  %v5288_v23 = vpop.f32.mrf.mxu0 }
 0x220   :  { %129 = vst.msk [vmem:[#allocation2 + $0xf8] sm:$0xff] %vm97_vm0, %v92_v1 }
 0x222   :  { %686 = vrot.lane.b32.xlu1 %v5187_v39, %s4017_s29  ;;  %684 = vrot.lane.b32.xlu0 %v5192_v0, %s4017_s29 }
 0x223   :  { %1134 = vrot.lane.b32.xlu2 %v5201_v41, %s4019_s15 }
 0x224   :  { %v464_v42 = vpop.permute.xlu1 %463  ;;  %v1764_v43 = vpop.permute.xlu0 %1763 }
 0x225   :  { %552 = vst.msk [vmem:[#allocation2 + $0xa0] sm:$0xff] %vm531_vm2, %v464_v42  ;;  %v1549_v50 = vpop.permute.xlu2 %1548  ;;  %v91_v42 = vld [vmem:[%s6565_s0 + $0xf5] sm:$0xff] }
 0x226   :  { %1853 = vst.msk [vmem:[#allocation2 + $0x98] sm:$0xff] %vm1833_vm8, %v1764_v43  ;;  %v1888_v55 = vld [vmem:[#allocation2 + $0x90] sm:$0xff] }
 0x227   :  { %128 = vst.msk [vmem:[#allocation2 + $0xf0] sm:$0xff] %vm97_vm0, %v91_v42 }
 0x22a   :  { %901 = vrot.lane.b32.xlu1 %v807_v48, %s4018_s12  ;;  %1136 = vrot.lane.b32.xlu0 %v5215_v49, %s4019_s15  ;;  %v1676_v48 = vld [vmem:[%s6565_s0 + $0xe3] sm:$0xff] }
 0x22b   :  { %903 = vrot.lane.b32.xlu2 %v808_v51, %s4018_s12 }
 0x22c   :  { %v683_v52 = vpop.permute.xlu1 %682  ;;  %v681_v54 = vpop.permute.xlu0 %680 }
 0x22d   :  { %770 = vst.msk [vmem:[#allocation2 + $0xa8] sm:$0xff] %vm748_vm3, %v683_v52  ;;  %v1889_v59 = vld [vmem:[#allocation2 + $0x98] sm:$0xff]  ;;  %v1768_v6 = vpop.permute.xlu2 %1767 }
 0x22e   :  { %769 = vst.msk [vmem:[#allocation2 + $0xa0] sm:$0xff] %vm748_vm3, %v681_v54  ;;  %v1915_v63 = vpack.c.bf16 %v1889_v59, %v1888_v55  ;;  %v162_v52 = vld [vmem:[%s6565_s0 + $0xe6] sm:$0xff] }
 0x22f   :  { %986 = vst.msk [vmem:[#allocation2 + $0xa0] sm:$0xff] %vm965_vm4, %v898_v34 }
 0x230   :  { %2045 = vmatmul.bf16.gmra.mxu0 %v1915_v63 }
 0x232   :  { %1353 = vrot.lane.b32.xlu1 %v5236_v3, %s4020_s20  ;;  %1351 = vrot.lane.b32.xlu0 %v5241_v5, %s4020_s20 }
 0x233   :  { %1118 = vrot.lane.b32.xlu2 %v4984_v16, %s4019_s15  ;;  %v1467_v16 = vld [vmem:[%s6565_s0 + $0x122] sm:$0xff] }
 0x234   :  { %v1115_v8 = vpop.permute.xlu1 %1114  ;;  %v900_v10 = vpop.permute.xlu0 %899 }
 0x235   :  { %1203 = vst.msk [vmem:[#allocation2 + $0xa0] sm:$0xff] %vm1182_vm5, %v1115_v8  ;;  %v476_v13 = vpop.permute.xlu2 %475 }
 0x236   :  { %987 = vst.msk [vmem:[#allocation2 + $0xa8] sm:$0xff] %vm965_vm4, %v900_v10  ;;  %v84_v10 = vld [vmem:[%s6565_s0 + $0xbd] sm:$0xff] }
 0x237   :  { %1204 = vst.msk [vmem:[#allocation2 + $0xa8] sm:$0xff] %vm1182_vm5, %v1117_v40 }
 0x238   :  { %121 = vst.msk [vmem:[#allocation2 + $0xb8] sm:$0xff] %vm97_vm0, %v84_v10 }
 0x23a   :  { %1568 = vrot.lane.b32.xlu1 %v1466_v11, %s4022_s8  ;;  %1120 = vrot.lane.b32.xlu0 %v4979_v15, %s4019_s15  ;;  %v5279_v15 = vld [vmem:[%s6565_s0 + $0xd9] sm:$0xff] }
 0x23b   :  { %1570 = vrot.lane.b32.xlu2 %v1467_v16, %s4022_s8 }
 0x23c   :  { %v1334_v18 = vpop.permute.xlu1 %1333  ;;  %v1332_v19 = vpop.permute.xlu0 %1331 }
 0x23d   :  { %1421 = vst.msk [vmem:[#allocation2 + $0xa8] sm:$0xff] %vm1399_vm6, %v1334_v18  ;;  %v695_v21 = vpop.permute.xlu2 %694  ;;  %v2031_v33 = vpop.f32.mrf.mxu0 }
 0x23e   :  { %1420 = vst.msk [vmem:[#allocation2 + $0xa0] sm:$0xff] %vm1399_vm6, %v1332_v19  ;;  %v814_v19 = vld [vmem:[%s6565_s0 + $0x100] sm:$0xff] }
 0x23f   :  { %1637 = vst.msk [vmem:[#allocation2 + $0xa0] sm:$0xff] %vm1616_vm7, %v1549_v50  ;;  %v1675_v50 = vld [vmem:[%s6565_s0 + $0xdb] sm:$0xff] }
 0x242   :  { %1337 = vrot.lane.b32.xlu1 %v5274_v20, %s4020_s20  ;;  %1335 = vrot.lane.b32.xlu0 %v5279_v15, %s4020_s20 }
 0x243   :  { %1785 = vrot.lane.b32.xlu2 %v1683_v22, %s4023_s11  ;;  %v2032_v22 = vadd.f32 %v4860_v14, %v2031_v33 }
 0x244   :  { %v1766_v24 = vpop.permute.xlu1 %1765  ;;  %v1551_v26 = vpop.permute.xlu0 %1550 }
 0x245   :  { %1854 = vst.msk [vmem:[#allocation2 + $0xa0] sm:$0xff] %vm1833_vm8, %v1766_v24  ;;  %v1127_v31 = vpop.permute.xlu2 %1126  ;;  %v2033_v59 = vpop.f32.mrf.mxu0  ;;  %v2103_v33 = vmax.f32 %v2032_v22, 0.0 }
 0x246   :  { %1638 = vst.msk [vmem:[#allocation2 + $0xa8] sm:$0xff] %vm1616_vm7, %v1551_v26 }
 0x247   :  { %1855 = vst.msk [vmem:[#allocation2 + $0xa8] sm:$0xff] %vm1833_vm8, %v1768_v6 }
 0x24a   :  { %1552 = vrot.lane.b32.xlu1 %v1458_v27, %s4022_s8  ;;  %1787 = vrot.lane.b32.xlu0 %v1684_v30, %s4023_s11  ;;  %v2029_v27 = vadd.f32 %v4860_v14, %v5288_v23 }
 0x24b   :  { %1554 = vrot.lane.b32.xlu2 %v1459_v32, %s4022_s8 }
 0x24c   :  { %v261_v34 = vpop.permute.xlu1 %260  ;;  %v259_v35 = vpop.permute.xlu0 %258  ;;  %v1890_v36 = vld [vmem:[#allocation2 + $0xa0] sm:$0xff]  ;;  %v2102_v23 = vmax.f32 %v2029_v27, 0.0 }
 0x24d   :  { %342 = vst.msk [vmem:[#allocation2 + $0xd8] sm:$0xff] %vm314_vm1, %v261_v34  ;;  %v1346_v51 = vpop.permute.xlu2 %1345 }
 0x24e   :  { %341 = vst.msk [vmem:[#allocation2 + $0xd0] sm:$0xff] %vm314_vm1, %v259_v35  ;;  %v1891_v40 = vld [vmem:[#allocation2 + $0xa8] sm:$0xff]  ;;  %v2027_v35 = vadd.f32 %v4860_v14, %v5259_v17  ;;  %v2022_v17 = vadd.f32 %v4860_v14, %v5207_v46 }
 0x24f   :  { %558 = vst.msk [vmem:[#allocation2 + $0xd0] sm:$0xff] %vm531_vm2, %v476_v13  ;;  %v1916_v43 = vpack.c.bf16 %v1891_v40, %v1890_v36 }
 0x250   :  { %v2101_v40 = vmax.f32 %v2027_v35, 0.0 }
 0x251   :  { %2050 = vmatmul.bf16.gmra.mxu0 %v1916_v43 }
 0x252   :  { %1771 = vrot.lane.b32.xlu1 %v1676_v48, %s4023_s11  ;;  %1769 = vrot.lane.b32.xlu0 %v1675_v50, %s4023_s11  ;;  %v2133_v42 = vpack.c.bf16 %v2102_v23, %v2101_v40  ;;  %v2099_v50 = vmax.f32 %v2022_v17, 0.0  ;;  %v90_v23 = vld [vmem:[%s6565_s0 + $0xed] sm:$0xff] }
 0x253   :  { %262 = vrot.lane.b32.xlu2 %v162_v52, %s4015_s25  ;;  %v1682_v52 = vld [vmem:[%s6565_s0 + $0x113] sm:$0xff]  ;;  %127 = vst.msk [vmem:[#allocation2 + $0xe8] sm:$0xff] %vm97_vm0, %v90_v23  ;;  %v1687_v23 = vld [vmem:[%s6565_s0 + $0x13b] sm:$0xff] }
 0x254   :  { %v693_v54 = vpop.permute.xlu1 %692  ;;  %v478_v55 = vpop.permute.xlu0 %477 }
 0x255   :  { %775 = vst.msk [vmem:[#allocation2 + $0xd0] sm:$0xff] %vm748_vm3, %v693_v54  ;;  %v1561_v63 = vpop.permute.xlu2 %1560 }
 0x256   :  { %559 = vst.msk [vmem:[#allocation2 + $0xd8] sm:$0xff] %vm531_vm2, %v478_v55 }
 0x257   :  { %776 = vst.msk [vmem:[#allocation2 + $0xd8] sm:$0xff] %vm748_vm3, %v695_v21 }
 0x25a   :  { %479 = vrot.lane.b32.xlu1 %v5037_v44, %s4016_s23  ;;  %264 = vrot.lane.b32.xlu0 %v163_v62, %s4015_s25  ;;  %v813_v44 = vld [vmem:[%s6565_s0 + $0xf8] sm:$0xff]  ;;  %v159_v62 = vld [vmem:[%s6565_s0 + $0xce] sm:$0xff] }
 0x25b   :  { %481 = vrot.lane.b32.xlu2 %v5051_v47, %s4016_s23 }
 0x25c   :  { %v912_v2 = vpop.permute.xlu1 %911  ;;  %v910_v6 = vpop.permute.xlu0 %909 }
 0x25d   :  { %993 = vst.msk [vmem:[#allocation2 + $0xd8] sm:$0xff] %vm965_vm4, %v912_v2  ;;  %v486_v11 = vpop.permute.xlu2 %485 }
 0x25e   :  { %992 = vst.msk [vmem:[#allocation2 + $0xd0] sm:$0xff] %vm965_vm4, %v910_v6  ;;  %v2036_v8 = vpop.f32.mrf.mxu0  ;;  %v2002_v6 = vadd.f32 %v4860_v14, %v4812_v56 }
 0x25f   :  { %1209 = vst.msk [vmem:[#allocation2 + $0xd0] sm:$0xff] %vm1182_vm5, %v1127_v31  ;;  %v2037_v16 = vadd.f32 %v4860_v14, %v2036_v8 }
 0x261   :  { %v2105_v24 = vmax.f32 %v2037_v16, 0.0 }
 0x262   :  { %698 = vrot.lane.b32.xlu1 %v5129_v12, %s4017_s29  ;;  %696 = vrot.lane.b32.xlu0 %v5118_v9, %s4017_s29  ;;  %v2034_v12 = vadd.f32 %v4860_v14, %v2033_v59  ;;  %v2004_v59 = vadd.f32 %v4860_v14, %v4832_v4 }
 0x263   :  { %913 = vrot.lane.b32.xlu2 %v813_v44, %s4018_s12 }
 0x264   :  { %v1344_v47 = vpop.permute.xlu1 %1343  ;;  %v1129_v13 = vpop.permute.xlu0 %1128  ;;  %v2104_v30 = vmax.f32 %v2034_v12, 0.0 }
 0x265   :  { %1426 = vst.msk [vmem:[#allocation2 + $0xd0] sm:$0xff] %vm1399_vm6, %v1344_v47  ;;  %v253_v21 = vpop.permute.xlu2 %252 }
 0x266   :  { %1210 = vst.msk [vmem:[#allocation2 + $0xd8] sm:$0xff] %vm1182_vm5, %v1129_v13  ;;  %v2038_v18 = vpop.f32.mrf.mxu0  ;;  %v2134_v36 = vpack.c.bf16 %v2104_v30, %v2103_v33 }
 0x267   :  { %1427 = vst.msk [vmem:[#allocation2 + $0xd8] sm:$0xff] %vm1399_vm6, %v1346_v51  ;;  %v2039_v9 = vadd.f32 %v4860_v14, %v2038_v18 }
 0x268   :  { %1643 = vst.msk [vmem:[#allocation2 + $0xd0] sm:$0xff] %vm1616_vm7, %v1561_v63  ;;  %v158_v63 = vld [vmem:[%s6565_s0 + $0xc6] sm:$0xff] }
 0x269   :  { %v2106_v26 = vmax.f32 %v2039_v9, 0.0  ;;  %338 = vst.msk [vmem:[#allocation2 + $0xb8] sm:$0xff] %vm314_vm1, %v253_v21 }
 0x26a   :  { %1130 = vrot.lane.b32.xlu1 %v5080_v57, %s4019_s15  ;;  %915 = vrot.lane.b32.xlu0 %v814_v19, %s4018_s12  ;;  %v2024_v57 = vadd.f32 %v4860_v14, %v5244_v7 }
 0x26b   :  { %v2135_v31 = vpack.c.bf16 %v2106_v26, %v2105_v24  ;;  %1132 = vrot.lane.b32.xlu2 %v5094_v60, %s4019_s15  ;;  %v1464_v60 = vld [vmem:[%s6565_s0 + $0x10a] sm:$0xff] }
 0x26c   :  { %v269_v32 = vpop.permute.xlu1 %268  ;;  %v267_v34 = vpop.permute.xlu0 %266  ;;  %v2100_v7 = vmax.f32 %v2024_v57, 0.0 }
 0x26d   :  { %346 = vst.msk [vmem:[#allocation2 + $0xf8] sm:$0xff] %vm314_vm1, %v269_v32  ;;  %2156 = vmatpush.bf16.msrb.mxu1 %v2135_v31  ;;  %v468_v1 = vpop.permute.xlu2 %467  ;;  %v89_v32 = vld [vmem:[%s6565_s0 + $0xe5] sm:$0xff] }
 0x26e   :  { %345 = vst.msk [vmem:[#allocation2 + $0xf0] sm:$0xff] %vm314_vm1, %v267_v34  ;;  %v2132_v46 = vpack.c.bf16 %v2100_v7, %v2099_v50  ;;  %v1461_v34 = vld [vmem:[%s6565_s0 + $0xf2] sm:$0xff]  ;;  %v5521_v7 = vld [vmem:[%s6565_s0 + $0x11f] sm:$0xff] }
 0x26f   :  { %563 = vst.msk [vmem:[#allocation2 + $0xf8] sm:$0xff] %vm531_vm2, %v486_v11  ;;  %v2091_v11 = vmax.f32 %v2002_v6, 0.0 }
 0x270   :  { %554 = vst.msk [vmem:[#allocation2 + $0xb0] sm:$0xff] %vm531_vm2, %v468_v1 }
 0x271   :  { %2157 = vmatpush.bf16.msrb.mxu1 %v2134_v36  ;;  %126 = vst.msk [vmem:[#allocation2 + $0xe0] sm:$0xff] %vm97_vm0, %v89_v32  ;;  %v1678_v36 = vld [vmem:[%s6565_s0 + $0xf3] sm:$0xff] }
 0x272   :  { %1349 = vrot.lane.b32.xlu1 %v5215_v49, %s4020_s20  ;;  %1347 = vrot.lane.b32.xlu0 %v5201_v41, %s4020_s20  ;;  %v1681_v41 = vld [vmem:[%s6565_s0 + $0x10b] sm:$0xff] }
 0x273   :  { %1564 = vrot.lane.b32.xlu2 %v1464_v60, %s4022_s8  ;;  %v1465_v49 = vld [vmem:[%s6565_s0 + $0x112] sm:$0xff] }
 0x274   :  { %v484_v43 = vpop.permute.xlu1 %483  ;;  %v1563_v48 = vpop.permute.xlu0 %1562  ;;  %v817_v60 = vld [vmem:[%s6565_s0 + $0x118] sm:$0xff]  ;;  %v94_v32 = vld [vmem:[%s6565_s0 + $0x10d] sm:$0xff] }
 0x275   :  { %562 = vst.msk [vmem:[#allocation2 + $0xf0] sm:$0xff] %vm531_vm2, %v484_v43  ;;  %2158 = vmatpush.bf16.msrb.mxu1 %v2133_v42  ;;  %v920_v51 = vpop.permute.xlu2 %919  ;;  %v818_v43 = vld [vmem:[%s6565_s0 + $0x120] sm:$0xff] }
 0x276   :  { %1644 = vst.msk [vmem:[#allocation2 + $0xd8] sm:$0xff] %vm1616_vm7, %v1563_v48 }
 0x277   :  { %131 = vst.msk [vmem:[#allocation2 + $0x108] sm:$0xff] %vm97_vm0, %v94_v32 }
 0x279   :  { %2159 = vmatpush.bf16.msrb.mxu1 %v2132_v46 }
 0x27a   :  { %1781 = vrot.lane.b32.xlu1 %v1681_v41, %s4023_s11  ;;  %1566 = vrot.lane.b32.xlu0 %v1465_v49, %s4022_s8  ;;  %v5540_v41 = vld [vmem:[%s6565_s0 + $0x129] sm:$0xff] }
 0x27b   :  { %1783 = vrot.lane.b32.xlu2 %v1682_v52, %s4023_s11 }
 0x27c   :  { %v1780_v54 = vpop.permute.xlu1 %1779  ;;  %v1778_v55 = vpop.permute.xlu0 %1777 }
 0x27d   :  { %1861 = vst.msk [vmem:[#allocation2 + $0xd8] sm:$0xff] %vm1833_vm8, %v1780_v54  ;;  %2160 = vmatpush.bf16.msrb.mxu1 %v5027_v38  ;;  %v1135_v2 = vpop.permute.xlu2 %1134  ;;  %v2092_v38 = vmax.f32 %v2004_v59, 0.0 }
 0x27e   :  { %1860 = vst.msk [vmem:[#allocation2 + $0xd0] sm:$0xff] %vm1833_vm8, %v1778_v55  ;;  %v1252_v55 = vld [vmem:[%s6565_s0 + $0x131] sm:$0xff] }
 0x281   :  { %2161 = vmatpush.bf16.msrb.mxu1 %v4941_v61  ;;  %v2128_v61 = vpack.c.bf16 %v2092_v38, %v2091_v11 }
 0x282   :  { %256 = vrot.lane.b32.xlu1 %v159_v62, %s4015_s25  ;;  %254 = vrot.lane.b32.xlu0 %v158_v63, %s4015_s25  ;;  %v1469_v62 = vld [vmem:[%s6565_s0 + $0x132] sm:$0xff] }
 0x283   :  { %471 = vrot.lane.b32.xlu2 %v5192_v0, %s4016_s23 }
 0x284   :  { %v703_v4 = vpop.permute.xlu1 %702  ;;  %v701_v8 = vpop.permute.xlu0 %700  ;;  %v1897_v10 = vld [vmem:[#allocation2 + $0xd8] sm:$0xff] }
 0x285   :  { %780 = vst.msk [vmem:[#allocation2 + $0xf8] sm:$0xff] %vm748_vm3, %v703_v4  ;;  %v2041_v44 = vpop.f32.mrf.mxu0  ;;  %2162 = vmatpush.bf16.msrb.mxu1 %v4876_v25  ;;  %v1896_v47 = vld [vmem:[#allocation2 + $0xd0] sm:$0xff]  ;;  %v904_v13 = vpop.permute.xlu2 %903 }
 0x286   :  { %779 = vst.msk [vmem:[#allocation2 + $0xf0] sm:$0xff] %vm748_vm3, %v701_v8  ;;  %v1919_v56 = vpack.c.bf16 %v1897_v10, %v1896_v47  ;;  %v2042_v25 = vadd.f32 %v4860_v14, %v2041_v44  ;;  %v1686_v8 = vld [vmem:[%s6565_s0 + $0x133] sm:$0xff]  ;;  %v1685_v10 = vld [vmem:[%s6565_s0 + $0x12b] sm:$0xff] }
 0x287   :  { %997 = vst.msk [vmem:[#allocation2 + $0xf8] sm:$0xff] %vm965_vm4, %v920_v51  ;;  %v168_v44 = vld [vmem:[%s6565_s0 + $0x116] sm:$0xff] }
 0x288   :  { %2065 = vmatmul.bf16.vlgmr.msra.gmra.mxu1 %v1919_v56  ;;  %v2107_v19 = vmax.f32 %v2042_v25, 0.0  ;;  %v169_v25 = vld [vmem:[%s6565_s0 + $0x11e] sm:$0xff] }
 0x289   :  { %2163 = vmatpush.bf16.msrb.mxu1 %v2128_v61  ;;  %v86_v61 = vld [vmem:[%s6565_s0 + $0xcd] sm:$0xff] }
 0x28a   :  { %688 = vrot.lane.b32.xlu1 %v5025_v37, %s4017_s29  ;;  %473 = vrot.lane.b32.xlu0 %v5187_v39, %s4016_s23  ;;  %v810_v37 = vld [vmem:[%s6565_s0 + $0xe0] sm:$0xff]  ;;  %v809_v39 = vld [vmem:[%s6565_s0 + $0xd8] sm:$0xff]  ;;  %123 = vst.msk [vmem:[#allocation2 + $0xc8] sm:$0xff] %vm97_vm0, %v86_v61 }
 0x28b   :  { %690 = vrot.lane.b32.xlu2 %v5042_v45, %s4017_s29 }
 0x28c   :  { %v918_v16 = vpop.permute.xlu1 %917  ;;  %v470_v18 = vpop.permute.xlu0 %469 }
 0x28d   :  { %996 = vst.msk [vmem:[#allocation2 + $0xf0] sm:$0xff] %vm965_vm4, %v918_v16  ;;  %v2043_v0 = vpop.f32.mrf.mxu0  ;;  %v1119_v9 = vpop.permute.xlu2 %1118 }
 0x28e   :  { %555 = vst.msk [vmem:[#allocation2 + $0xb8] sm:$0xff] %vm531_vm2, %v470_v18  ;;  %v2044_v12 = vadd.f32 %v4860_v14, %v2043_v0 }
 0x28f   :  { %1213 = vst.msk [vmem:[#allocation2 + $0xf0] sm:$0xff] %vm1182_vm5, %v1135_v2 }
 0x290   :  { %v2108_v21 = vmax.f32 %v2044_v12, 0.0  ;;  %v602_v12 = vld [vmem:[%s6565_s0 + $0x127] sm:$0xff] }
 0x292   :  { %907 = vrot.lane.b32.xlu1 %v810_v37, %s4018_s12  ;;  %905 = vrot.lane.b32.xlu0 %v809_v39, %s4018_s12  ;;  %v5447_v45 = vpack.c.bf16 %v2108_v21, %v2107_v19  ;;  %v603_v37 = vld [vmem:[%s6565_s0 + $0x12f] sm:$0xff] }
 0x293   :  { %1122 = vrot.lane.b32.xlu2 %v5279_v15, %s4019_s15  ;;  %v167_v15 = vld [vmem:[%s6565_s0 + $0x10e] sm:$0xff] }
 0x294   :  { %v687_v14 = vpop.permute.xlu1 %686  ;;  %v685_v22 = vpop.permute.xlu0 %684 }
 0x295   :  { %772 = vst.msk [vmem:[#allocation2 + $0xb8] sm:$0xff] %vm748_vm3, %v687_v14  ;;  %v1571_v24 = vpop.permute.xlu2 %1570  ;;  %v820_v14 = vld [vmem:[%s6565_s0 + $0x130] sm:$0xff] }
 0x296   :  { %771 = vst.msk [vmem:[#allocation2 + $0xb0] sm:$0xff] %vm748_vm3, %v685_v22 }
 0x297   :  { %989 = vst.msk [vmem:[#allocation2 + $0xb8] sm:$0xff] %vm965_vm4, %v904_v13  ;;  %v85_v13 = vld [vmem:[%s6565_s0 + $0xc5] sm:$0xff] }
 0x298   :  { %122 = vst.msk [vmem:[#allocation2 + $0xc0] sm:$0xff] %vm97_vm0, %v85_v13 }
 0x29a   :  { %1339 = vrot.lane.b32.xlu1 %v5070_v53, %s4020_s20  ;;  %1124 = vrot.lane.b32.xlu0 %v5274_v20, %s4019_s15  ;;  %v166_v53 = vld [vmem:[%s6565_s0 + $0x106] sm:$0xff] }
 0x29b   :  { %1341 = vrot.lane.b32.xlu2 %v5085_v58, %s4020_s20  ;;  %v1460_v58 = vld [vmem:[%s6565_s0 + $0xea] sm:$0xff] }
 0x29c   :  { %v902_v26 = vpop.permute.xlu1 %901  ;;  %v1137_v27 = vpop.permute.xlu0 %1136 }
 0x29d   :  { %988 = vst.msk [vmem:[#allocation2 + $0xb0] sm:$0xff] %vm965_vm4, %v902_v26  ;;  %v1786_v20 = vpop.permute.xlu2 %1785 }
 0x29e   :  { %1214 = vst.msk [vmem:[#allocation2 + $0xf8] sm:$0xff] %vm1182_vm5, %v1137_v27  ;;  %v1253_v27 = vld [vmem:[%s6565_s0 + $0x139] sm:$0xff] }
 0x29f   :  { %1205 = vst.msk [vmem:[#allocation2 + $0xb0] sm:$0xff] %vm1182_vm5, %v1119_v9  ;;  %v819_v9 = vld [vmem:[%s6565_s0 + $0x128] sm:$0xff] }
 0x2a2   :  { %272 = vrot.lane.b32.xlu1 %v167_v15, %s4015_s25  ;;  %270 = vrot.lane.b32.xlu0 %v166_v53, %s4015_s25  ;;  %v1254_v15 = vld [vmem:[%s6565_s0 + $0x141] sm:$0xff] }
 0x2a3   :  { %1556 = vrot.lane.b32.xlu2 %v1460_v58, %s4022_s8 }
 0x2a4   :  { %v1354_v30 = vpop.permute.xlu1 %1353  ;;  %v1352_v31 = vpop.permute.xlu0 %1351 }
 0x2a5   :  { %1431 = vst.msk [vmem:[#allocation2 + $0xf8] sm:$0xff] %vm1399_vm6, %v1354_v30  ;;  %v1555_v35 = vpop.permute.xlu2 %1554 }
 0x2a6   :  { %1430 = vst.msk [vmem:[#allocation2 + $0xf0] sm:$0xff] %vm1399_vm6, %v1352_v31 }
 0x2a7   :  { %1648 = vst.msk [vmem:[#allocation2 + $0xf8] sm:$0xff] %vm1616_vm7, %v1571_v24 }
 0x2aa   :  { %487 = vrot.lane.b32.xlu1 %v5159_v29, %s4016_s23  ;;  %1558 = vrot.lane.b32.xlu0 %v1461_v34, %s4022_s8  ;;  %v1677_v29 = vld [vmem:[%s6565_s0 + $0xeb] sm:$0xff] }
 0x2ab   :  { %489 = vrot.lane.b32.xlu2 %v5154_v28, %s4016_s23  ;;  %v5509_v28 = vld [vmem:[%s6565_s0 + $0x117] sm:$0xff] }
 0x2ac   :  { %v1569_v33 = vpop.permute.xlu1 %1568  ;;  %v1121_v57 = vpop.permute.xlu0 %1120 }
 0x2ad   :  { %1647 = vst.msk [vmem:[#allocation2 + $0xf0] sm:$0xff] %vm1616_vm7, %v1569_v33  ;;  %v263_v1 = vpop.permute.xlu2 %262 }
 0x2ae   :  { %1206 = vst.msk [vmem:[#allocation2 + $0xb8] sm:$0xff] %vm1182_vm5, %v1121_v57  ;;  %v1471_v57 = vld [vmem:[%s6565_s0 + $0x142] sm:$0xff] }
 0x2af   :  { %1864 = vst.msk [vmem:[#allocation2 + $0xf0] sm:$0xff] %vm1833_vm8, %v1786_v20  ;;  %v1470_v20 = vld [vmem:[%s6565_s0 + $0x13a] sm:$0xff] }
 0x2b0   :  { %343 = vst.msk [vmem:[#allocation2 + $0xe0] sm:$0xff] %vm314_vm1, %v263_v1 }
 0x2b2   :  { %1775 = vrot.lane.b32.xlu1 %v1678_v36, %s4023_s11  ;;  %1773 = vrot.lane.b32.xlu0 %v1677_v29, %s4023_s11  ;;  %v1688_v29 = vld [vmem:[%s6565_s0 + $0x143] sm:$0xff] }
 0x2b3   :  { %704 = vrot.lane.b32.xlu2 %v5509_v28, %s4017_s29 }
 0x2b4   :  { %v1338_v17 = vpop.permute.xlu1 %1337  ;;  %v1336_v40 = vpop.permute.xlu0 %1335 }
 0x2b5   :  { %1423 = vst.msk [vmem:[#allocation2 + $0xb8] sm:$0xff] %vm1399_vm6, %v1338_v17  ;;  %v482_v42 = vpop.permute.xlu2 %481 }
 0x2b6   :  { %1422 = vst.msk [vmem:[#allocation2 + $0xb0] sm:$0xff] %vm1399_vm6, %v1336_v40  ;;  %v1900_v52 = vld [vmem:[#allocation2 + $0xf0] sm:$0xff] }
 0x2b7   :  { %1640 = vst.msk [vmem:[#allocation2 + $0xb8] sm:$0xff] %vm1616_vm7, %v1555_v35  ;;  %v93_v35 = vld [vmem:[%s6565_s0 + $0x105] sm:$0xff] }
 0x2b8   :  { %130 = vst.msk [vmem:[#allocation2 + $0x100] sm:$0xff] %vm97_vm0, %v93_v35 }
 0x2ba   :  { %921 = vrot.lane.b32.xlu1 %v817_v60, %s4018_s12  ;;  %706 = vrot.lane.b32.xlu0 %v5521_v7, %s4017_s29 }
 0x2bb   :  { %923 = vrot.lane.b32.xlu2 %v818_v43, %s4018_s12 }
 0x2bc   :  { %v1553_v48 = vpop.permute.xlu1 %1552  ;;  %v1788_v50 = vpop.permute.xlu0 %1787 }
 0x2bd   :  { %1639 = vst.msk [vmem:[#allocation2 + $0xb0] sm:$0xff] %vm1616_vm7, %v1553_v48  ;;  %v914_v46 = vpop.permute.xlu2 %913 }
 0x2be   :  { %1865 = vst.msk [vmem:[#allocation2 + $0xf8] sm:$0xff] %vm1833_vm8, %v1788_v50 }
 0x2c2   :  { %1140 = vrot.lane.b32.xlu1 %v5236_v3, %s4019_s15  ;;  %1138 = vrot.lane.b32.xlu0 %v5241_v5, %s4019_s15  ;;  %v1468_v5 = vld [vmem:[%s6565_s0 + $0x12a] sm:$0xff] }
 0x2c3   :  { %1355 = vrot.lane.b32.xlu2 %v5540_v41, %s4020_s20 }
 0x2c4   :  { %v1772_v49 = vpop.permute.xlu1 %1771  ;;  %v1770_v51 = vpop.permute.xlu0 %1769 }
 0x2c5   :  { %1857 = vst.msk [vmem:[#allocation2 + $0xb8] sm:$0xff] %vm1833_vm8, %v1772_v49  ;;  %v1901_v54 = vld [vmem:[#allocation2 + $0xf8] sm:$0xff]  ;;  %v1133_v59 = vpop.permute.xlu2 %1132 }
 0x2c6   :  { %1856 = vst.msk [vmem:[#allocation2 + $0xb0] sm:$0xff] %vm1833_vm8, %v1770_v51  ;;  %v1921_v3 = vpack.c.bf16 %v1901_v54, %v1900_v52 }
 0x2c8   :  { %2075 = vmatmul.bf16.vlgmr.msra.gmra.mxu2 %v1921_v3 }
 0x2ca   :  { %1572 = vrot.lane.b32.xlu1 %v1468_v5, %s4022_s8  ;;  %1357 = vrot.lane.b32.xlu0 %v1252_v55, %s4020_s20  ;;  %v95_v5 = vld [vmem:[%s6565_s0 + $0x115] sm:$0xff] }
 0x2cb   :  { %1574 = vrot.lane.b32.xlu2 %v1469_v62, %s4022_s8  ;;  %132 = vst.msk [vmem:[#allocation2 + $0x110] sm:$0xff] %vm97_vm0, %v95_v5 }
 0x2cc   :  { %v480_v63 = vpop.permute.xlu1 %479  ;;  %v265_v2 = vpop.permute.xlu0 %264  ;;  %v1893_v6 = vld [vmem:[#allocation2 + $0xb8] sm:$0xff] }
 0x2cd   :  { %560 = vst.msk [vmem:[#allocation2 + $0xe0] sm:$0xff] %vm531_vm2, %v480_v63  ;;  %v1892_v38 = vld [vmem:[#allocation2 + $0xb0] sm:$0xff]  ;;  %v1565_v11 = vpop.permute.xlu2 %1564 }
 0x2ce   :  { %344 = vst.msk [vmem:[#allocation2 + $0xe8] sm:$0xff] %vm314_vm1, %v265_v2  ;;  %v1917_v4 = vpack.c.bf16 %v1893_v6, %v1892_v38  ;;  %v96_v38 = vld [vmem:[%s6565_s0 + $0x11d] sm:$0xff] }
 0x2cf   :  { %561 = vst.msk [vmem:[#allocation2 + $0xe8] sm:$0xff] %vm531_vm2, %v482_v42 }
 0x2d0   :  { %2055 = vmatmul.bf16.gmra.mxu0 %v1917_v4  ;;  %133 = vst.msk [vmem:[#allocation2 + $0x118] sm:$0xff] %vm97_vm0, %v96_v38  ;;  %vm3251_vm0 = vcmask 1043456  }
 0x2d2   :  { %1791 = vrot.lane.b32.xlu1 %v1686_v8, %s4023_s11  ;;  %1789 = vrot.lane.b32.xlu0 %v1685_v10, %s4023_s11 }
 0x2d3   :  { %274 = vrot.lane.b32.xlu2 %v168_v44, %s4015_s25 }
 0x2d4   :  { %v699_v47 = vpop.permute.xlu1 %698  ;;  %v697_v56 = vpop.permute.xlu0 %696 }
 0x2d5   :  { %778 = vst.msk [vmem:[#allocation2 + $0xe8] sm:$0xff] %vm748_vm3, %v699_v47  ;;  %v1784_v16 = vpop.permute.xlu2 %1783 }
 0x2d6   :  { %777 = vst.msk [vmem:[#allocation2 + $0xe0] sm:$0xff] %vm748_vm3, %v697_v56 }
 0x2d7   :  { %994 = vst.msk [vmem:[#allocation2 + $0xe0] sm:$0xff] %vm965_vm4, %v914_v46 }
 0x2da   :  { %276 = vrot.lane.b32.xlu0 %v169_v25, %s4015_s25  ;;  %491 = vrot.lane.b32.xlu1 %v5509_v28, %s4016_s23 }
 0x2db   :  { %493 = vrot.lane.b32.xlu2 %v5521_v7, %s4016_s23 }
 0x2dc   :  { %v1131_v18 = vpop.permute.xlu1 %1130  ;;  %v916_v0 = vpop.permute.xlu0 %915 }
 0x2dd   :  { %1211 = vst.msk [vmem:[#allocation2 + $0xe0] sm:$0xff] %vm1182_vm5, %v1131_v18  ;;  %v472_v39 = vpop.permute.xlu2 %471 }
 0x2de   :  { %995 = vst.msk [vmem:[#allocation2 + $0xe8] sm:$0xff] %vm965_vm4, %v916_v0 }
 0x2df   :  { %1212 = vst.msk [vmem:[#allocation2 + $0xe8] sm:$0xff] %vm1182_vm5, %v1133_v59 }
 0x2e2   :  { %708 = vrot.lane.b32.xlu0 %v602_v12, %s4017_s29  ;;  %710 = vrot.lane.b32.xlu1 %v603_v37, %s4017_s29 }
 0x2e3   :  { %925 = vrot.lane.b32.xlu2 %v819_v9, %s4018_s12 }
 0x2e4   :  { %v1350_v19 = vpop.permute.xlu1 %1349  ;;  %v1348_v21 = vpop.permute.xlu0 %1347 }
 0x2e5   :  { %1429 = vst.msk [vmem:[#allocation2 + $0xe8] sm:$0xff] %vm1399_vm6, %v1350_v19  ;;  %v691_v22 = vpop.permute.xlu2 %690 }
 0x2e6   :  { %1428 = vst.msk [vmem:[#allocation2 + $0xe0] sm:$0xff] %vm1399_vm6, %v1348_v21 }
 0x2e7   :  { %1645 = vst.msk [vmem:[#allocation2 + $0xe0] sm:$0xff] %vm1616_vm7, %v1565_v11 }
 0x2ea   :  { %927 = vrot.lane.b32.xlu0 %v820_v14, %s4018_s12  ;;  %1142 = vrot.lane.b32.xlu1 %v5540_v41, %s4019_s15 }
 0x2eb   :  { %1144 = vrot.lane.b32.xlu2 %v1252_v55, %s4019_s15 }
 0x2ec   :  { %v1782_v24 = vpop.permute.xlu1 %1781  ;;  %v1567_v26 = vpop.permute.xlu0 %1566 }
 0x2ed   :  { %1862 = vst.msk [vmem:[#allocation2 + $0xe0] sm:$0xff] %vm1833_vm8, %v1782_v24  ;;  %v1123_v53 = vpop.permute.xlu2 %1122 }
 0x2ee   :  { %1646 = vst.msk [vmem:[#allocation2 + $0xe8] sm:$0xff] %vm1616_vm7, %v1567_v26 }
 0x2ef   :  { %1863 = vst.msk [vmem:[#allocation2 + $0xe8] sm:$0xff] %vm1833_vm8, %v1784_v16 }
 0x2f2   :  { %1359 = vrot.lane.b32.xlu0 %v1253_v27, %s4020_s20  ;;  %1361 = vrot.lane.b32.xlu1 %v1254_v15, %s4020_s20 }
 0x2f3   :  { %1576 = vrot.lane.b32.xlu2 %v1470_v20, %s4022_s8 }
 0x2f4   :  { %v257_v58 = vpop.permute.xlu1 %256  ;;  %v255_v30 = vpop.permute.xlu0 %254  ;;  %v1898_v31 = vld [vmem:[#allocation2 + $0xe0] sm:$0xff] }
 0x2f5   :  { %340 = vst.msk [vmem:[#allocation2 + $0xc8] sm:$0xff] %vm314_vm1, %v257_v58  ;;  %v1342_v36 = vpop.permute.xlu2 %1341 }
 0x2f6   :  { %339 = vst.msk [vmem:[#allocation2 + $0xc0] sm:$0xff] %vm314_vm1, %v255_v30  ;;  %v1899_v34 = vld [vmem:[#allocation2 + $0xe8] sm:$0xff] }
 0x2f7   :  { %556 = vst.msk [vmem:[#allocation2 + $0xc0] sm:$0xff] %vm531_vm2, %v472_v39  ;;  %v1920_v33 = vpack.c.bf16 %v1899_v34, %v1898_v31  ;;  %v5699_v39 = vld [vmem:[%s6568_s3] ss:$0 sm:$0xff] }
 0x2f9   :  { %2070 = vmatmul.bf16.gmra.mxu1 %v1920_v33 }
 0x2fa   :  { %1578 = vrot.lane.b32.xlu0 %v1471_v57, %s4022_s8  ;;  %1793 = vrot.lane.b32.xlu1 %v1687_v23, %s4023_s11 }
 0x2fb   :  { %1795 = vrot.lane.b32.xlu2 %v1688_v29, %s4023_s11 }
 0x2fc   :  { %v689_v1 = vpop.permute.xlu1 %688  ;;  %v474_v28 = vpop.permute.xlu0 %473 }
 0x2fd   :  { %773 = vst.msk [vmem:[#allocation2 + $0xc0] sm:$0xff] %vm748_vm3, %v689_v1  ;;  %v1557_v17 = vpop.permute.xlu2 %1556  ;;  %v2046_v1 = vpop.f32.mrf.mxu0 }
 0x2fe   :  { %557 = vst.msk [vmem:[#allocation2 + $0xc8] sm:$0xff] %vm531_vm2, %v474_v28 }
 0x2ff   :  { %774 = vst.msk [vmem:[#allocation2 + $0xc8] sm:$0xff] %vm748_vm3, %v691_v22 }
 0x304   :  { %v908_v40 = vpop.permute.xlu1 %907  ;;  %v906_v60 = vpop.permute.xlu0 %905 }
 0x305   :  { %991 = vst.msk [vmem:[#allocation2 + $0xc8] sm:$0xff] %vm965_vm4, %v908_v40  ;;  %v490_v7 = vpop.permute.xlu2 %489  ;;  %v2066_v30 = vpop.f32.mrf.mxu1 }
 0x306   :  { %990 = vst.msk [vmem:[#allocation2 + $0xc0] sm:$0xff] %vm965_vm4, %v906_v60 }
 0x307   :  { %1207 = vst.msk [vmem:[#allocation2 + $0xc0] sm:$0xff] %vm1182_vm5, %v1123_v53 }
 0x30c   :  { %v1340_v42 = vpop.permute.xlu1 %1339  ;;  %v1125_v43 = vpop.permute.xlu0 %1124 }
 0x30d   :  { %1424 = vst.msk [vmem:[#allocation2 + $0xc0] sm:$0xff] %vm1399_vm6, %v1340_v42  ;;  %v705_v48 = vpop.permute.xlu2 %704  ;;  %v2068_v57 = vpop.f32.mrf.mxu1 }
 0x30e   :  { %1208 = vst.msk [vmem:[#allocation2 + $0xc8] sm:$0xff] %vm1182_vm5, %v1125_v43  ;;  %v2069_v60 = vadd.f32 %v5699_v39, %v2068_v57  ;;  %v2048_v42 = vpop.f32.mrf.mxu0  ;;  %v2067_v43 = vadd.f32 %v5699_v39, %v2066_v30  ;;  %v3929_v30 = vld [vmem:[%s6569_s4 + $0x304] sm:$0xf] }
 0x30f   :  { %1425 = vst.msk [vmem:[#allocation2 + $0xc8] sm:$0xff] %vm1399_vm6, %v1342_v36  ;;  %v3913_v57 = vld [vmem:[%s6569_s4 + $0x284] sm:$0xf] }
 0x310   :  { %1641 = vst.msk [vmem:[#allocation2 + $0xc0] sm:$0xff] %vm1616_vm7, %v1557_v17 }
 0x314   :  { %v273_v50 = vpop.permute.xlu1 %272  ;;  %v271_v46 = vpop.permute.xlu0 %270 }
 0x315   :  { %348 = vst.msk [vmem:[#allocation2 + $0x108] sm:$0xff] %vm314_vm1, %v273_v50  ;;  %v924_v41 = vpop.permute.xlu2 %923 }
 0x316   :  { %347 = vst.msk [vmem:[#allocation2 + $0x100] sm:$0xff] %vm314_vm1, %v271_v46  ;;  %v2118_v46 = vmax.f32 %v2069_v60, 0.0 }
 0x317   :  { %565 = vst.msk [vmem:[#allocation2 + $0x108] sm:$0xff] %vm531_vm2, %v490_v7 }
 0x31c   :  { %v488_v49 = vpop.permute.xlu1 %487  ;;  %v1559_v51 = vpop.permute.xlu0 %1558 }
 0x31d   :  { %564 = vst.msk [vmem:[#allocation2 + $0x100] sm:$0xff] %vm531_vm2, %v488_v49  ;;  %v1356_v52 = vpop.permute.xlu2 %1355  ;;  %v2117_v49 = vmax.f32 %v2067_v43, 0.0  ;;  %v3507_v43 = vld [vmem:[%s6569_s4 + $0x180] sm:$0xf] }
 0x31e   :  { %1642 = vst.msk [vmem:[#allocation2 + $0xc8] sm:$0xff] %vm1616_vm7, %v1559_v51 }
 0x31f   :  { %781 = vst.msk [vmem:[#allocation2 + $0x100] sm:$0xff] %vm748_vm3, %v705_v48  ;;  %v2141_v51 = vpack.c.bf16 %v2118_v46, %v2117_v49  ;;  %v3509_v46 = vld [vmem:[%s6569_s4 + $0x1c0] sm:$0xf0] }
 0x324   :  { %v1776_v54 = vpop.permute.xlu1 %1775  ;;  %v1774_v3 = vpop.permute.xlu0 %1773 }
 0x325   :  { %1859 = vst.msk [vmem:[#allocation2 + $0xc8] sm:$0xff] %vm1833_vm8, %v1776_v54  ;;  %v1575_v55 = vpop.permute.xlu2 %1574 }
 0x326   :  { %1858 = vst.msk [vmem:[#allocation2 + $0xc0] sm:$0xff] %vm1833_vm8, %v1774_v3 }
 0x32c   :  { %v922_v59 = vpop.permute.xlu1 %921  ;;  %v707_v62 = vpop.permute.xlu0 %706  ;;  %v1895_v63 = vld [vmem:[#allocation2 + $0xc8] sm:$0xff] }
 0x32d   :  { %998 = vst.msk [vmem:[#allocation2 + $0x100] sm:$0xff] %vm965_vm4, %v922_v59  ;;  %v1894_v2 = vld [vmem:[#allocation2 + $0xc0] sm:$0xff]  ;;  %v275_v4 = vpop.permute.xlu2 %274 }
 0x32e   :  { %782 = vst.msk [vmem:[#allocation2 + $0x108] sm:$0xff] %vm748_vm3, %v707_v62  ;;  %v1918_v6 = vpack.c.bf16 %v1895_v63, %v1894_v2 }
 0x32f   :  { %999 = vst.msk [vmem:[#allocation2 + $0x108] sm:$0xff] %vm965_vm4, %v924_v41 }
 0x330   :  { %2060 = vmatmul.bf16.gmra.mxu0 %v1918_v6  ;;  %349 = vst.msk [vmem:[#allocation2 + $0x110] sm:$0xff] %vm314_vm1, %v275_v4 }
 0x334   :  { %v1141_v8 = vpop.permute.xlu1 %1140  ;;  %v1139_v10 = vpop.permute.xlu0 %1138 }
 0x335   :  { %1216 = vst.msk [vmem:[#allocation2 + $0x108] sm:$0xff] %vm1182_vm5, %v1141_v8  ;;  %v494_v47 = vpop.permute.xlu2 %493 }
 0x336   :  { %1215 = vst.msk [vmem:[#allocation2 + $0x100] sm:$0xff] %vm1182_vm5, %v1139_v10 }
 0x337   :  { %1432 = vst.msk [vmem:[#allocation2 + $0x100] sm:$0xff] %vm1399_vm6, %v1356_v52  ;;  %v2051_v52 = vpop.f32.mrf.mxu0 }
 0x33c   :  { %v1573_v11 = vpop.permute.xlu1 %1572  ;;  %v1358_v44 = vpop.permute.xlu0 %1357 }
 0x33d   :  { %1649 = vst.msk [vmem:[#allocation2 + $0x100] sm:$0xff] %vm1616_vm7, %v1573_v11  ;;  %v926_v12 = vpop.permute.xlu2 %925 }
 0x33e   :  { %1433 = vst.msk [vmem:[#allocation2 + $0x108] sm:$0xff] %vm1399_vm6, %v1358_v44  ;;  %v2052_v44 = vadd.f32 %v5699_v39, %v2051_v52  ;;  %v3873_v52 = vld [vmem:[%s6569_s4 + $0x13c] sm:$0xf0] }
 0x33f   :  { %1650 = vst.msk [vmem:[#allocation2 + $0x108] sm:$0xff] %vm1616_vm7, %v1575_v55  ;;  %v2053_v54 = vpop.f32.mrf.mxu0 }
 0x340   :  { %v2054_v8 = vadd.f32 %v5699_v39, %v2053_v54 }
 0x344   :  { %v1792_v56 = vpop.permute.xlu1 %1791  ;;  %v1790_v61 = vpop.permute.xlu0 %1789 }
 0x345   :  { %1867 = vst.msk [vmem:[#allocation2 + $0x108] sm:$0xff] %vm1833_vm8, %v1792_v56  ;;  %v1145_v27 = vpop.permute.xlu2 %1144  ;;  %v2049_v56 = vadd.f32 %v5699_v39, %v2048_v42 }
 0x346   :  { %1866 = vst.msk [vmem:[#allocation2 + $0x100] sm:$0xff] %vm1833_vm8, %v1790_v61  ;;  %v2112_v61 = vmax.f32 %v2054_v8, 0.0 }
 0x34b   :  { %v2076_v13 = vpop.f32.mrf.mxu2 }
 0x34c   :  { %v277_v25 = vpop.permute.xlu0 %276  ;;  %v492_v16 = vpop.permute.xlu1 %491  ;;  %v1903_v18 = vld [vmem:[#allocation2 + $0x108] sm:$0xff]  ;;  %v2077_v9 = vadd.f32 %v5699_v39, %v2076_v13 }
 0x34d   :  { %350 = vst.msk [vmem:[#allocation2 + $0x118] sm:$0xff] %vm314_vm1, %v277_v25  ;;  %v1902_v0 = vld [vmem:[#allocation2 + $0x100] sm:$0xff]  ;;  %v1577_v58 = vpop.permute.xlu2 %1576  ;;  %v2056_v3 = vpop.f32.mrf.mxu0  ;;  %v2047_v25 = vadd.f32 %v5699_v39, %v2046_v1  ;;  %v3571_v1 = vld [vmem:[%s6569_s4 + $0x200] sm:$0xf] }
 0x34e   :  { %567 = vst.msk [vmem:[#allocation2 + $0x118] sm:$0xff] %vm531_vm2, %v494_v47  ;;  %v1922_v37 = vpack.c.bf16 %v1903_v18, %v1902_v0  ;;  %v2121_v24 = vmax.f32 %v2077_v9, 0.0  ;;  %v2057_v6 = vadd.f32 %v5699_v39, %v2056_v3  ;;  %v2127_v18 = vld [vmem:[%s6566_s1] sm:$0x7]  ;;  %v2110_v0 = vmax.f32 %v2049_v56, 0.0 }
 0x34f   :  { %566 = vst.msk [vmem:[#allocation2 + $0x110] sm:$0xff] %vm531_vm2, %v492_v16  ;;  %v2111_v16 = vmax.f32 %v2052_v44, 0.0  ;;  %v3865_v3 = vld [vmem:[%s6569_s4 + $0x104] sm:$0xf] }
 0x350   :  { %2080 = vmatmul.bf16.gmra.mxu2 %v1922_v37  ;;  %v2113_v47 = vmax.f32 %v2057_v6, 0.0  ;;  %2147 = vst [vmem:[#allocation1] ss:$9 sm:$0xff] %v2127_v18  ;;  %v2109_v37 = vmax.f32 %v2047_v25, 0.0  ;;  %v3379_v6 = vld [vmem:[%s6569_s4 + $0x80] sm:$0xf] }
 0x351   :  { %v3381_v44 = vld [vmem:[%s6569_s4 + $0xc0] sm:$0xf0] }
 0x352   :  { %v2137_v9 = vpack.c.bf16 %v2110_v0, %v2109_v37  ;;  %v3717_v37 = vld [vmem:[%s6569_s4 + $0x350] sm:$0xf0] }
 0x353   :  { %v2078_v19 = vpop.f32.mrf.mxu2 }
 0x354   :  { %v2079_v21 = vadd.f32 %v5699_v39, %v2078_v19  ;;  %v709_v14 = vpop.permute.xlu0 %708  ;;  %v711_v22 = vpop.permute.xlu1 %710 }
 0x355   :  { %783 = vst.msk [vmem:[#allocation2 + $0x110] sm:$0xff] %vm748_vm3, %v709_v14  ;;  %v1796_v34 = vpop.permute.xlu2 %1795  ;;  %v2058_v5 = vpop.f32.mrf.mxu0 }
 0x356   :  { %v2122_v26 = vmax.f32 %v2079_v21, 0.0  ;;  %1000 = vst.msk [vmem:[#allocation2 + $0x110] sm:$0xff] %vm965_vm4, %v926_v12  ;;  %v2059_v63 = vadd.f32 %v5699_v39, %v2058_v5  ;;  %v2138_v12 = vpack.c.bf16 %v2112_v61, %v2111_v16  ;;  %v3445_v5 = vld [vmem:[%s6569_s4 + $0x140] sm:$0xf0]  ;;  %v3947_v61 = vld [vmem:[%s6569_s4 + $0x394] sm:$0xf] }
 0x357   :  { %784 = vst.msk [vmem:[#allocation2 + $0x118] sm:$0xff] %vm748_vm3, %v711_v22  ;;  %v2149_v19 = vld [vmem:[#allocation1 + $0x9] sm:$0xff]  ;;  %v2148_v21 = vld [vmem:[#allocation1] sm:$0xff] }
 0x358   :  { %v2143_v15 = vpack.c.bf16 %v2122_v26, %v2121_v24  ;;  %v2114_v10 = vmax.f32 %v2059_v63, 0.0  ;;  %2164 = vmatmul.bf16.vlgmr.msrb.gmra.mxu1 %v2148_v21  ;;  %v3763_v22 = vld [vmem:[%s6569_s4 + $0x380] sm:$0xf]  ;;  %v3945_v26 = vld [vmem:[%s6569_s4 + $0x384] sm:$0xf] }
 0x359   :  { %v3953_v24 = vld [vmem:[%s6569_s4 + $0x3bc] sm:$0xf0]  ;;  %v3915_v21 = vld [vmem:[%s6569_s4 + $0x294] sm:$0xf] }
 0x35a   :  { %2169 = vmatpush.bf16.msrb.mxu2 %v2143_v15  ;;  %v2139_v13 = vpack.c.bf16 %v2114_v10, %v2113_v47 }
 0x35c   :  { %v928_v53 = vpop.permute.xlu0 %927  ;;  %v1143_v20 = vpop.permute.xlu1 %1142 }
 0x35d   :  { %1001 = vst.msk [vmem:[#allocation2 + $0x118] sm:$0xff] %vm965_vm4, %v928_v53 }
 0x35e   :  { %1218 = vst.msk [vmem:[#allocation2 + $0x118] sm:$0xff] %vm1182_vm5, %v1145_v27  ;;  %v3764_v27 = vor.u32 %v3953_v24, %v3763_v22  ;;  %v3899_v24 = vld [vmem:[%s6569_s4 + $0x214] sm:$0xf] }
 0x35f   :  { %1217 = vst.msk [vmem:[#allocation2 + $0x110] sm:$0xff] %vm1182_vm5, %v1143_v20  ;;  %v3699_v20 = vld [vmem:[%s6569_s4 + $0x300] sm:$0xf] }
 0x360   :  { %3001 = vmatpush.bf16.msra.mxu3 %v3764_v27 }
 0x364   :  { %v1360_v31 = vpop.permute.xlu0 %1359  ;;  %v1362_v32 = vpop.permute.xlu1 %1361 }
 0x365   :  { %1434 = vst.msk [vmem:[#allocation2 + $0x110] sm:$0xff] %vm1399_vm6, %v1360_v31 }
 0x366   :  { %1651 = vst.msk [vmem:[#allocation2 + $0x110] sm:$0xff] %vm1616_vm7, %v1577_v58  ;;  %v3937_v58 = vld [vmem:[%s6569_s4 + $0x33c] sm:$0xf0] }
 0x367   :  { %1435 = vst.msk [vmem:[#allocation2 + $0x118] sm:$0xff] %vm1399_vm6, %v1362_v32  ;;  %v3700_v31 = vor.u32 %v3937_v58, %v3699_v20  ;;  %v3701_v32 = vld [vmem:[%s6569_s4 + $0x340] sm:$0xf0]  ;;  %v3867_v20 = vld [vmem:[%s6569_s4 + $0x114] sm:$0xf] }
 0x368   :  { %v3461_v58 = vld [vmem:[%s6569_s4 + $0x150] sm:$0xf0] }
 0x369   :  { %3002 = vmatpush.bf16.msra.mxu3 %v3700_v31  ;;  %v3851_v31 = vld [vmem:[%s6569_s4 + $0x94] sm:$0xf] }
 0x36c   :  { %v1579_v35 = vpop.permute.xlu0 %1578  ;;  %v1794_v33 = vpop.permute.xlu1 %1793 }
 0x36d   :  { %1652 = vst.msk [vmem:[#allocation2 + $0x118] sm:$0xff] %vm1616_vm7, %v1579_v35  ;;  %v3635_v35 = vld [vmem:[%s6569_s4 + $0x280] sm:$0xf] }
 0x36e   :  { %1869 = vst.msk [vmem:[#allocation2 + $0x118] sm:$0xff] %vm1833_vm8, %v1796_v34  ;;  %v3704_v34 = vor.u32 %v3929_v30, %v3701_v32  ;;  %v3464_v30 = vor.u32 %v3867_v20, %v3461_v58  ;;  %v3397_v32 = vld [vmem:[%s6569_s4 + $0xd0] sm:$0xf0]  ;;  %v3475_v20 = vld [vmem:[%s6569_s4 + $0x120] sm:$0xf] }
 0x36f   :  { %1868 = vst.msk [vmem:[#allocation2 + $0x110] sm:$0xff] %vm1833_vm8, %v1794_v33  ;;  %v3921_v33 = vld [vmem:[%s6569_s4 + $0x2bc] sm:$0xf0] }
 0x370   :  { %v3877_v58 = vld [vmem:[%s6569_s4 + $0x15c] sm:$0xf0] }
 0x375   :  { %v1905_v23 = vld [vmem:[#allocation2 + $0x118] sm:$0xff] }
 0x376   :  { %v2071_v36 = vpop.f32.mrf.mxu1  ;;  %v1904_v29 = vld [vmem:[#allocation2 + $0x110] sm:$0xff] }
 0x377   :  { %v1923_v28 = vpack.c.bf16 %v1905_v23, %v1904_v29  ;;  %v2072_v17 = vadd.f32 %v5699_v39, %v2071_v36  ;;  %v3637_v23 = vld [vmem:[%s6569_s4 + $0x2c0] sm:$0xf0]  ;;  %v3636_v36 = vor.u32 %v3921_v33, %v3635_v35  ;;  %v3315_v35 = vld [vmem:[%s6569_s4] sm:$0xf] }
 0x378   :  { %v3640_v29 = vor.u32 %v3913_v57, %v3637_v23  ;;  %v3841_v33 = vld [vmem:[%s6569_s4 + $0x3c] sm:$0xf0]  ;;  %v3833_v57 = vld [vmem:[%s6569_s4 + $0x4] sm:$0xf] }
 0x379   :  { %2085 = vmatmul.bf16.gmra.mxu2 %v1923_v28  ;;  %v2119_v48 = vmax.f32 %v2072_v17, 0.0  ;;  %v3905_v28 = vld [vmem:[%s6569_s4 + $0x23c] sm:$0xf0]  ;;  %v3897_v17 = vld [vmem:[%s6569_s4 + $0x204] sm:$0xf]  ;;  %3003 = vmatpush.bf16.msra.mxu3 %v3636_v36  ;;  %v3316_v23 = vor.u32 %v3841_v33, %v3315_v35 }
 0x37a   :  { %v3317_v36 = vld [vmem:[%s6569_s4 + $0x40] sm:$0xf0] }
 0x37e   :  { %v2073_v40 = vpop.f32.mrf.mxu1 }
 0x37f   :  { %v2074_v7 = vadd.f32 %v5699_v39, %v2073_v40  ;;  %v3573_v40 = vld [vmem:[%s6569_s4 + $0x240] sm:$0xf0] }
 0x380   :  { %v3576_v42 = vor.u32 %v3897_v17, %v3573_v40  ;;  %v3771_v40 = vld [vmem:[%s6569_s4 + $0x388] sm:$0xf] }
 0x381   :  { %v2120_v50 = vmax.f32 %v2074_v7, 0.0  ;;  %v3572_v7 = vor.u32 %v3905_v28, %v3571_v1  ;;  %v3333_v1 = vld [vmem:[%s6569_s4 + $0x50] sm:$0xf0]  ;;  %v3320_v28 = vor.u32 %v3833_v57, %v3317_v36  ;;  %v3858_v36 = vld [vmem:[%s6569_s4 + $0xc4] sm:$0xf0] }
 0x383   :  { %v2142_v41 = vpack.c.bf16 %v2120_v50, %v2119_v48  ;;  %v3889_v48 = vld [vmem:[%s6569_s4 + $0x1bc] sm:$0xf0]  ;;  %v3881_v50 = vld [vmem:[%s6569_s4 + $0x184] sm:$0xf]  ;;  %3004 = vmatpush.bf16.msra.mxu3 %v3572_v7  ;;  %v3779_v7 = vld [vmem:[%s6569_s4 + $0x390] sm:$0xf] }
 0x384   :  { %v3512_v49 = vor.u32 %v3881_v50, %v3509_v46  ;;  %v3957_v50 = vld [vmem:[%s6569_s4 + $0x3dc] sm:$0xf0] }
 0x385   :  { %2170 = vmatpush.bf16.msrb.mxu2 %v2142_v41  ;;  %v3508_v41 = vor.u32 %v3889_v48, %v3507_v43  ;;  %v3955_v43 = vld [vmem:[%s6569_s4 + $0x3cc] sm:$0xf0]  ;;  %v3795_v48 = vld [vmem:[%s6569_s4 + $0x3a0] sm:$0xf] }
 0x386   :  { %v3780_v46 = vor.u32 %v3955_v43, %v3779_v7  ;;  %v3842_v43 = vld [vmem:[%s6569_s4 + $0x44] sm:$0xf0] }
 0x387   :  { %3005 = vmatpush.bf16.msra.mxu3 %v3508_v41  ;;  %v3796_v41 = vor.u32 %v3957_v50, %v3795_v48  ;;  %v3331_v48 = vld [vmem:[%s6569_s4 + $0x10] sm:$0xf] }
 0x389   :  { %2171 = vmatpush.bf16.msrb.mxu2 %v2141_v51  ;;  %v3443_v51 = vld [vmem:[%s6569_s4 + $0x100] sm:$0xf] }
 0x38a   :  { %v3444_v63 = vor.u32 %v3873_v52, %v3443_v51  ;;  %v3938_v51 = vld [vmem:[%s6569_s4 + $0x344] sm:$0xf0]  ;;  %v3715_v52 = vld [vmem:[%s6569_s4 + $0x310] sm:$0xf] }
 0x38c   :  { %3006 = vmatpush.bf16.msra.mxu3 %v3444_v63  ;;  %v3643_v63 = vld [vmem:[%s6569_s4 + $0x288] sm:$0xf] }
 0x3ad   :  { %v2061_v55 = vpop.f32.mrf.mxu0 }
 0x3ae   :  { %v2062_v59 = vadd.f32 %v5699_v39, %v2061_v55 }
 0x3b0   :  { %v2115_v38 = vmax.f32 %v2062_v59, 0.0 }
 0x3b5   :  { %v2063_v62 = vpop.f32.mrf.mxu0 }
 0x3b6   :  { %v2064_v2 = vadd.f32 %v5699_v39, %v2063_v62 }
 0x3b8   :  { %v2116_v4 = vmax.f32 %v2064_v2, 0.0  ;;  %v3448_v2 = vor.u32 %v3865_v3, %v3445_v5  ;;  %v3939_v3 = vld [vmem:[%s6569_s4 + $0x34c] sm:$0xf0]  ;;  %v3731_v5 = vld [vmem:[%s6569_s4 + $0x320] sm:$0xf] }
 0x3ba   :  { %v2140_v11 = vpack.c.bf16 %v2116_v4, %v2115_v38  ;;  %v3857_v38 = vld [vmem:[%s6569_s4 + $0xbc] sm:$0xf0] }
 0x3bc   :  { %2172 = vmatpush.bf16.msrb.mxu2 %v2140_v11  ;;  %v3849_v11 = vld [vmem:[%s6569_s4 + $0x84] sm:$0xf] }
 0x3bd   :  { %v3384_v25 = vor.u32 %v3849_v11, %v3381_v44 }
 0x3c0   :  { %2173 = vmatpush.bf16.msrb.mxu2 %v2139_v13  ;;  %v3380_v13 = vor.u32 %v3857_v38, %v3379_v6  ;;  %v3651_v6 = vld [vmem:[%s6569_s4 + $0x290] sm:$0xf] }
 0x3c2   :  { %3007 = vmatpush.bf16.msra.mxu3 %v3380_v13  ;;  %v3907_v13 = vld [vmem:[%s6569_s4 + $0x24c] sm:$0xf0] }
 0x3c4   :  { %2174 = vmatpush.bf16.msrb.mxu2 %v2138_v12  ;;  %v3931_v12 = vld [vmem:[%s6569_s4 + $0x314] sm:$0xf] }
 0x3c6   :  { %3008 = vmatpush.bf16.msra.mxu3 %v3316_v23  ;;  %v3387_v23 = vld [vmem:[%s6569_s4 + $0x88] sm:$0xf] }
 0x3c8   :  { %2175 = vmatpush.bf16.msrb.mxu2 %v2137_v9  ;;  %v2150_v9 = vld [vmem:[#allocation1 + $0x12] sm:$0xff] }
 0x3cc   :  { %2176 = vmatpush.bf16.msrb.mxu2 %v5447_v45  ;;  %v3765_v45 = vld [vmem:[%s6569_s4 + $0x3c0] sm:$0xf0] }
 0x3cd   :  { %v3768_v53 = vor.u32 %v3945_v26, %v3765_v45  ;;  %v3589_v26 = vld [vmem:[%s6569_s4 + $0x250] sm:$0xf0] }
 0x3ce   :  { %v3592_v27 = vor.u32 %v3899_v24, %v3589_v26  ;;  %v3883_v45 = vld [vmem:[%s6569_s4 + $0x194] sm:$0xf] }
 0x3cf   :  { %2177 = vmatmul.bf16.vlgmr.msrb.gmra.mxu2 %v2149_v19  ;;  %3014 = vmatpush.bf16.msra.mxu1 %v3768_v53  ;;  %v3720_v19 = vor.u32 %v3931_v12, %v3717_v37  ;;  %v3515_v12 = vld [vmem:[%s6569_s4 + $0x188] sm:$0xf] }
 0x3d0   :  { %v3890_v37 = vld [vmem:[%s6569_s4 + $0x1c4] sm:$0xf0] }
 0x3d3   :  { %v2081_v14 = vpop.f32.mrf.mxu2  ;;  %3015 = vmatpush.bf16.msra.mxu1 %v3704_v34  ;;  %v3400_v34 = vor.u32 %v3851_v31, %v3397_v32 }
 0x3d4   :  { %v2082_v4 = vadd.f32 %v5699_v39, %v2081_v14  ;;  %v3653_v14 = vld [vmem:[%s6569_s4 + $0x2d0] sm:$0xf0] }
 0x3d5   :  { %v3656_v22 = vor.u32 %v3915_v21, %v3653_v14  ;;  %v3539_v21 = vld [vmem:[%s6569_s4 + $0x1a0] sm:$0xf]  ;;  %v2165_v33 = vpop.f32.mrf.mxu1 }
 0x3d6   :  { %v2123_v16 = vmax.f32 %v2082_v4, 0.0  ;;  %v3923_v4 = vld [vmem:[%s6569_s4 + $0x2cc] sm:$0xf0]  ;;  %v3893_v14 = vld [vmem:[%s6569_s4 + $0x1dc] sm:$0xf0] }
 0x3d7   :  { %3016 = vmatpush.bf16.msra.mxu1 %v3640_v29  ;;  %v3835_v29 = vld [vmem:[%s6569_s4 + $0x14] sm:$0xf]  ;;  %v3652_v11 = vor.u32 %v3923_v4, %v3651_v6  ;;  %v3540_v26 = vor.u32 %v3893_v14, %v3539_v21  ;;  %v3805_v6 = vld [vmem:[%s6569_s4 + $0x3e8] sm:$0xf0] }
 0x3d8   :  { %v3336_v17 = vor.u32 %v3835_v29, %v3333_v1  ;;  %v3395_v29 = vld [vmem:[%s6569_s4 + $0x90] sm:$0xf]  ;;  %v3388_v1 = vor.u32 %v3858_v36, %v3387_v23  ;;  %v3918_v21 = vld [vmem:[%s6569_s4 + $0x2ac] sm:$0xf] }
 0x3d9   :  { %v3677_v14 = vld [vmem:[%s6569_s4 + $0x2e8] sm:$0xf0] }
 0x3da   :  { %v3886_v23 = vld [vmem:[%s6569_s4 + $0x1ac] sm:$0xf] }
 0x3db   :  { %v2083_v15 = vpop.f32.mrf.mxu2  ;;  %3017 = vmatpush.bf16.msra.mxu1 %v3576_v42  ;;  %v3549_v36 = vld [vmem:[%s6569_s4 + $0x1e8] sm:$0xf0] }
 0x3dc   :  { %v2084_v59 = vadd.f32 %v5699_v39, %v2083_v15  ;;  %v3525_v15 = vld [vmem:[%s6569_s4 + $0x1d0] sm:$0xf0] }
 0x3dd   :  { %v3528_v53 = vor.u32 %v3883_v45, %v3525_v15  ;;  %v3874_v45 = vld [vmem:[%s6569_s4 + $0x144] sm:$0xf0]  ;;  %v3459_v15 = vld [vmem:[%s6569_s4 + $0x110] sm:$0xf]  ;;  %v2167_v57 = vpop.f32.mrf.mxu1 }
 0x3de   :  { %v2124_v47 = vmax.f32 %v2084_v59, 0.0  ;;  %v3716_v59 = vor.u32 %v3939_v3, %v3715_v52  ;;  %v3533_v57 = vld [vmem:[%s6569_s4 + $0x1d8] sm:$0xf0] }
 0x3df   :  { %3018 = vmatpush.bf16.msra.mxu1 %v3512_v49  ;;  %v3707_v49 = vld [vmem:[%s6569_s4 + $0x308] sm:$0xf] }
 0x3e0   :  { %v2144_v0 = vpack.c.bf16 %v2124_v47, %v2123_v16  ;;  %v3579_v47 = vld [vmem:[%s6569_s4 + $0x208] sm:$0xf]  ;;  %v3909_v16 = vld [vmem:[%s6569_s4 + $0x25c] sm:$0xf0] }
 0x3e3   :  { %3019 = vmatpush.bf16.msra.mxu1 %v3448_v2  ;;  %v3922_v2 = vld [vmem:[%s6569_s4 + $0x2c4] sm:$0xf0] }
 0x3e4   :  { %v3644_v38 = vor.u32 %v3922_v2, %v3643_v63  ;;  %v3789_v63 = vld [vmem:[%s6569_s4 + $0x3d8] sm:$0xf0]  ;;  %v3950_v2 = vld [vmem:[%s6569_s4 + $0x3ac] sm:$0xf] }
 0x3e7   :  { %3020 = vmatpush.bf16.msra.mxu1 %v3384_v25  ;;  %v3603_v25 = vld [vmem:[%s6569_s4 + $0x220] sm:$0xf] }
 0x3eb   :  { %3021 = vmatpush.bf16.msra.mxu1 %v3320_v28  ;;  %v3859_v28 = vld [vmem:[%s6569_s4 + $0xcc] sm:$0xf0] }
 0x3ef   :  { %3053 = vmatpush.bf16.msrb.mxu1 %v3780_v46  ;;  %v3843_v46 = vld [vmem:[%s6569_s4 + $0x4c] sm:$0xf0] }
 0x3f3   :  { %3054 = vmatpush.bf16.msrb.mxu1 %v3716_v59  ;;  %v3773_v59 = vld [vmem:[%s6569_s4 + $0x3c8] sm:$0xf0] }
 0x3f7   :  { %3055 = vmatpush.bf16.msrb.mxu1 %v3652_v11  ;;  %v3808_v11 = vor.u32 %v3950_v2, %v3805_v6  ;;  %v3836_v2 = vld [vmem:[%s6569_s4 + $0x1c] sm:$0xf] }
 0x3f8   :  { %v3341_v6 = vld [vmem:[%s6569_s4 + $0x58] sm:$0xf0] }
 0x3fc   :  { %v2086_v60 = vpop.f32.mrf.mxu2 }
 0x3fd   :  { %v2087_v54 = vadd.f32 %v5699_v39, %v2086_v60  ;;  %v3954_v60 = vld [vmem:[%s6569_s4 + $0x3c4] sm:$0xf0] }
 0x3fe   :  { %v3772_v42 = vor.u32 %v3954_v60, %v3771_v40  ;;  %v3861_v40 = vld [vmem:[%s6569_s4 + $0xdc] sm:$0xf0]  ;;  %v3396_v60 = vor.u32 %v3859_v28, %v3395_v29  ;;  %v3552_v28 = vor.u32 %v3886_v23, %v3549_v36  ;;  %v3627_v23 = vld [vmem:[%s6569_s4 + $0x238] sm:$0xf] }
 0x3ff   :  { %v2125_v8 = vmax.f32 %v2087_v54, 0.0  ;;  %v3708_v54 = vor.u32 %v3938_v51, %v3707_v49  ;;  %v3845_v49 = vld [vmem:[%s6569_s4 + $0x5c] sm:$0xf0]  ;;  %v3332_v51 = vor.u32 %v3843_v46, %v3331_v48  ;;  %v3912_v36 = vld [vmem:[%s6569_s4 + $0x274] sm:$0xf0] }
 0x400   :  { %3027 = vmatpush.bf16.msrb.mxu3 %v3772_v42  ;;  %v3323_v42 = vld [vmem:[%s6569_s4 + $0x8] sm:$0xf] }
 0x401   :  { %v3324_v50 = vor.u32 %v3842_v43, %v3323_v42  ;;  %v3870_v42 = vld [vmem:[%s6569_s4 + $0x12c] sm:$0xf] }
 0x402   :  { %v3485_v43 = vld [vmem:[%s6569_s4 + $0x168] sm:$0xf0] }
 0x403   :  { %v3488_v46 = vor.u32 %v3870_v42, %v3485_v43  ;;  %v3563_v42 = vld [vmem:[%s6569_s4 + $0x1b8] sm:$0xf] }
 0x404   :  { %v2088_v55 = vpop.f32.mrf.mxu2  ;;  %3028 = vmatpush.bf16.msrb.mxu3 %v3708_v54  ;;  %v3896_v43 = vld [vmem:[%s6569_s4 + $0x1f4] sm:$0xf0] }
 0x405   :  { %v2089_v62 = vadd.f32 %v5699_v39, %v2088_v55  ;;  %v3781_v39 = vld [vmem:[%s6569_s4 + $0x3d0] sm:$0xf0]  ;;  %v3941_v55 = vld [vmem:[%s6569_s4 + $0x35c] sm:$0xf0] }
 0x406   :  { %v3784_v18 = vor.u32 %v3947_v61, %v3781_v39  ;;  %v3587_v61 = vld [vmem:[%s6569_s4 + $0x210] sm:$0xf] }
 0x407   :  { %v2126_v10 = vmax.f32 %v2089_v62, 0.0  ;;  %v3732_v62 = vor.u32 %v3941_v55, %v3731_v5  ;;  %v3946_v55 = vld [vmem:[%s6569_s4 + $0x38c] sm:$0xf] }
 0x408   :  { %3029 = vmatpush.bf16.msrb.mxu3 %v3644_v38  ;;  %v3776_v4 = vor.u32 %v3946_v55, %v3773_v59  ;;  %v3834_v55 = vld [vmem:[%s6569_s4 + $0xc] sm:$0xf] }
 0x409   :  { %v2145_v56 = vpack.c.bf16 %v2126_v10, %v2125_v8  ;;  %v3667_v8 = vld [vmem:[%s6569_s4 + $0x2a0] sm:$0xf] }
 0x40a   :  { %v3925_v10 = vld [vmem:[%s6569_s4 + $0x2dc] sm:$0xf0] }
 0x40b   :  { %2188 = vmatpush.bf16.msra.mxu2 %v2145_v56  ;;  %v3668_v44 = vor.u32 %v3925_v10, %v3667_v8  ;;  %v3906_v56 = vld [vmem:[%s6569_s4 + $0x244] sm:$0xf0] }
 0x40c   :  { %v3580_v39 = vor.u32 %v3906_v56, %v3579_v47  ;;  %v3709_v47 = vld [vmem:[%s6569_s4 + $0x348] sm:$0xf0]  ;;  %v3932_v56 = vld [vmem:[%s6569_s4 + $0x31c] sm:$0xf] }
 0x40e   :  { %3030 = vmatpush.bf16.msrb.mxu3 %v3580_v39  ;;  %v3934_v39 = vld [vmem:[%s6569_s4 + $0x32c] sm:$0xf] }
 0x40f   :  { %2189 = vmatpush.bf16.msra.mxu2 %v2144_v0  ;;  %v3604_v0 = vor.u32 %v3909_v16, %v3603_v25 }
 0x412   :  { %3312 = vmatmul.msk.bf16.vlgmr.msra.gmra.mxu2 %vm2153_vm9, %v2150_v9  ;;  %v3523_v9 = vld [vmem:[%s6569_s4 + $0x190] sm:$0xf] }
 0x413   :  { %3066 = vmatpush.bf16.msrb.mxu2 %v3784_v18  ;;  %v3588_v18 = vor.u32 %v3907_v13, %v3587_v61  ;;  %v3725_v61 = vld [vmem:[%s6569_s4 + $0x358] sm:$0xf0]  ;;  %v3741_v13 = vld [vmem:[%s6569_s4 + $0x368] sm:$0xf0] }
 0x415   :  { %3056 = vmatpush.bf16.msrb.mxu1 %v3588_v18  ;;  %v3728_v18 = vor.u32 %v3932_v56, %v3725_v61  ;;  %v3819_v61 = vld [vmem:[%s6569_s4 + $0x3b8] sm:$0xf] }
 0x417   :  { %3067 = vmatpush.bf16.msrb.mxu2 %v3720_v19  ;;  %v3891_v19 = vld [vmem:[%s6569_s4 + $0x1cc] sm:$0xf0] }
 0x418   :  { %v3524_v24 = vor.u32 %v3891_v19, %v3523_v9  ;;  %v3916_v9 = vld [vmem:[%s6569_s4 + $0x29c] sm:$0xf] }
 0x419   :  { %v3661_v19 = vld [vmem:[%s6569_s4 + $0x2d8] sm:$0xf0] }
 0x41a   :  { %3057 = vmatpush.bf16.msrb.mxu1 %v3524_v24  ;;  %v3664_v24 = vor.u32 %v3916_v9, %v3661_v19  ;;  %v3739_v9 = vld [vmem:[%s6569_s4 + $0x328] sm:$0xf] }
 0x41b   :  { %3068 = vmatpush.bf16.msrb.mxu2 %v3656_v22  ;;  %v3516_v22 = vor.u32 %v3890_v37, %v3515_v12  ;;  %v3914_v12 = vld [vmem:[%s6569_s4 + $0x28c] sm:$0xf]  ;;  %v3942_v19 = vld [vmem:[%s6569_s4 + $0x364] sm:$0xf0] }
 0x41c   :  { %v3645_v37 = vld [vmem:[%s6569_s4 + $0x2c8] sm:$0xf0] }
 0x41d   :  { %3031 = vmatpush.bf16.msrb.mxu3 %v3516_v22  ;;  %v3648_v22 = vor.u32 %v3914_v12, %v3645_v37  ;;  %v3940_v37 = vld [vmem:[%s6569_s4 + $0x354] sm:$0xf0] }
 0x41f   :  { %3069 = vmatpush.bf16.msrb.mxu2 %v3592_v27  ;;  %v3451_v27 = vld [vmem:[%s6569_s4 + $0x108] sm:$0xf] }
 0x420   :  { %v3452_v31 = vor.u32 %v3874_v45, %v3451_v27  ;;  %v3898_v27 = vld [vmem:[%s6569_s4 + $0x20c] sm:$0xf] }
 0x421   :  { %v3581_v45 = vld [vmem:[%s6569_s4 + $0x248] sm:$0xf0] }
 0x422   :  { %3032 = vmatpush.bf16.msrb.mxu3 %v3452_v31 }
 0x423   :  { %3070 = vmatpush.bf16.msrb.mxu2 %v3528_v53  ;;  %v3875_v53 = vld [vmem:[%s6569_s4 + $0x14c] sm:$0xf0] }
 0x424   :  { %v3460_v32 = vor.u32 %v3875_v53, %v3459_v15  ;;  %v3900_v15 = vld [vmem:[%s6569_s4 + $0x21c] sm:$0xf] }
 0x425   :  { %v3597_v53 = vld [vmem:[%s6569_s4 + $0x258] sm:$0xf0] }
 0x426   :  { %3058 = vmatpush.bf16.msrb.mxu1 %v3460_v32  ;;  %3033 = vmatpush.bf16.msrb.mxu3 %v3388_v1  ;;  %v3600_v31 = vor.u32 %v3900_v15, %v3597_v53  ;;  %v3675_v15 = vld [vmem:[%s6569_s4 + $0x2a8] sm:$0xf] }
 0x427   :  { %3071 = vmatpush.bf16.msrb.mxu2 %v3464_v30  ;;  %v3926_v53 = vld [vmem:[%s6569_s4 + $0x2e4] sm:$0xf0] }
 0x42a   :  { %3059 = vmatpush.bf16.msrb.mxu1 %v3396_v60  ;;  %3034 = vmatpush.bf16.msrb.mxu3 %v3324_v50  ;;  %v3868_v60 = vld [vmem:[%s6569_s4 + $0x11c] sm:$0xf] }
 0x42b   :  { %3072 = vmatpush.bf16.msrb.mxu2 %v3400_v34  ;;  %v3476_v34 = vor.u32 %v3877_v58, %v3475_v20  ;;  %v3902_v20 = vld [vmem:[%s6569_s4 + $0x22c] sm:$0xf] }
 0x42c   :  { %v3613_v58 = vld [vmem:[%s6569_s4 + $0x268] sm:$0xf0] }
 0x42d   :  { %v3616_v32 = vor.u32 %v3902_v20, %v3613_v58  ;;  %v3691_v20 = vld [vmem:[%s6569_s4 + $0x2b8] sm:$0xf] }
 0x42e   :  { %3060 = vmatpush.bf16.msrb.mxu1 %v3332_v51  ;;  %v3852_v51 = vld [vmem:[%s6569_s4 + $0x9c] sm:$0xf]  ;;  %v3928_v58 = vld [vmem:[%s6569_s4 + $0x2f4] sm:$0xf0] }
 0x42f   :  { %3073 = vmatpush.bf16.msrb.mxu2 %v3336_v17  ;;  %v3411_v17 = vld [vmem:[%s6569_s4 + $0xa0] sm:$0xf] }
 0x430   :  { %v3412_v7 = vor.u32 %v3861_v40, %v3411_v17  ;;  %v3866_v17 = vld [vmem:[%s6569_s4 + $0x10c] sm:$0xf] }
 0x431   :  { %v3453_v40 = vld [vmem:[%s6569_s4 + $0x148] sm:$0xf0] }
 0x432   :  { %v3456_v48 = vor.u32 %v3866_v17, %v3453_v40  ;;  %v3628_v17 = vor.u32 %v3912_v36, %v3627_v23  ;;  %v3892_v40 = vld [vmem:[%s6569_s4 + $0x1d4] sm:$0xf0] }
 0x433   :  { %3105 = vmatpush.bf16.msra.mxu2 %v3796_v41  ;;  %v3347_v41 = vld [vmem:[%s6569_s4 + $0x20] sm:$0xf] }
 0x434   :  { %v3348_v52 = vor.u32 %v3845_v49, %v3347_v41  ;;  %v3850_v41 = vld [vmem:[%s6569_s4 + $0x8c] sm:$0xf] }
 0x435   :  { %v3389_v49 = vld [vmem:[%s6569_s4 + $0xc8] sm:$0xf0] }
 0x437   :  { %3106 = vmatpush.bf16.msra.mxu2 %v3732_v62  ;;  %v3948_v62 = vld [vmem:[%s6569_s4 + $0x39c] sm:$0xf] }
 0x438   :  { %v3792_v10 = vor.u32 %v3948_v62, %v3789_v63  ;;  %v3325_v63 = vld [vmem:[%s6569_s4 + $0x48] sm:$0xf0] }
 0x439   :  { %v3328_v56 = vor.u32 %v3834_v55, %v3325_v63  ;;  %v3860_v63 = vld [vmem:[%s6569_s4 + $0xd4] sm:$0xf0] }
 0x43b   :  { %3107 = vmatpush.bf16.msra.mxu2 %v3668_v44  ;;  %v3930_v44 = vld [vmem:[%s6569_s4 + $0x30c] sm:$0xf] }
 0x43c   :  { %v3712_v16 = vor.u32 %v3930_v44, %v3709_v47  ;;  %v3803_v44 = vld [vmem:[%s6569_s4 + $0x3a8] sm:$0xf] }
 0x43d   :  { %v3958_v47 = vld [vmem:[%s6569_s4 + $0x3e4] sm:$0xf0] }
 0x43f   :  { %3108 = vmatpush.bf16.msra.mxu2 %v3604_v0  ;;  %v3744_v0 = vor.u32 %v3934_v39, %v3741_v13  ;;  %v3960_v39 = vld [vmem:[%s6569_s4 + $0x3f4] sm:$0xf0]  ;;  %v3344_v13 = vor.u32 %v3836_v2, %v3341_v6  ;;  %v3419_v2 = vld [vmem:[%s6569_s4 + $0xa8] sm:$0xf] }
 0x440   :  { %v3820_v12 = vor.u32 %v3960_v39, %v3819_v61  ;;  %v3862_v6 = vld [vmem:[%s6569_s4 + $0xe4] sm:$0xf0] }
 0x441   :  { %v3355_v61 = vld [vmem:[%s6569_s4 + $0x28] sm:$0xf] }
 0x442   :  { %v3846_v39 = vld [vmem:[%s6569_s4 + $0x64] sm:$0xf0] }
 0x443   :  { %3109 = vmatpush.bf16.msra.mxu2 %v3540_v26  ;;  %v3680_v26 = vor.u32 %v3918_v21, %v3677_v14  ;;  %v3755_v21 = vld [vmem:[%s6569_s4 + $0x338] sm:$0xf] }
 0x444   :  { %v3944_v14 = vld [vmem:[%s6569_s4 + $0x374] sm:$0xf0] }
 0x447   :  { %3110 = vmatpush.bf16.msra.mxu2 %v3476_v34  ;;  %v3882_v34 = vld [vmem:[%s6569_s4 + $0x18c] sm:$0xf] }
 0x44b   :  { %3111 = vmatpush.bf16.msra.mxu2 %v3412_v7  ;;  %v3469_v7 = vld [vmem:[%s6569_s4 + $0x158] sm:$0xf0] }
 0x44c   :  { %v3472_v50 = vor.u32 %v3868_v60, %v3469_v7  ;;  %v3547_v60 = vld [vmem:[%s6569_s4 + $0x1a8] sm:$0xf] }
 0x44d   :  { %v3894_v7 = vld [vmem:[%s6569_s4 + $0x1e4] sm:$0xf0] }
 0x44f   :  { %3112 = vmatpush.bf16.msra.mxu2 %v3348_v52  ;;  %v3405_v52 = vld [vmem:[%s6569_s4 + $0xd8] sm:$0xf0] }
 0x450   :  { %v3408_v59 = vor.u32 %v3852_v51, %v3405_v52  ;;  %v3483_v51 = vld [vmem:[%s6569_s4 + $0x128] sm:$0xf] }
 0x451   :  { %v3878_v52 = vld [vmem:[%s6569_s4 + $0x164] sm:$0xf0] }
 0x452   :  { %v2178_v30 = vpop.f32.mrf.mxu2  ;;  %v3484_v55 = vor.u32 %v3878_v52, %v3483_v51  ;;  %v3855_v51 = vld [vmem:[%s6569_s4 + $0xb4] sm:$0xf] }
 0x453   :  { %v2179_v54 = vadd.f32 %v2178_v30, %v2165_v33  ;;  %v3584_v30 = vor.u32 %v3898_v27, %v3581_v45  ;;  %v3884_v33 = vld [vmem:[%s6569_s4 + $0x19c] sm:$0xf]  ;;  %v3756_v27 = vor.u32 %v3944_v14, %v3755_v21  ;;  %v3924_v45 = vld [vmem:[%s6569_s4 + $0x2d4] sm:$0xf0]  ;;  %v3429_v52 = vld [vmem:[%s6569_s4 + $0xf0] sm:$0xf0] }
 0x454   :  { %v3536_v1 = vor.u32 %v3884_v33, %v3533_v57  ;;  %v3611_v33 = vld [vmem:[%s6569_s4 + $0x228] sm:$0xf] }
 0x455   :  { %v3910_v57 = vld [vmem:[%s6569_s4 + $0x264] sm:$0xf0] }
 0x45a   :  { %v2180_v35 = vpop.f32.mrf.mxu2 }
 0x45b   :  { %v3517_v35 = vld [vmem:[%s6569_s4 + $0x1c8] sm:$0xf0] }
 0x45c   :  { %v3520_v29 = vor.u32 %v3882_v34, %v3517_v35  ;;  %v3692_v34 = vor.u32 %v3928_v58, %v3691_v20  ;;  %v3908_v35 = vld [vmem:[%s6569_s4 + $0x254] sm:$0xf0]  ;;  %v3669_v20 = vld [vmem:[%s6569_s4 + $0x2e0] sm:$0xf0]  ;;  %v3919_v58 = vld [vmem:[%s6569_s4 + $0x2b4] sm:$0xf] }
 0x495   :  { %v2191_v3 = vpop.f32.mrf.mxu2 }
 0x496   :  { %v2192_v5 = vadd.f32 %v2191_v3, %v2179_v54  ;;  %v3854_v54 = vld [vmem:[%s6569_s4 + $0xac] sm:$0xf] }
 0x497   :  { %v3421_v3 = vld [vmem:[%s6569_s4 + $0xe8] sm:$0xf0] }
 0x498   :  { %v2195_v38 = vmul.f32 0.00390625, %v2192_v5  ;;  %v3392_v5 = vor.u32 %v3850_v41, %v3389_v49  ;;  %v3424_v62 = vor.u32 %v3854_v54, %v3421_v3  ;;  %v3564_v41 = vor.u32 %v3896_v43, %v3563_v42  ;;  %v3876_v49 = vld [vmem:[%s6569_s4 + $0x154] sm:$0xf0]  ;;  %v3477_v42 = vld [vmem:[%s6569_s4 + $0x160] sm:$0xf0] }
 0x499   :  { %v3499_v54 = vld [vmem:[%s6569_s4 + $0x138] sm:$0xf]  ;;  %v3871_v43 = vld [vmem:[%s6569_s4 + $0x134] sm:$0xf] }
 0x49a   :  { %v6041_v8 = vpack.c.bf16 %v2195_v38, %v2195_v38  ;;  %v3838_v38 = vld [vmem:[%s6569_s4 + $0x2c] sm:$0xf]  ;;  %v3880_v3 = vld [vmem:[%s6569_s4 + $0x174] sm:$0xf0] }
 0x49c   :  { %3009 = vmatmul.bf16.vlgmr.msra.gmra.mxu3 %v6041_v8  ;;  %3022 = vmatmul.bf16.vlgmr.msra.gmra.mxu1 %v6041_v8 }
 0x49d   :  { %3040 = vmatpush.bf16.msra.mxu3 %v3776_v4  ;;  %3074 = vmatmul.bf16.vlgmr.msrb.gmra.mxu2 %v6041_v8  ;;  %v2193_v25 = vpop.f32.mrf.mxu2  ;;  %v3357_v4 = vld [vmem:[%s6569_s4 + $0x68] sm:$0xf0] }
 0x49e   :  { %3092 = vmatpush.bf16.msra.mxu1 %v3792_v10  ;;  %3144 = vmatpush.bf16.msrb.mxu2 %v3808_v11  ;;  %v3787_v10 = vld [vmem:[%s6569_s4 + $0x398] sm:$0xf]  ;;  %v3360_v25 = vor.u32 %v3838_v38, %v3357_v4 }
 0x49f   :  { %v3956_v11 = vld [vmem:[%s6569_s4 + $0x3d4] sm:$0xf0] }
 0x4a0   :  { %v3435_v38 = vld [vmem:[%s6569_s4 + $0xb8] sm:$0xf] }
 0x4a1   :  { %3041 = vmatpush.bf16.msra.mxu3 %v3712_v16  ;;  %v3788_v16 = vor.u32 %v3956_v11, %v3787_v10  ;;  %v3864_v4 = vld [vmem:[%s6569_s4 + $0xf4] sm:$0xf0]  ;;  %v3420_v11 = vor.u32 %v3862_v6, %v3419_v2  ;;  %v3959_v2 = vld [vmem:[%s6569_s4 + $0x3ec] sm:$0xf0] }
 0x4a2   :  { %3093 = vmatpush.bf16.msra.mxu1 %v3728_v18  ;;  %3145 = vmatpush.bf16.msrb.mxu2 %v3744_v0  ;;  %v3804_v18 = vor.u32 %v3958_v47, %v3803_v44  ;;  %v3723_v0 = vld [vmem:[%s6569_s4 + $0x318] sm:$0xf] }
 0x4a3   :  { %v3339_v44 = vld [vmem:[%s6569_s4 + $0x18] sm:$0xf] }
 0x4a4   :  { %v3844_v47 = vld [vmem:[%s6569_s4 + $0x54] sm:$0xf0] }
 0x4a5   :  { %3042 = vmatpush.bf16.msra.mxu3 %v3648_v22  ;;  %v3724_v22 = vor.u32 %v3940_v37, %v3723_v0  ;;  %v3951_v0 = vld [vmem:[%s6569_s4 + $0x3b4] sm:$0xf]  ;;  %v3340_v37 = vor.u32 %v3844_v47, %v3339_v44  ;;  %v3683_v47 = vld [vmem:[%s6569_s4 + $0x2b0] sm:$0xf] }
 0x4a6   :  { %3094 = vmatpush.bf16.msra.mxu1 %v3664_v24  ;;  %3146 = vmatpush.bf16.msrb.mxu2 %v3680_v26  ;;  %v3740_v24 = vor.u32 %v3942_v19, %v3739_v9  ;;  %v3659_v26 = vld [vmem:[%s6569_s4 + $0x298] sm:$0xf]  ;;  %v3356_v9 = vor.u32 %v3846_v39, %v3355_v61  ;;  %v3619_v39 = vld [vmem:[%s6569_s4 + $0x230] sm:$0xf] }
 0x4a9   :  { %3043 = vmatpush.bf16.msra.mxu3 %v3584_v30  ;;  %v3660_v30 = vor.u32 %v3924_v45, %v3659_v26  ;;  %v3935_v26 = vld [vmem:[%s6569_s4 + $0x334] sm:$0xf] }
 0x4aa   :  { %3095 = vmatpush.bf16.msra.mxu1 %v3600_v31  ;;  %3147 = vmatpush.bf16.msrb.mxu2 %v3616_v32  ;;  %v3676_v31 = vor.u32 %v3926_v53, %v3675_v15  ;;  %v3595_v32 = vld [vmem:[%s6569_s4 + $0x218] sm:$0xf]  ;;  %v3917_v53 = vld [vmem:[%s6569_s4 + $0x2a4] sm:$0xf] }
 0x4ac   :  { %3035 = vmatmul.bf16.vlgmr.msrb.gmra.mxu3 %v6041_v8  ;;  %3061 = vmatmul.bf16.vlgmr.msrb.gmra.mxu1 %v6041_v8 }
 0x4ad   :  { %3044 = vmatpush.bf16.msra.mxu3 %v3520_v29  ;;  %3113 = vmatmul.bf16.vlgmr.msra.gmra.mxu2 %v6041_v8  ;;  %v3596_v29 = vor.u32 %v3908_v35, %v3595_v32  ;;  %v3605_v35 = vld [vmem:[%s6569_s4 + $0x260] sm:$0xf0] }
 0x4ae   :  { %3096 = vmatpush.bf16.msra.mxu1 %v3536_v1  ;;  %3148 = vmatpush.bf16.msrb.mxu2 %v3552_v28  ;;  %v3612_v1 = vor.u32 %v3910_v57, %v3611_v33  ;;  %v3531_v28 = vld [vmem:[%s6569_s4 + $0x198] sm:$0xf]  ;;  %v3903_v33 = vld [vmem:[%s6569_s4 + $0x234] sm:$0xf] }
 0x4af   :  { %v3621_v57 = vld [vmem:[%s6569_s4 + $0x270] sm:$0xf0] }
 0x4b0   :  { %v3624_v36 = vor.u32 %v3903_v33, %v3621_v57  ;;  %v3629_v33 = vld [vmem:[%s6569_s4 + $0x278] sm:$0xf0] }
 0x4b1   :  { %3045 = vmatpush.bf16.msra.mxu3 %v3456_v48  ;;  %v3532_v48 = vor.u32 %v3892_v40, %v3531_v28  ;;  %v3887_v28 = vld [vmem:[%s6569_s4 + $0x1b4] sm:$0xf] }
 0x4b2   :  { %3097 = vmatpush.bf16.msra.mxu1 %v3472_v50  ;;  %3149 = vmatpush.bf16.msrb.mxu2 %v3488_v46  ;;  %v3548_v50 = vor.u32 %v3894_v7, %v3547_v60  ;;  %v3467_v46 = vld [vmem:[%s6569_s4 + $0x118] sm:$0xf]  ;;  %v3869_v7 = vld [vmem:[%s6569_s4 + $0x124] sm:$0xf] }
 0x4b5   :  { %3046 = vmatpush.bf16.msra.mxu3 %v3392_v5  ;;  %v3468_v5 = vor.u32 %v3876_v49, %v3467_v46  ;;  %v3413_v49 = vld [vmem:[%s6569_s4 + $0xe0] sm:$0xf0] }
 0x4b6   :  { %3098 = vmatpush.bf16.msra.mxu1 %v3408_v59  ;;  %3150 = vmatpush.bf16.msrb.mxu2 %v3424_v62  ;;  %v3403_v59 = vld [vmem:[%s6569_s4 + $0x98] sm:$0xf]  ;;  %v3500_v62 = vor.u32 %v3880_v3, %v3499_v54  ;;  %v3432_v3 = vor.u32 %v3855_v51, %v3429_v52  ;;  %v3856_v51 = vld [vmem:[%s6569_s4 + $0xbc] sm:$0xf] }
 0x4b7   :  { %v3404_v10 = vor.u32 %v3860_v63, %v3403_v59  ;;  %v3839_v59 = vld [vmem:[%s6569_s4 + $0x34] sm:$0xf]  ;;  %v3811_v63 = vld [vmem:[%s6569_s4 + $0x3b0] sm:$0xf]  ;;  %v3437_v52 = vld [vmem:[%s6569_s4 + $0xf8] sm:$0xf0] }
 0x4b9   :  { %3047 = vmatpush.bf16.msra.mxu3 %v3328_v56  ;;  %v3436_v56 = vor.u32 %v3864_v4, %v3435_v38  ;;  %v3812_v4 = vor.u32 %v3959_v2, %v3811_v63 }
 0x4ba   :  { %3099 = vmatpush.bf16.msra.mxu1 %v3344_v13  ;;  %3151 = vmatpush.bf16.msrb.mxu2 %v3360_v25  ;;  %v3371_v13 = vld [vmem:[%s6569_s4 + $0x38] sm:$0xf] }
 0x4bb   :  { %v3848_v25 = vld [vmem:[%s6569_s4 + $0x74] sm:$0xf0] }
 0x4bc   :  { %3048 = vmatmul.bf16.vlgmr.msra.gmra.mxu3 %v6041_v8  ;;  %v3372_v19 = vor.u32 %v3848_v25, %v3371_v13  ;;  %v3911_v13 = vld [vmem:[%s6569_s4 + $0x26c] sm:$0xf0] }
 0x4bd   :  { %3079 = vmatpush.bf16.msrb.mxu3 %v3788_v16  ;;  %3100 = vmatmul.bf16.vlgmr.msra.gmra.mxu1 %v6041_v8  ;;  %v3949_v16 = vld [vmem:[%s6569_s4 + $0x3a4] sm:$0xf]  ;;  %v3620_v25 = vor.u32 %v3911_v13, %v3619_v39  ;;  %v6534_v13 = vld [vmem:[%s6570_s5 + $0x8] sm:$0xff] }
 0x4be   :  { %3131 = vmatpush.bf16.msrb.mxu1 %v3804_v18  ;;  %3183 = vmatpush.bf16.msra.mxu2 %v3820_v12  ;;  %v3797_v18 = vld [vmem:[%s6569_s4 + $0x3e0] sm:$0xf0]  ;;  %v3813_v12 = vld [vmem:[%s6569_s4 + $0x3f0] sm:$0xf0] }
 0x4bf   :  { %3152 = vmatmul.bf16.vlgmr.msrb.gmra.mxu2 %v6041_v8  ;;  %v3800_v21 = vor.u32 %v3949_v16, %v3797_v18  ;;  %v3816_v14 = vor.u32 %v3951_v0, %v3813_v12  ;;  %v3555_v16 = vld [vmem:[%s6569_s4 + $0x1b0] sm:$0xf] }
 0x4c0   :  { %v3895_v18 = vld [vmem:[%s6569_s4 + $0x1ec] sm:$0xf0] }
 0x4c1   :  { %3080 = vmatpush.bf16.msrb.mxu3 %v3724_v22  ;;  %v3933_v22 = vld [vmem:[%s6569_s4 + $0x324] sm:$0xf]  ;;  %v3556_v0 = vor.u32 %v3895_v18, %v3555_v16  ;;  %v3491_v12 = vld [vmem:[%s6569_s4 + $0x130] sm:$0xf] }
 0x4c2   :  { %3132 = vmatpush.bf16.msrb.mxu1 %v3740_v24  ;;  %3184 = vmatpush.bf16.msra.mxu2 %v3756_v27  ;;  %v3733_v24 = vld [vmem:[%s6569_s4 + $0x360] sm:$0xf0]  ;;  %v3749_v27 = vld [vmem:[%s6569_s4 + $0x370] sm:$0xf0] }
 0x4c3   :  { %v3736_v45 = vor.u32 %v3933_v22, %v3733_v24  ;;  %v3752_v15 = vor.u32 %v3935_v26, %v3749_v27  ;;  %v3363_v22 = vld [vmem:[%s6569_s4 + $0x30] sm:$0xf]  ;;  %v3952_v26 = vld [vmem:[%s6569_s4 + $0x3bc] sm:$0xf] }
 0x4c4   :  { %v3847_v24 = vld [vmem:[%s6569_s4 + $0x6c] sm:$0xf0]  ;;  %v3821_v27 = vld [vmem:[%s6569_s4 + $0x3f8] sm:$0xf0] }
 0x4c5   :  { %3081 = vmatpush.bf16.msrb.mxu3 %v3660_v30  ;;  %v3685_v30 = vld [vmem:[%s6569_s4 + $0x2f0] sm:$0xf0] }
 0x4c6   :  { %3133 = vmatpush.bf16.msrb.mxu1 %v3676_v31  ;;  %3185 = vmatpush.bf16.msra.mxu2 %v3692_v34  ;;  %v3672_v31 = vor.u32 %v3917_v53, %v3669_v20  ;;  %v3688_v32 = vor.u32 %v3919_v58, %v3685_v30  ;;  %v3901_v34 = vld [vmem:[%s6569_s4 + $0x224] sm:$0xf]  ;;  %v3936_v53 = vld [vmem:[%s6569_s4 + $0x33c] sm:$0xf] }
 0x4c7   :  { %v3608_v23 = vor.u32 %v3901_v34, %v3605_v35  ;;  %v3757_v20 = vld [vmem:[%s6569_s4 + $0x378] sm:$0xf0] }
 0x4c8   :  { %v3760_v58 = vor.u32 %v3936_v53, %v3757_v20  ;;  %v3920_v30 = vld [vmem:[%s6569_s4 + $0x2bc] sm:$0xf] }
 0x4c9   :  { %3082 = vmatpush.bf16.msrb.mxu3 %v3596_v29  ;;  %v3885_v29 = vld [vmem:[%s6569_s4 + $0x1a4] sm:$0xf]  ;;  %v3904_v35 = vld [vmem:[%s6569_s4 + $0x23c] sm:$0xf] }
 0x4ca   :  { %3134 = vmatpush.bf16.msrb.mxu1 %v3612_v1  ;;  %3186 = vmatpush.bf16.msra.mxu2 %v3628_v17  ;;  %v3541_v1 = vld [vmem:[%s6569_s4 + $0x1e0] sm:$0xf0]  ;;  %v3557_v17 = vld [vmem:[%s6569_s4 + $0x1f0] sm:$0xf0] }
 0x4cb   :  { %v3544_v40 = vor.u32 %v3885_v29, %v3541_v1  ;;  %v3560_v60 = vor.u32 %v3887_v28, %v3557_v17  ;;  %v3888_v29 = vld [vmem:[%s6569_s4 + $0x1bc] sm:$0xf] }
 0x4cc   :  { %v3565_v1 = vld [vmem:[%s6569_s4 + $0x1f8] sm:$0xf0] }
 0x4cd   :  { %3083 = vmatpush.bf16.msrb.mxu3 %v3532_v48  ;;  %v3493_v48 = vld [vmem:[%s6569_s4 + $0x170] sm:$0xf0] }
 0x4ce   :  { %3135 = vmatpush.bf16.msrb.mxu1 %v3548_v50  ;;  %3187 = vmatpush.bf16.msra.mxu2 %v3564_v41  ;;  %v3480_v50 = vor.u32 %v3869_v7, %v3477_v42  ;;  %v3496_v46 = vor.u32 %v3871_v43, %v3493_v48  ;;  %v3853_v41 = vld [vmem:[%s6569_s4 + $0xa4] sm:$0xf]  ;;  %v3872_v7 = vld [vmem:[%s6569_s4 + $0x13c] sm:$0xf] }
 0x4cf   :  { %v3416_v54 = vor.u32 %v3853_v41, %v3413_v49  ;;  %v3501_v42 = vld [vmem:[%s6569_s4 + $0x178] sm:$0xf0] }
 0x4d0   :  { %v3504_v49 = vor.u32 %v3872_v7, %v3501_v42 }
 0x4d1   :  { %3084 = vmatpush.bf16.msrb.mxu3 %v3468_v5  ;;  %v3837_v5 = vld [vmem:[%s6569_s4 + $0x24] sm:$0xf] }
 0x4d2   :  { %3136 = vmatpush.bf16.msrb.mxu1 %v3484_v55  ;;  %3188 = vmatpush.bf16.msra.mxu2 %v3500_v62  ;;  %v3349_v55 = vld [vmem:[%s6569_s4 + $0x60] sm:$0xf0]  ;;  %v3365_v62 = vld [vmem:[%s6569_s4 + $0x70] sm:$0xf0] }
 0x4d3   :  { %v3352_v6 = vor.u32 %v3837_v5, %v3349_v55  ;;  %v3368_v38 = vor.u32 %v3839_v59, %v3365_v62  ;;  %v3840_v5 = vld [vmem:[%s6569_s4 + $0x3c] sm:$0xf] }
 0x4d4   :  { %v3373_v55 = vld [vmem:[%s6569_s4 + $0x78] sm:$0xf0] }
 0x4d5   :  { %3085 = vmatpush.bf16.msrb.mxu3 %v3404_v10  ;;  %v3747_v10 = vld [vmem:[%s6569_s4 + $0x330] sm:$0xf]  ;;  %v3376_v63 = vor.u32 %v3840_v5, %v3373_v55 }
 0x4d6   :  { %3137 = vmatpush.bf16.msrb.mxu1 %v3420_v11  ;;  %3189 = vmatpush.bf16.msra.mxu2 %v3436_v56  ;;  %v3943_v11 = vld [vmem:[%s6569_s4 + $0x36c] sm:$0xf0] }
 0x4d7   :  { %v3748_v44 = vor.u32 %v3943_v11, %v3747_v10  ;;  %v3927_v56 = vld [vmem:[%s6569_s4 + $0x2ec] sm:$0xf0] }
 0x4d8   :  { %v3684_v61 = vor.u32 %v3927_v56, %v3683_v47 }
 0x4d9   :  { %3086 = vmatpush.bf16.msrb.mxu3 %v3340_v37  ;;  %v3879_v37 = vld [vmem:[%s6569_s4 + $0x16c] sm:$0xf0] }
 0x4da   :  { %3138 = vmatpush.bf16.msrb.mxu1 %v3356_v9  ;;  %3190 = vmatpush.bf16.msra.mxu2 %v3372_v19  ;;  %v3492_v9 = vor.u32 %v3879_v37, %v3491_v12  ;;  %v3427_v19 = vld [vmem:[%s6569_s4 + $0xb0] sm:$0xf] }
 0x4dc   :  { %3087 = vmatmul.bf16.vlgmr.msrb.gmra.mxu3 %v6041_v8 }
 0x4dd   :  { %3118 = vmatpush.bf16.msra.mxu3 %v3800_v21  ;;  %3139 = vmatmul.bf16.vlgmr.msrb.gmra.mxu1 %v6041_v8  ;;  %v3863_v21 = vld [vmem:[%s6569_s4 + $0xec] sm:$0xf0] }
 0x4de   :  { %3170 = vmatpush.bf16.msra.mxu1 %v3816_v14  ;;  %3191 = vmatmul.bf16.vlgmr.msra.gmra.mxu2 %v6041_v8  ;;  %v3428_v14 = vor.u32 %v3863_v21, %v3427_v19 }
 0x4e1   :  { %3119 = vmatpush.bf16.msra.mxu3 %v3736_v45  ;;  %v3364_v45 = vor.u32 %v3847_v24, %v3363_v22 }
 0x4e2   :  { %3171 = vmatpush.bf16.msra.mxu1 %v3752_v15  ;;  %v3824_v15 = vor.u32 %v3952_v26, %v3821_v27 }
 0x4e5   :  { %3120 = vmatpush.bf16.msra.mxu3 %v3672_v31  ;;  %v3693_v31 = vld [vmem:[%s6569_s4 + $0x2f8] sm:$0xf0] }
 0x4e6   :  { %3172 = vmatpush.bf16.msra.mxu1 %v3688_v32  ;;  %v6493_v32 = vld [vmem:[%s6570_s5] sm:$0xff]  ;;  %v3696_v34 = vor.u32 %v3920_v30, %v3693_v31  ;;  %s4024_s5 = smov [#allocation3]  }
 0x4e7   :  { %v2970_v57 = vperm.slane %v6493_v32, 1  ;;  %v2969_v17 = vperm.slane %v6493_v32, 0  ;;  %v2972_v16 = vperm.slane %v6493_v32, 3  ;;  %v2973_v18 = vperm.slane %v6493_v32, 4  ;;  %s3269_s16 = sshll.u32 %s4024_s5, 4  ;;  %s3270_s16 = int_to_ptr.vmem [resolvable:$true] %s3269_s16 }
 0x4e8   :  { %v2974_v37 = vperm.slane %v6493_v32, 5  ;;  %v2976_v19 = vperm.slane %v6493_v32, 7 }
 0x4e9   :  { %3121 = vmatpush.bf16.msra.mxu3 %v3608_v23 }
 0x4ea   :  { %3173 = vmatpush.bf16.msra.mxu1 %v3624_v36  ;;  %v3632_v36 = vor.u32 %v3904_v35, %v3629_v33 }
 0x4ed   :  { %3122 = vmatpush.bf16.msra.mxu3 %v3544_v40  ;;  %v3568_v40 = vor.u32 %v3888_v29, %v3565_v1 }
 0x4ee   :  { %3174 = vmatpush.bf16.msra.mxu1 %v3560_v60 }
 0x4f1   :  { %3123 = vmatpush.bf16.msra.mxu3 %v3480_v50 }
 0x4f2   :  { %3175 = vmatpush.bf16.msra.mxu1 %v3496_v46 }
 0x4f5   :  { %3124 = vmatpush.bf16.msra.mxu3 %v3416_v54  ;;  %v3440_v54 = vor.u32 %v3856_v51, %v3437_v52 }
 0x4f6   :  { %3176 = vmatpush.bf16.msra.mxu1 %v3432_v3 }
 0x4f9   :  { %3125 = vmatpush.bf16.msra.mxu3 %v3352_v6 }
 0x4fa   :  { %3177 = vmatpush.bf16.msra.mxu1 %v3368_v38 }
 0x4fc   :  { %3126 = vmatmul.bf16.vlgmr.msra.gmra.mxu3 %v6041_v8 }
 0x4fd   :  { %3157 = vmatpush.bf16.msrb.mxu3 %v3812_v4  ;;  %3178 = vmatmul.bf16.vlgmr.msra.gmra.mxu1 %v6041_v8 }
 0x501   :  { %3158 = vmatpush.bf16.msrb.mxu3 %v3748_v44 }
 0x505   :  { %3159 = vmatpush.bf16.msrb.mxu3 %v3684_v61 }
 0x509   :  { %3160 = vmatpush.bf16.msrb.mxu3 %v3620_v25  ;;  %v2980_v25 = vperm.slane %v6534_v13, 3 }
 0x50d   :  { %3161 = vmatpush.bf16.msrb.mxu3 %v3556_v0  ;;  %v2971_v0 = vperm.slane %v6493_v32, 2 }
 0x511   :  { %3162 = vmatpush.bf16.msrb.mxu3 %v3492_v9 }
 0x515   :  { %3163 = vmatpush.bf16.msrb.mxu3 %v3428_v14 }
 0x519   :  { %3164 = vmatpush.bf16.msrb.mxu3 %v3364_v45  ;;  %v3023_v23 = vpop.f32.mrf.mxu1  ;;  %v2975_v45 = vperm.slane %v6493_v32, 6 }
 0x51a   :  { %v3024_v28 = vadd.f32 %v3023_v23, %v2970_v57 }
 0x51c   :  { %3165 = vmatmul.bf16.vlgmr.msrb.gmra.mxu3 %v6041_v8  ;;  %v3225_v43 = vrot.slane %v3024_v28, 7 }
 0x51d   :  { %3196 = vmatpush.bf16.msra.mxu3 %v3824_v15 }
 0x51f   :  { %v3010_v60 = vpop.f32.mrf.mxu3 }
 0x520   :  { %v3011_v48 = vadd.f32 %v3010_v60, %v2969_v17  ;;  %v3075_v50 = vpop.f32.mrf.mxu2 }
 0x521   :  { %3197 = vmatpush.bf16.msra.mxu3 %v3760_v58  ;;  %v3025_v46 = vpop.f32.mrf.mxu1  ;;  %v3076_v15 = vadd.f32 %v3075_v50, %v2974_v37  ;;  %v2977_v50 = vperm.slane %v6534_v13, 0 }
 0x522   :  { %v6516_v41 = vsel %vm3239_vm10, %v3011_v48, %v3225_v43  ;;  %v2978_v48 = vperm.slane %v6534_v13, 1 }
 0x523   :  { %v3229_v57 = vrot.slane %v3076_v15, 3 }
 0x525   :  { %3198 = vmatpush.bf16.msra.mxu3 %v3696_v34 }
 0x527   :  { %v3012_v3 = vpop.f32.mrf.mxu3 }
 0x528   :  { %v3077_v59 = vpop.f32.mrf.mxu2 }
 0x529   :  { %3199 = vmatpush.bf16.msra.mxu3 %v3632_v36  ;;  %v3062_v62 = vpop.f32.mrf.mxu1 }
 0x52a   :  { %v3063_v22 = vadd.f32 %v3062_v62, %v2973_v18  ;;  %v2981_v62 = vperm.slane %v6534_v13, 4 }
 0x52c   :  { %v3228_v31 = vrot.slane %v3063_v22, 4 }
 0x52d   :  { %3200 = vmatpush.bf16.msra.mxu3 %v3568_v40 }
 0x52e   :  { %v3246_v32 = vsel %vm3245_vm12, %v3228_v31, %v3229_v57 }
 0x52f   :  { %v3036_v2 = vpop.f32.mrf.mxu3 }
 0x530   :  { %v3114_v6 = vpop.f32.mrf.mxu2  ;;  %v3037_v24 = vadd.f32 %v3036_v2, %v2971_v0  ;;  %v2982_v2 = vperm.slane %v6534_v13, 5 }
 0x531   :  { %3201 = vmatpush.bf16.msra.mxu3 %v3504_v49  ;;  %v3064_v38 = vpop.f32.mrf.mxu1  ;;  %v3115_v51 = vadd.f32 %v3114_v6, %v2977_v50 }
 0x532   :  { %v3226_v34 = vrot.slane %v3037_v24, 6 }
 0x535   :  { %3202 = vmatpush.bf16.msra.mxu3 %v3440_v54 }
 0x537   :  { %v3038_v4 = vpop.f32.mrf.mxu3 }
 0x538   :  { %v3116_v10 = vpop.f32.mrf.mxu2  ;;  %v2984_v4 = vperm.slane %v6534_v13, 7 }
 0x539   :  { %3203 = vmatpush.bf16.msra.mxu3 %v3376_v63  ;;  %v2983_v63 = vperm.slane %v6534_v13, 6 }
 0x53a   :  { %v3101_v11 = vpop.f32.mrf.mxu1 }
 0x53b   :  { %v3102_v53 = vadd.f32 %v3101_v11, %v2976_v19 }
 0x53c   :  { %3204 = vmatmul.bf16.vlgmr.msra.gmra.mxu3 %v6041_v8  ;;  %v2979_v8 = vperm.slane %v6534_v13, 2 }
 0x53d   :  { %v3231_v36 = vrot.slane %v3102_v53, 1 }
 0x53f   :  { %v3049_v44 = vpop.f32.mrf.mxu3 }
 0x540   :  { %v3050_v21 = vadd.f32 %v3049_v44, %v2972_v16 }
 0x542   :  { %v3153_v47 = vpop.f32.mrf.mxu2  ;;  %v3103_v56 = vpop.f32.mrf.mxu1  ;;  %v3227_v20 = vrot.slane %v3050_v21, 5 }
 0x543   :  { %v3154_v12 = vadd.f32 %v3153_v47, %v2980_v25 }
 0x544   :  { %v3242_v29 = vsel %vm3241_vm11, %v3226_v34, %v3227_v20 }
 0x545   :  { %v3234_v26 = vrot.slane %v3154_v12, 5  ;;  %v3244_v17 = vsel %vm3243_vm13, %v6516_v41, %v3242_v29 }
 0x547   :  { %v3051_v61 = vpop.f32.mrf.mxu3 }
 0x54a   :  { %v3155_v39 = vpop.f32.mrf.mxu2 }
 0x55a   :  { %v3140_v9 = vpop.f32.mrf.mxu1 }
 0x55b   :  { %v3141_v14 = vadd.f32 %v3140_v9, %v2979_v8 }
 0x55d   :  { %v3233_v27 = vrot.slane %v3141_v14, 6 }
 0x55f   :  { %v3254_v58 = vsel %vm3241_vm11, %v3233_v27, %v3234_v26  ;;  %v3088_v30 = vpop.f32.mrf.mxu3 }
 0x560   :  { %v3089_v35 = vadd.f32 %v3088_v30, %v2975_v45 }
 0x561   :  { %v3192_v33 = vpop.f32.mrf.mxu2 }
 0x562   :  { %v3142_v23 = vpop.f32.mrf.mxu1  ;;  %v3230_v1 = vrot.slane %v3089_v35, 2  ;;  %v3193_v10 = vadd.f32 %v3192_v33, %v2983_v63 }
 0x564   :  { %v3248_v28 = vsel %vm3247_vm14, %v3230_v1, %v3231_v36  ;;  %v3237_v56 = vrot.slane %v3193_v10, 2 }
 0x565   :  { %v3250_v40 = vsel %vm3249_vm15, %v3246_v32, %v3248_v28 }
 0x566   :  { %v3252_v60 = vsel %vm3251_vm0, %v3244_v17, %v3250_v40 }
 0x567   :  { %v3090_v7 = vpop.f32.mrf.mxu3  ;;  %3262 = vst [vmem:[#allocation3] sm:$0xff] %v3252_v60 }
 0x569   :  { %v3194_v42 = vpop.f32.mrf.mxu2 }
 0x57a   :  { %v3179_v43 = vpop.f32.mrf.mxu1 }
 0x57b   :  { %v3180_v6 = vadd.f32 %v3179_v43, %v2982_v2 }
 0x57d   :  { %v3236_v61 = vrot.slane %v3180_v6, 3 }
 0x57f   :  { %v3127_v46 = vpop.f32.mrf.mxu3 }
 0x580   :  { %v3128_v49 = vadd.f32 %v3127_v46, %v2978_v48 }
 0x582   :  { %v3232_v52 = vrot.slane %v3128_v49, 7  ;;  %v3181_v54 = vpop.f32.mrf.mxu1 }
 0x584   :  { %v3253_v3 = vsel %vm3239_vm10, %v3115_v51, %v3232_v52 }
 0x585   :  { %v3255_v41 = vsel %vm3243_vm13, %v3253_v3, %v3254_v58 }
 0x587   :  { %v3129_v5 = vpop.f32.mrf.mxu3 }
 0x59f   :  { %v3166_v55 = vpop.f32.mrf.mxu3 }
 0x5a0   :  { %v3167_v38 = vadd.f32 %v3166_v55, %v2981_v62 }
 0x5a2   :  { %v3235_v44 = vrot.slane %v3167_v38, 4 }
 0x5a4   :  { %v3256_v25 = vsel %vm3245_vm12, %v3235_v44, %v3236_v61 }
 0x5a7   :  { %v3168_v59 = vpop.f32.mrf.mxu3 }
 0x5bf   :  { %v3205_v11 = vpop.f32.mrf.mxu3 }
 0x5c0   :  { %v3206_v47 = vadd.f32 %v3205_v11, %v2984_v4 }
 0x5c2   :  { %v3238_v39 = vrot.slane %v3206_v47, 1 }
 0x5c4   :  { %v3257_v16 = vsel %vm3247_vm14, %v3237_v56, %v3238_v39 }
 0x5c5   :  { %v3258_v13 = vsel %vm3249_vm15, %v3256_v25, %v3257_v16 }
 0x5c6   :  { %v3259_v8 = vsel %vm3251_vm0, %v3255_v41, %v3258_v13 }
 0x5c7   :  { %v3207_v18 = vpop.f32.mrf.mxu3  ;;  %3263 = vst [vmem:[#allocation3 + $0x8] sm:$0xff] %v3259_v8 }
 0x5c8   :  { %3274 = dma.vmem_to_hbm [thread:$0]  %s3270_s16, 256, %s3272_s18, [#allocation4]  }
 0x5c9   :  { %4013 = dma.done.wait [#allocation4], 256  }
 0x5ca   :  { %4014 = vsyncadd [#allocation4], 4294967040 }
 0x5cb   :  { %3279 = vsyncpa [#allocation4], 1 }

</bundles_post_ra>
